<compile_context>
chip_gen: v7x
topology: tpu7x:2x2x1
jax: 0.10.0
libtpu: 0.0.40
codegen_flags: <defaults>
</compile_context>

<pallas_src>
import functools

import jax
import jax.numpy as jnp
from jax.experimental import pallas as pl
from jax.experimental.pallas import tpu as pltpu


# ----------------------------------------------------------------------------
# Fused kernel: LSTM recurrence (all layers / directions / timesteps) + fc1 + softmax
# Gate column layout per layer (width 8H): [i_f,i_b, f_f,f_b, g_f,g_b, o_f,o_b]
# State layout per layer (width 2H):       [fwd | bwd]
# ----------------------------------------------------------------------------
def name_format_kernel(gx0_ref, whh0_ref, wrec_ref, brec_ref, wfc_ref, bfc_ref,
                       out_ref, *, seq_len, batch_pad, hidden_sz, num_layers):
    S, Bp, H, L = seq_len, batch_pad, hidden_sz, num_layers
    G = 8 * H
    Op = out_ref.shape[1]

    # ---- hoisted constants (emitted once, NOT re-emitted per unrolled step) ----
    # Single transcendental per gate slab:
    #   sigmoid blocks: sigmoid(x);  cell-candidate block: tanh(x) = 2*sigmoid(2x) - 1
    lane = jax.lax.broadcasted_iota(jnp.int32, (Bp, G), 1)
    is_g = (lane >= 4 * H) & (lane < 6 * H)
    scale = jnp.where(is_g, 2.0, 1.0).astype(jnp.float32)
    shift = jnp.where(is_g, -1.0, 0.0).astype(jnp.float32)
    # Per-layer biases for layers 1..L-1, pre-broadcast once.
    # (Layer-0 bias is folded into the gx0 gather table at pack time.)
    bias = [jnp.broadcast_to(brec_ref[l], (Bp, G)) for l in range(L - 1)]

    # Carried per-layer state, both directions packed on the lane axis [fwd | bwd].
    hc = [jnp.zeros((Bp, 2 * H), jnp.float32) for _ in range(L)]
    cc = [jnp.zeros((Bp, 2 * H), jnp.float32) for _ in range(L)]

    # Fully unrolled recurrence: one K=64 matmul for layer 0 and one fused K=128
    # matmul for each layer > 0 per timestep (no grid, no scratch copies).
    for t in range(S):
        for l in range(L):
            if l == 0:
                gates = gx0_ref[t] + jnp.dot(
                    hc[0].astype(jnp.bfloat16), whh0_ref[...],
                    preferred_element_type=jnp.float32)
            else:
                lhs = jnp.concatenate([hc[l - 1], hc[l]], axis=1)   # (Bp, 4H) = 128 lanes
                gates = jnp.dot(lhs.astype(jnp.bfloat16), wrec_ref[l - 1],
                                preferred_element_type=jnp.float32) + bias[l - 1]
            act = jax.nn.sigmoid(gates * scale) * scale + shift
            i_g = act[:, 0 * H:2 * H]
            f_g = act[:, 2 * H:4 * H]
            g_g = act[:, 4 * H:6 * H]
            o_g = act[:, 6 * H:8 * H]
            cc[l] = f_g * cc[l] + i_g * g_g
            hc[l] = o_g * jnp.tanh(cc[l])

    # ---- epilogue: concat-free fc1 (per-layer bf16 partial matmuls) + softmax ----
    logits = jnp.broadcast_to(bfc_ref[...], (Bp, Op))   # pad lanes carry -1e30 bias
    for l in range(L):
        logits = logits + jnp.dot(hc[l].astype(jnp.bfloat16), wfc_ref[2 * l],
                                  preferred_element_type=jnp.float32)
        logits = logits + jnp.dot(cc[l].astype(jnp.bfloat16), wfc_ref[2 * l + 1],
                                  preferred_element_type=jnp.float32)
    m = jnp.max(logits, axis=1, keepdims=True)
    e = jnp.exp(logits - m)
    # TODO(synk): nn.Dropout(p=0.1) is identity at inference time; not applied.
    out_ref[...] = e / jnp.sum(e, axis=1, keepdims=True)


# ----------------------------------------------------------------------------
# Wrapper: layer-0 gate-table gather (host-side glue) + one gridless pallas_call.
# ----------------------------------------------------------------------------
def name_format_forward(tokens, kparams, *, hidden_sz, num_layers, output_sz):
    S, B = tokens.shape
    H, L = hidden_sz, num_layers
    Bp = max(8, -(-B // 8) * 8)                 # pad batch to full sublane tiles
    Opad = kparams["b_fc"].shape[1]

    # Embedding + layer-0 input projection + bias, prebaked as a table lookup.
    gx0 = kparams["gx0_table"][tokens]                      # (S, B, 8H)
    gx0 = jnp.pad(gx0, ((0, 0), (0, Bp - B), (0, 0)))       # (S, Bp, 8H): aligned tiles

    out_padded = pl.pallas_call(
        functools.partial(name_format_kernel, seq_len=S, batch_pad=Bp,
                          hidden_sz=H, num_layers=L),
        out_shape=jax.ShapeDtypeStruct((Bp, Opad), jnp.float32),
        in_specs=[pl.BlockSpec(memory_space=pltpu.MemorySpace.VMEM)] * 6,
        out_specs=pl.BlockSpec(memory_space=pltpu.MemorySpace.VMEM),
    )(gx0, kparams["whh0"], kparams["w_rec"], kparams["b_rec"],
      kparams["w_fc"], kparams["b_fc"])
    return out_padded[:B, :output_sz]


# ----------------------------------------------------------------------------
# Parameters in PyTorch convention (nn.LSTM shapes, gate order i,f,g,o), then
# packed into the fused kernel layout.
# ----------------------------------------------------------------------------
def init_torch_style_params(key, input_sz, hidden_sz, output_sz, num_layers, embed_sz):
    H, L, E, O = hidden_sz, num_layers, embed_sz, output_sz
    keys = iter(jax.random.split(key, 3 + L * 2 * 4))
    s = 0.1
    p = {
        "embed": s * jax.random.normal(next(keys), (input_sz, E), jnp.float32),
        "fc_w": s * jax.random.normal(next(keys), (O, 4 * L * H), jnp.float32),
        "fc_b": s * jax.random.normal(next(keys), (O,), jnp.float32),
        "lstm": [],
    }
    for l in range(L):
        in_sz = E if l == 0 else 2 * H
        layer = []
        for _d in range(2):  # 0 = forward, 1 = reverse
            layer.append(dict(
                w_ih=s * jax.random.normal(next(keys), (4 * H, in_sz), jnp.float32),
                w_hh=s * jax.random.normal(next(keys), (4 * H, H), jnp.float32),
                b_ih=s * jax.random.normal(next(keys), (4 * H,), jnp.float32),
                b_hh=s * jax.random.normal(next(keys), (4 * H,), jnp.float32)))
        p["lstm"].append(layer)
    return p


def pack_params(p, *, hidden_sz, num_layers, output_sz, out_pad=128):
    H, L, O = hidden_sz, num_layers, output_sz
    Opad = max(out_pad, -(-O // 128) * 128)

    def fuse_ih(w_f, w_b):
        # (4H, in) x 2 dirs -> (in, 8H); column blocks [i_f,i_b,f_f,f_b,g_f,g_b,o_f,o_b]
        cols = []
        for g in range(4):
            cols.append(w_f[g * H:(g + 1) * H, :].T)
            cols.append(w_b[g * H:(g + 1) * H, :].T)
        return jnp.concatenate(cols, axis=1)

    def fuse_hh(w_f, w_b):
        # Block-diagonal (2H, 8H): fwd h rows feed only fwd gate cols, bwd -> bwd cols.
        out = jnp.zeros((2 * H, 8 * H), jnp.float32)
        for g in range(4):
            out = out.at[0:H, (2 * g + 0) * H:(2 * g + 1) * H].set(
                w_f[g * H:(g + 1) * H, :].T)
            out = out.at[H:2 * H, (2 * g + 1) * H:(2 * g + 2) * H].set(
                w_b[g * H:(g + 1) * H, :].T)
        return out

    def fuse_bias(d_f, d_b):
        bf = d_f["b_ih"] + d_f["b_hh"]
        bb = d_b["b_ih"] + d_b["b_hh"]
        chunks = []
        for g in range(4):
            chunks.append(bf[g * H:(g + 1) * H])
            chunks.append(bb[g * H:(g + 1) * H])
        return jnp.concatenate(chunks)[None, :]                    # (1, 8H)

    # Layer 0: bake embedding @ W_ih + bias into a (vocab, 8H) gather table.
    wih0 = fuse_ih(p["lstm"][0][0]["w_ih"], p["lstm"][0][1]["w_ih"])     # (E, 8H)
    b0 = fuse_bias(p["lstm"][0][0], p["lstm"][0][1])                     # (1, 8H)
    gx0_table = p["embed"] @ wih0 + b0                                   # (vocab, 8H)
    whh0 = fuse_hh(p["lstm"][0][0]["w_hh"], p["lstm"][0][1]["w_hh"])     # (2H, 8H)

    # Layers 1..L-1: ONE fused (4H, 8H) RHS per layer = [W_ih_fused ; W_hh_fused].
    if L > 1:
        w_rec = jnp.stack([
            jnp.concatenate(
                [fuse_ih(p["lstm"][l][0]["w_ih"], p["lstm"][l][1]["w_ih"]),
                 fuse_hh(p["lstm"][l][0]["w_hh"], p["lstm"][l][1]["w_hh"])], axis=0)
            for l in range(1, L)])                                       # (L-1, 4H, 8H)
        b_rec = jnp.stack([fuse_bias(p["lstm"][l][0], p["lstm"][l][1])
                           for l in range(1, L)])                        # (L-1, 1, 8H)
    else:
        w_rec = jnp.zeros((1, 4 * H, 8 * H), jnp.float32)                # unused placeholder
        b_rec = jnp.zeros((1, 1, 8 * H), jnp.float32)

    # fc1: PyTorch feature order per layer l (torch.cat((h_n, c_n), 2), then cat over
    # the 2L layer/dir slices) is [h_fwd | c_fwd | h_bwd | c_bwd].
    # Pack concat-free per-layer slabs in the kernel's state layout:
    #   slab 2l   multiplies hc[l] = [h_fwd | h_bwd]
    #   slab 2l+1 multiplies cc[l] = [c_fwd | c_bwd]
    fc_w = p["fc_w"]                                                     # (O, 4LH)
    slabs = []
    for l in range(L):
        base = l * 4 * H
        h_slab = jnp.concatenate([fc_w[:, base + 0 * H:base + 1 * H].T,
                                  fc_w[:, base + 2 * H:base + 3 * H].T], axis=0)
        c_slab = jnp.concatenate([fc_w[:, base + 1 * H:base + 2 * H].T,
                                  fc_w[:, base + 3 * H:base + 4 * H].T], axis=0)
        slabs += [h_slab, c_slab]
    w_fc = jnp.pad(jnp.stack(slabs), ((0, 0), (0, 0), (0, Opad - O)))    # (2L, 2H, Opad)

    # Pad-lane bias of -1e30 => softmax over the padded 128-lane output assigns
    # exactly 0 probability to pad lanes (lane-dense unmasked store).
    b_fc = jnp.full((1, Opad), -1e30, jnp.float32).at[0, :O].set(p["fc_b"])

    return dict(
        gx0_table=gx0_table.astype(jnp.float32),
        whh0=whh0.astype(jnp.bfloat16),
        w_rec=w_rec.astype(jnp.bfloat16),
        b_rec=b_rec.astype(jnp.float32),
        w_fc=w_fc.astype(jnp.bfloat16),
        b_fc=b_fc.astype(jnp.float32),
    )


# ----------------------------------------------------------------------------
# Pure-JAX reference of the PyTorch forward (f32), for a correctness check.
# ----------------------------------------------------------------------------
def reference_forward(tokens, p, *, hidden_sz, num_layers):
    S, B = tokens.shape
    H, L = hidden_sz, num_layers
    h = jnp.zeros((2 * L, B, H), jnp.float32)
    c = jnp.zeros((2 * L, B, H), jnp.float32)
    for t in range(S):
        layer_in = p["embed"][tokens[t]]                       # (B, E)
        h_new, c_new = [], []
        for l in range(L):
            outs = []
            for d in range(2):
                lp = p["lstm"][l][d]
                k = 2 * l + d
                gates = (layer_in @ lp["w_ih"].T + h[k] @ lp["w_hh"].T
                         + lp["b_ih"] + lp["b_hh"])
                i = jax.nn.sigmoid(gates[:, 0:H])
                f = jax.nn.sigmoid(gates[:, H:2 * H])
                g = jnp.tanh(gates[:, 2 * H:3 * H])
                o = jax.nn.sigmoid(gates[:, 3 * H:4 * H])
                c_k = f * c[k] + i * g
                h_k = o * jnp.tanh(c_k)
                h_new.append(h_k); c_new.append(c_k); outs.append(h_k)
            layer_in = jnp.concatenate(outs, axis=1)           # (B, 2H)
        h, c = jnp.stack(h_new), jnp.stack(c_new)
    feat = jnp.concatenate(
        [jnp.concatenate([h[k], c[k]], axis=1) for k in range(2 * L)], axis=1)
    return jax.nn.softmax(feat @ p["fc_w"].T + p["fc_b"], axis=1)


if __name__ == "__main__":
    INPUT_SZ = 20       # vocab size
    HIDDEN_SZ = 32
    OUTPUT_SZ = 10
    NUM_LAYERS = 4
    EMBED_SZ = 16
    SEQ_LEN = 8
    BATCH = 2

    key = jax.random.PRNGKey(0)
    pkey, tkey = jax.random.split(key)
    torch_params = init_torch_style_params(pkey, INPUT_SZ, HIDDEN_SZ, OUTPUT_SZ,
                                           NUM_LAYERS, EMBED_SZ)
    kparams = pack_params(torch_params, hidden_sz=HIDDEN_SZ, num_layers=NUM_LAYERS,
                          output_sz=OUTPUT_SZ)
    tokens = jax.random.randint(tkey, (SEQ_LEN, BATCH), 0, INPUT_SZ, dtype=jnp.int32)

    fwd = jax.jit(functools.partial(name_format_forward, hidden_sz=HIDDEN_SZ,
                                    num_layers=NUM_LAYERS, output_sz=OUTPUT_SZ))
    out = jax.block_until_ready(fwd(tokens, kparams))
    ref = reference_forward(tokens, torch_params, hidden_sz=HIDDEN_SZ,
                            num_layers=NUM_LAYERS)

    assert out.shape == (BATCH, OUTPUT_SZ)
    assert bool(jnp.all(jnp.isfinite(out)))
    assert bool(jnp.allclose(jnp.sum(out, axis=1), 1.0, atol=1e-5))
    assert bool(jnp.allclose(out, ref, atol=5e-3)), \
        f"max abs err {float(jnp.max(jnp.abs(out - ref)))}"
    print("KERNEL_OK")
</pallas_src>

<mosaic_0001>
module attributes {stable_mosaic.version = 11 : i64} {
  func.func @name_format_kernel(%arg0: memref<8x8x256xf32, #tpu.memory_space<vmem>>, %arg1: memref<64x256xbf16, #tpu.memory_space<vmem>>, %arg2: memref<3x128x256xbf16, #tpu.memory_space<vmem>>, %arg3: memref<3x1x256xf32, #tpu.memory_space<vmem>>, %arg4: memref<8x64x128xbf16, #tpu.memory_space<vmem>>, %arg5: memref<1x128xf32, #tpu.memory_space<vmem>>, %arg6: memref<8x128xf32, #tpu.memory_space<vmem>>) attributes {dimension_semantics = [], scalar_prefetch = 0 : i64, scratch_operands = 0 : i64, tpu.core_type = #tpu.core_type<tc>} {
    %0 = tpu.iota {dimensions = array<i32: 1>} : vector<8x256xi32>
    %c128_i32 = arith.constant 128 : i32
    %1 = vector.broadcast %c128_i32 : i32 to vector<8x256xi32>
    %2 = arith.cmpi sge, %0, %1 : vector<8x256xi32>
    %c192_i32 = arith.constant 192 : i32
    %3 = vector.broadcast %c192_i32 : i32 to vector<8x256xi32>
    %4 = arith.cmpi slt, %0, %3 : vector<8x256xi32>
    %5 = arith.andi %2, %4 : vector<8x256xi1>
    %cst = arith.constant 2.000000e+00 : f32
    %cst_0 = arith.constant 1.000000e+00 : f32
    %6 = vector.broadcast %cst : f32 to vector<8x256xf32>
    %7 = vector.broadcast %cst_0 : f32 to vector<8x256xf32>
    %8 = arith.select %5, %6, %7 : vector<8x256xi1>, vector<8x256xf32>
    %cst_1 = arith.constant -1.000000e+00 : f32
    %cst_2 = arith.constant 0.000000e+00 : f32
    %9 = vector.broadcast %cst_1 : f32 to vector<8x256xf32>
    %10 = vector.broadcast %cst_2 : f32 to vector<8x256xf32>
    %11 = arith.select %5, %9, %10 : vector<8x256xi1>, vector<8x256xf32>
    %c0 = arith.constant 0 : index
    %c0_3 = arith.constant 0 : index
    %c0_4 = arith.constant 0 : index
    %12 = vector.load %arg3[%c0, %c0_3, %c0_4] : memref<3x1x256xf32, #tpu.memory_space<vmem>>, vector<1x1x256xf32>
    %13 = vector.shape_cast %12 : vector<1x1x256xf32> to vector<1x256xf32>
    %14 = vector.shape_cast %13 : vector<1x256xf32> to vector<1x256xf32>
    %15 = vector.broadcast %14 : vector<1x256xf32> to vector<8x256xf32>
    %c1 = arith.constant 1 : index
    %c0_5 = arith.constant 0 : index
    %c0_6 = arith.constant 0 : index
    %16 = vector.load %arg3[%c1, %c0_5, %c0_6] : memref<3x1x256xf32, #tpu.memory_space<vmem>>, vector<1x1x256xf32>
    %17 = vector.shape_cast %16 : vector<1x1x256xf32> to vector<1x256xf32>
    %18 = vector.shape_cast %17 : vector<1x256xf32> to vector<1x256xf32>
    %19 = vector.broadcast %18 : vector<1x256xf32> to vector<8x256xf32>
    %c2 = arith.constant 2 : index
    %c0_7 = arith.constant 0 : index
    %c0_8 = arith.constant 0 : index
    %20 = vector.load %arg3[%c2, %c0_7, %c0_8] : memref<3x1x256xf32, #tpu.memory_space<vmem>>, vector<1x1x256xf32>
    %21 = vector.shape_cast %20 : vector<1x1x256xf32> to vector<1x256xf32>
    %22 = vector.shape_cast %21 : vector<1x256xf32> to vector<1x256xf32>
    %23 = vector.broadcast %22 : vector<1x256xf32> to vector<8x256xf32>
    %cst_9 = arith.constant 0.000000e+00 : f32
    %24 = vector.broadcast %cst_9 : f32 to vector<8x64xf32>
    %cst_10 = arith.constant 0.000000e+00 : f32
    %25 = vector.broadcast %cst_10 : f32 to vector<8x64xf32>
    %cst_11 = arith.constant 0.000000e+00 : f32
    %26 = vector.broadcast %cst_11 : f32 to vector<8x64xf32>
    %cst_12 = arith.constant 0.000000e+00 : f32
    %27 = vector.broadcast %cst_12 : f32 to vector<8x64xf32>
    %cst_13 = arith.constant 0.000000e+00 : f32
    %28 = vector.broadcast %cst_13 : f32 to vector<8x64xf32>
    %cst_14 = arith.constant 0.000000e+00 : f32
    %29 = vector.broadcast %cst_14 : f32 to vector<8x64xf32>
    %cst_15 = arith.constant 0.000000e+00 : f32
    %30 = vector.broadcast %cst_15 : f32 to vector<8x64xf32>
    %cst_16 = arith.constant 0.000000e+00 : f32
    %31 = vector.broadcast %cst_16 : f32 to vector<8x64xf32>
    %c0_17 = arith.constant 0 : index
    %c0_18 = arith.constant 0 : index
    %c0_19 = arith.constant 0 : index
    %32 = vector.load %arg0[%c0_17, %c0_18, %c0_19] : memref<8x8x256xf32, #tpu.memory_space<vmem>>, vector<1x8x256xf32>
    %33 = vector.shape_cast %32 : vector<1x8x256xf32> to vector<8x256xf32>
    %34 = arith.truncf %24 : vector<8x64xf32> to vector<8x64xbf16>
    %c0_20 = arith.constant 0 : index
    %c0_21 = arith.constant 0 : index
    %35 = vector.load %arg1[%c0_20, %c0_21] : memref<64x256xbf16, #tpu.memory_space<vmem>>, vector<64x256xbf16>
    %cst_22 = arith.constant dense<0.000000e+00> : vector<8x256xf32>
    %36 = tpu.matmul %34, %35, %cst_22 {dimension_numbers = #tpu.dot_dimension_numbers<[1], [0], [0], [1], [0, 0, 1, 1], [], []>} : vector<8x64xbf16>, vector<64x256xbf16>, vector<8x256xf32> -> vector<8x256xf32>
    %37 = arith.addf %33, %36 : vector<8x256xf32>
    %38 = arith.mulf %37, %8 : vector<8x256xf32>
    %39 = arith.negf %38 : vector<8x256xf32>
    %40 = math.exp %39 : vector<8x256xf32>
    %cst_23 = arith.constant 1.000000e+00 : f32
    %41 = vector.broadcast %cst_23 : f32 to vector<8x256xf32>
    %42 = arith.addf %41, %40 : vector<8x256xf32>
    %43 = arith.divf %41, %42 : vector<8x256xf32>
    %44 = arith.mulf %43, %8 : vector<8x256xf32>
    %45 = arith.addf %44, %11 : vector<8x256xf32>
    %46 = vector.extract_strided_slice %45 {offsets = [0, 0], sizes = [8, 64], strides = [1, 1]} : vector<8x256xf32> to vector<8x64xf32>
    %47 = vector.extract_strided_slice %45 {offsets = [0, 64], sizes = [8, 64], strides = [1, 1]} : vector<8x256xf32> to vector<8x64xf32>
    %48 = vector.extract_strided_slice %45 {offsets = [0, 128], sizes = [8, 64], strides = [1, 1]} : vector<8x256xf32> to vector<8x64xf32>
    %49 = vector.extract_strided_slice %45 {offsets = [0, 192], sizes = [8, 64], strides = [1, 1]} : vector<8x256xf32> to vector<8x64xf32>
    %50 = arith.mulf %47, %28 : vector<8x64xf32>
    %51 = arith.mulf %46, %48 : vector<8x64xf32>
    %52 = arith.addf %50, %51 : vector<8x64xf32>
    %53 = math.tanh %52 : vector<8x64xf32>
    %54 = arith.mulf %49, %53 : vector<8x64xf32>
    %55 = tpu.concatenate %54, %25 in 1 : vector<8x64xf32>, vector<8x64xf32> -> vector<8x128xf32>
    %56 = arith.truncf %55 : vector<8x128xf32> to vector<8x128xbf16>
    %c0_24 = arith.constant 0 : index
    %c0_25 = arith.constant 0 : index
    %c0_26 = arith.constant 0 : index
    %57 = vector.load %arg2[%c0_24, %c0_25, %c0_26] : memref<3x128x256xbf16, #tpu.memory_space<vmem>>, vector<1x128x256xbf16>
    %58 = vector.shape_cast %57 : vector<1x128x256xbf16> to vector<128x256xbf16>
    %cst_27 = arith.constant dense<0.000000e+00> : vector<8x256xf32>
    %59 = tpu.matmul %56, %58, %cst_27 {dimension_numbers = #tpu.dot_dimension_numbers<[1], [0], [0], [1], [0, 0, 1, 1], [], []>} : vector<8x128xbf16>, vector<128x256xbf16>, vector<8x256xf32> -> vector<8x256xf32>
    %60 = arith.addf %59, %15 : vector<8x256xf32>
    %61 = arith.mulf %60, %8 : vector<8x256xf32>
    %62 = arith.negf %61 : vector<8x256xf32>
    %63 = math.exp %62 : vector<8x256xf32>
    %cst_28 = arith.constant 1.000000e+00 : f32
    %64 = vector.broadcast %cst_28 : f32 to vector<8x256xf32>
    %65 = arith.addf %64, %63 : vector<8x256xf32>
    %66 = arith.divf %64, %65 : vector<8x256xf32>
    %67 = arith.mulf %66, %8 : vector<8x256xf32>
    %68 = arith.addf %67, %11 : vector<8x256xf32>
    %69 = vector.extract_strided_slice %68 {offsets = [0, 0], sizes = [8, 64], strides = [1, 1]} : vector<8x256xf32> to vector<8x64xf32>
    %70 = vector.extract_strided_slice %68 {offsets = [0, 64], sizes = [8, 64], strides = [1, 1]} : vector<8x256xf32> to vector<8x64xf32>
    %71 = vector.extract_strided_slice %68 {offsets = [0, 128], sizes = [8, 64], strides = [1, 1]} : vector<8x256xf32> to vector<8x64xf32>
    %72 = vector.extract_strided_slice %68 {offsets = [0, 192], sizes = [8, 64], strides = [1, 1]} : vector<8x256xf32> to vector<8x64xf32>
    %73 = arith.mulf %70, %29 : vector<8x64xf32>
    %74 = arith.mulf %69, %71 : vector<8x64xf32>
    %75 = arith.addf %73, %74 : vector<8x64xf32>
    %76 = math.tanh %75 : vector<8x64xf32>
    %77 = arith.mulf %72, %76 : vector<8x64xf32>
    %78 = tpu.concatenate %77, %26 in 1 : vector<8x64xf32>, vector<8x64xf32> -> vector<8x128xf32>
    %79 = arith.truncf %78 : vector<8x128xf32> to vector<8x128xbf16>
    %c1_29 = arith.constant 1 : index
    %c0_30 = arith.constant 0 : index
    %c0_31 = arith.constant 0 : index
    %80 = vector.load %arg2[%c1_29, %c0_30, %c0_31] : memref<3x128x256xbf16, #tpu.memory_space<vmem>>, vector<1x128x256xbf16>
    %81 = vector.shape_cast %80 : vector<1x128x256xbf16> to vector<128x256xbf16>
    %cst_32 = arith.constant dense<0.000000e+00> : vector<8x256xf32>
    %82 = tpu.matmul %79, %81, %cst_32 {dimension_numbers = #tpu.dot_dimension_numbers<[1], [0], [0], [1], [0, 0, 1, 1], [], []>} : vector<8x128xbf16>, vector<128x256xbf16>, vector<8x256xf32> -> vector<8x256xf32>
    %83 = arith.addf %82, %19 : vector<8x256xf32>
    %84 = arith.mulf %83, %8 : vector<8x256xf32>
    %85 = arith.negf %84 : vector<8x256xf32>
    %86 = math.exp %85 : vector<8x256xf32>
    %cst_33 = arith.constant 1.000000e+00 : f32
    %87 = vector.broadcast %cst_33 : f32 to vector<8x256xf32>
    %88 = arith.addf %87, %86 : vector<8x256xf32>
    %89 = arith.divf %87, %88 : vector<8x256xf32>
    %90 = arith.mulf %89, %8 : vector<8x256xf32>
    %91 = arith.addf %90, %11 : vector<8x256xf32>
    %92 = vector.extract_strided_slice %91 {offsets = [0, 0], sizes = [8, 64], strides = [1, 1]} : vector<8x256xf32> to vector<8x64xf32>
    %93 = vector.extract_strided_slice %91 {offsets = [0, 64], sizes = [8, 64], strides = [1, 1]} : vector<8x256xf32> to vector<8x64xf32>
    %94 = vector.extract_strided_slice %91 {offsets = [0, 128], sizes = [8, 64], strides = [1, 1]} : vector<8x256xf32> to vector<8x64xf32>
    %95 = vector.extract_strided_slice %91 {offsets = [0, 192], sizes = [8, 64], strides = [1, 1]} : vector<8x256xf32> to vector<8x64xf32>
    %96 = arith.mulf %93, %30 : vector<8x64xf32>
    %97 = arith.mulf %92, %94 : vector<8x64xf32>
    %98 = arith.addf %96, %97 : vector<8x64xf32>
    %99 = math.tanh %98 : vector<8x64xf32>
    %100 = arith.mulf %95, %99 : vector<8x64xf32>
    %101 = tpu.concatenate %100, %27 in 1 : vector<8x64xf32>, vector<8x64xf32> -> vector<8x128xf32>
    %102 = arith.truncf %101 : vector<8x128xf32> to vector<8x128xbf16>
    %c2_34 = arith.constant 2 : index
    %c0_35 = arith.constant 0 : index
    %c0_36 = arith.constant 0 : index
    %103 = vector.load %arg2[%c2_34, %c0_35, %c0_36] : memref<3x128x256xbf16, #tpu.memory_space<vmem>>, vector<1x128x256xbf16>
    %104 = vector.shape_cast %103 : vector<1x128x256xbf16> to vector<128x256xbf16>
    %cst_37 = arith.constant dense<0.000000e+00> : vector<8x256xf32>
    %105 = tpu.matmul %102, %104, %cst_37 {dimension_numbers = #tpu.dot_dimension_numbers<[1], [0], [0], [1], [0, 0, 1, 1], [], []>} : vector<8x128xbf16>, vector<128x256xbf16>, vector<8x256xf32> -> vector<8x256xf32>
    %106 = arith.addf %105, %23 : vector<8x256xf32>
    %107 = arith.mulf %106, %8 : vector<8x256xf32>
    %108 = arith.negf %107 : vector<8x256xf32>
    %109 = math.exp %108 : vector<8x256xf32>
    %cst_38 = arith.constant 1.000000e+00 : f32
    %110 = vector.broadcast %cst_38 : f32 to vector<8x256xf32>
    %111 = arith.addf %110, %109 : vector<8x256xf32>
    %112 = arith.divf %110, %111 : vector<8x256xf32>
    %113 = arith.mulf %112, %8 : vector<8x256xf32>
    %114 = arith.addf %113, %11 : vector<8x256xf32>
    %115 = vector.extract_strided_slice %114 {offsets = [0, 0], sizes = [8, 64], strides = [1, 1]} : vector<8x256xf32> to vector<8x64xf32>
    %116 = vector.extract_strided_slice %114 {offsets = [0, 64], sizes = [8, 64], strides = [1, 1]} : vector<8x256xf32> to vector<8x64xf32>
    %117 = vector.extract_strided_slice %114 {offsets = [0, 128], sizes = [8, 64], strides = [1, 1]} : vector<8x256xf32> to vector<8x64xf32>
    %118 = vector.extract_strided_slice %114 {offsets = [0, 192], sizes = [8, 64], strides = [1, 1]} : vector<8x256xf32> to vector<8x64xf32>
    %119 = arith.mulf %116, %31 : vector<8x64xf32>
    %120 = arith.mulf %115, %117 : vector<8x64xf32>
    %121 = arith.addf %119, %120 : vector<8x64xf32>
    %122 = math.tanh %121 : vector<8x64xf32>
    %123 = arith.mulf %118, %122 : vector<8x64xf32>
    %c1_39 = arith.constant 1 : index
    %c0_40 = arith.constant 0 : index
    %c0_41 = arith.constant 0 : index
    %124 = vector.load %arg0[%c1_39, %c0_40, %c0_41] : memref<8x8x256xf32, #tpu.memory_space<vmem>>, vector<1x8x256xf32>
    %125 = vector.shape_cast %124 : vector<1x8x256xf32> to vector<8x256xf32>
    %126 = arith.truncf %54 : vector<8x64xf32> to vector<8x64xbf16>
    %c0_42 = arith.constant 0 : index
    %c0_43 = arith.constant 0 : index
    %127 = vector.load %arg1[%c0_42, %c0_43] : memref<64x256xbf16, #tpu.memory_space<vmem>>, vector<64x256xbf16>
    %cst_44 = arith.constant dense<0.000000e+00> : vector<8x256xf32>
    %128 = tpu.matmul %126, %127, %cst_44 {dimension_numbers = #tpu.dot_dimension_numbers<[1], [0], [0], [1], [0, 0, 1, 1], [], []>} : vector<8x64xbf16>, vector<64x256xbf16>, vector<8x256xf32> -> vector<8x256xf32>
    %129 = arith.addf %125, %128 : vector<8x256xf32>
    %130 = arith.mulf %129, %8 : vector<8x256xf32>
    %131 = arith.negf %130 : vector<8x256xf32>
    %132 = math.exp %131 : vector<8x256xf32>
    %cst_45 = arith.constant 1.000000e+00 : f32
    %133 = vector.broadcast %cst_45 : f32 to vector<8x256xf32>
    %134 = arith.addf %133, %132 : vector<8x256xf32>
    %135 = arith.divf %133, %134 : vector<8x256xf32>
    %136 = arith.mulf %135, %8 : vector<8x256xf32>
    %137 = arith.addf %136, %11 : vector<8x256xf32>
    %138 = vector.extract_strided_slice %137 {offsets = [0, 0], sizes = [8, 64], strides = [1, 1]} : vector<8x256xf32> to vector<8x64xf32>
    %139 = vector.extract_strided_slice %137 {offsets = [0, 64], sizes = [8, 64], strides = [1, 1]} : vector<8x256xf32> to vector<8x64xf32>
    %140 = vector.extract_strided_slice %137 {offsets = [0, 128], sizes = [8, 64], strides = [1, 1]} : vector<8x256xf32> to vector<8x64xf32>
    %141 = vector.extract_strided_slice %137 {offsets = [0, 192], sizes = [8, 64], strides = [1, 1]} : vector<8x256xf32> to vector<8x64xf32>
    %142 = arith.mulf %139, %52 : vector<8x64xf32>
    %143 = arith.mulf %138, %140 : vector<8x64xf32>
    %144 = arith.addf %142, %143 : vector<8x64xf32>
    %145 = math.tanh %144 : vector<8x64xf32>
    %146 = arith.mulf %141, %145 : vector<8x64xf32>
    %147 = tpu.concatenate %146, %77 in 1 : vector<8x64xf32>, vector<8x64xf32> -> vector<8x128xf32>
    %148 = arith.truncf %147 : vector<8x128xf32> to vector<8x128xbf16>
    %c0_46 = arith.constant 0 : index
    %c0_47 = arith.constant 0 : index
    %c0_48 = arith.constant 0 : index
    %149 = vector.load %arg2[%c0_46, %c0_47, %c0_48] : memref<3x128x256xbf16, #tpu.memory_space<vmem>>, vector<1x128x256xbf16>
    %150 = vector.shape_cast %149 : vector<1x128x256xbf16> to vector<128x256xbf16>
    %cst_49 = arith.constant dense<0.000000e+00> : vector<8x256xf32>
    %151 = tpu.matmul %148, %150, %cst_49 {dimension_numbers = #tpu.dot_dimension_numbers<[1], [0], [0], [1], [0, 0, 1, 1], [], []>} : vector<8x128xbf16>, vector<128x256xbf16>, vector<8x256xf32> -> vector<8x256xf32>
    %152 = arith.addf %151, %15 : vector<8x256xf32>
    %153 = arith.mulf %152, %8 : vector<8x256xf32>
    %154 = arith.negf %153 : vector<8x256xf32>
    %155 = math.exp %154 : vector<8x256xf32>
    %cst_50 = arith.constant 1.000000e+00 : f32
    %156 = vector.broadcast %cst_50 : f32 to vector<8x256xf32>
    %157 = arith.addf %156, %155 : vector<8x256xf32>
    %158 = arith.divf %156, %157 : vector<8x256xf32>
    %159 = arith.mulf %158, %8 : vector<8x256xf32>
    %160 = arith.addf %159, %11 : vector<8x256xf32>
    %161 = vector.extract_strided_slice %160 {offsets = [0, 0], sizes = [8, 64], strides = [1, 1]} : vector<8x256xf32> to vector<8x64xf32>
    %162 = vector.extract_strided_slice %160 {offsets = [0, 64], sizes = [8, 64], strides = [1, 1]} : vector<8x256xf32> to vector<8x64xf32>
    %163 = vector.extract_strided_slice %160 {offsets = [0, 128], sizes = [8, 64], strides = [1, 1]} : vector<8x256xf32> to vector<8x64xf32>
    %164 = vector.extract_strided_slice %160 {offsets = [0, 192], sizes = [8, 64], strides = [1, 1]} : vector<8x256xf32> to vector<8x64xf32>
    %165 = arith.mulf %162, %75 : vector<8x64xf32>
    %166 = arith.mulf %161, %163 : vector<8x64xf32>
    %167 = arith.addf %165, %166 : vector<8x64xf32>
    %168 = math.tanh %167 : vector<8x64xf32>
    %169 = arith.mulf %164, %168 : vector<8x64xf32>
    %170 = tpu.concatenate %169, %100 in 1 : vector<8x64xf32>, vector<8x64xf32> -> vector<8x128xf32>
    %171 = arith.truncf %170 : vector<8x128xf32> to vector<8x128xbf16>
    %c1_51 = arith.constant 1 : index
    %c0_52 = arith.constant 0 : index
    %c0_53 = arith.constant 0 : index
    %172 = vector.load %arg2[%c1_51, %c0_52, %c0_53] : memref<3x128x256xbf16, #tpu.memory_space<vmem>>, vector<1x128x256xbf16>
    %173 = vector.shape_cast %172 : vector<1x128x256xbf16> to vector<128x256xbf16>
    %cst_54 = arith.constant dense<0.000000e+00> : vector<8x256xf32>
    %174 = tpu.matmul %171, %173, %cst_54 {dimension_numbers = #tpu.dot_dimension_numbers<[1], [0], [0], [1], [0, 0, 1, 1], [], []>} : vector<8x128xbf16>, vector<128x256xbf16>, vector<8x256xf32> -> vector<8x256xf32>
    %175 = arith.addf %174, %19 : vector<8x256xf32>
    %176 = arith.mulf %175, %8 : vector<8x256xf32>
    %177 = arith.negf %176 : vector<8x256xf32>
    %178 = math.exp %177 : vector<8x256xf32>
    %cst_55 = arith.constant 1.000000e+00 : f32
    %179 = vector.broadcast %cst_55 : f32 to vector<8x256xf32>
    %180 = arith.addf %179, %178 : vector<8x256xf32>
    %181 = arith.divf %179, %180 : vector<8x256xf32>
    %182 = arith.mulf %181, %8 : vector<8x256xf32>
    %183 = arith.addf %182, %11 : vector<8x256xf32>
    %184 = vector.extract_strided_slice %183 {offsets = [0, 0], sizes = [8, 64], strides = [1, 1]} : vector<8x256xf32> to vector<8x64xf32>
    %185 = vector.extract_strided_slice %183 {offsets = [0, 64], sizes = [8, 64], strides = [1, 1]} : vector<8x256xf32> to vector<8x64xf32>
    %186 = vector.extract_strided_slice %183 {offsets = [0, 128], sizes = [8, 64], strides = [1, 1]} : vector<8x256xf32> to vector<8x64xf32>
    %187 = vector.extract_strided_slice %183 {offsets = [0, 192], sizes = [8, 64], strides = [1, 1]} : vector<8x256xf32> to vector<8x64xf32>
    %188 = arith.mulf %185, %98 : vector<8x64xf32>
    %189 = arith.mulf %184, %186 : vector<8x64xf32>
    %190 = arith.addf %188, %189 : vector<8x64xf32>
    %191 = math.tanh %190 : vector<8x64xf32>
    %192 = arith.mulf %187, %191 : vector<8x64xf32>
    %193 = tpu.concatenate %192, %123 in 1 : vector<8x64xf32>, vector<8x64xf32> -> vector<8x128xf32>
    %194 = arith.truncf %193 : vector<8x128xf32> to vector<8x128xbf16>
    %c2_56 = arith.constant 2 : index
    %c0_57 = arith.constant 0 : index
    %c0_58 = arith.constant 0 : index
    %195 = vector.load %arg2[%c2_56, %c0_57, %c0_58] : memref<3x128x256xbf16, #tpu.memory_space<vmem>>, vector<1x128x256xbf16>
    %196 = vector.shape_cast %195 : vector<1x128x256xbf16> to vector<128x256xbf16>
    %cst_59 = arith.constant dense<0.000000e+00> : vector<8x256xf32>
    %197 = tpu.matmul %194, %196, %cst_59 {dimension_numbers = #tpu.dot_dimension_numbers<[1], [0], [0], [1], [0, 0, 1, 1], [], []>} : vector<8x128xbf16>, vector<128x256xbf16>, vector<8x256xf32> -> vector<8x256xf32>
    %198 = arith.addf %197, %23 : vector<8x256xf32>
    %199 = arith.mulf %198, %8 : vector<8x256xf32>
    %200 = arith.negf %199 : vector<8x256xf32>
    %201 = math.exp %200 : vector<8x256xf32>
    %cst_60 = arith.constant 1.000000e+00 : f32
    %202 = vector.broadcast %cst_60 : f32 to vector<8x256xf32>
    %203 = arith.addf %202, %201 : vector<8x256xf32>
    %204 = arith.divf %202, %203 : vector<8x256xf32>
    %205 = arith.mulf %204, %8 : vector<8x256xf32>
    %206 = arith.addf %205, %11 : vector<8x256xf32>
    %207 = vector.extract_strided_slice %206 {offsets = [0, 0], sizes = [8, 64], strides = [1, 1]} : vector<8x256xf32> to vector<8x64xf32>
    %208 = vector.extract_strided_slice %206 {offsets = [0, 64], sizes = [8, 64], strides = [1, 1]} : vector<8x256xf32> to vector<8x64xf32>
    %209 = vector.extract_strided_slice %206 {offsets = [0, 128], sizes = [8, 64], strides = [1, 1]} : vector<8x256xf32> to vector<8x64xf32>
    %210 = vector.extract_strided_slice %206 {offsets = [0, 192], sizes = [8, 64], strides = [1, 1]} : vector<8x256xf32> to vector<8x64xf32>
    %211 = arith.mulf %208, %121 : vector<8x64xf32>
    %212 = arith.mulf %207, %209 : vector<8x64xf32>
    %213 = arith.addf %211, %212 : vector<8x64xf32>
    %214 = math.tanh %213 : vector<8x64xf32>
    %215 = arith.mulf %210, %214 : vector<8x64xf32>
    %c2_61 = arith.constant 2 : index
    %c0_62 = arith.constant 0 : index
    %c0_63 = arith.constant 0 : index
    %216 = vector.load %arg0[%c2_61, %c0_62, %c0_63] : memref<8x8x256xf32, #tpu.memory_space<vmem>>, vector<1x8x256xf32>
    %217 = vector.shape_cast %216 : vector<1x8x256xf32> to vector<8x256xf32>
    %218 = arith.truncf %146 : vector<8x64xf32> to vector<8x64xbf16>
    %c0_64 = arith.constant 0 : index
    %c0_65 = arith.constant 0 : index
    %219 = vector.load %arg1[%c0_64, %c0_65] : memref<64x256xbf16, #tpu.memory_space<vmem>>, vector<64x256xbf16>
    %cst_66 = arith.constant dense<0.000000e+00> : vector<8x256xf32>
    %220 = tpu.matmul %218, %219, %cst_66 {dimension_numbers = #tpu.dot_dimension_numbers<[1], [0], [0], [1], [0, 0, 1, 1], [], []>} : vector<8x64xbf16>, vector<64x256xbf16>, vector<8x256xf32> -> vector<8x256xf32>
    %221 = arith.addf %217, %220 : vector<8x256xf32>
    %222 = arith.mulf %221, %8 : vector<8x256xf32>
    %223 = arith.negf %222 : vector<8x256xf32>
    %224 = math.exp %223 : vector<8x256xf32>
    %cst_67 = arith.constant 1.000000e+00 : f32
    %225 = vector.broadcast %cst_67 : f32 to vector<8x256xf32>
    %226 = arith.addf %225, %224 : vector<8x256xf32>
    %227 = arith.divf %225, %226 : vector<8x256xf32>
    %228 = arith.mulf %227, %8 : vector<8x256xf32>
    %229 = arith.addf %228, %11 : vector<8x256xf32>
    %230 = vector.extract_strided_slice %229 {offsets = [0, 0], sizes = [8, 64], strides = [1, 1]} : vector<8x256xf32> to vector<8x64xf32>
    %231 = vector.extract_strided_slice %229 {offsets = [0, 64], sizes = [8, 64], strides = [1, 1]} : vector<8x256xf32> to vector<8x64xf32>
    %232 = vector.extract_strided_slice %229 {offsets = [0, 128], sizes = [8, 64], strides = [1, 1]} : vector<8x256xf32> to vector<8x64xf32>
    %233 = vector.extract_strided_slice %229 {offsets = [0, 192], sizes = [8, 64], strides = [1, 1]} : vector<8x256xf32> to vector<8x64xf32>
    %234 = arith.mulf %231, %144 : vector<8x64xf32>
    %235 = arith.mulf %230, %232 : vector<8x64xf32>
    %236 = arith.addf %234, %235 : vector<8x64xf32>
    %237 = math.tanh %236 : vector<8x64xf32>
    %238 = arith.mulf %233, %237 : vector<8x64xf32>
    %239 = tpu.concatenate %238, %169 in 1 : vector<8x64xf32>, vector<8x64xf32> -> vector<8x128xf32>
    %240 = arith.truncf %239 : vector<8x128xf32> to vector<8x128xbf16>
    %c0_68 = arith.constant 0 : index
    %c0_69 = arith.constant 0 : index
    %c0_70 = arith.constant 0 : index
    %241 = vector.load %arg2[%c0_68, %c0_69, %c0_70] : memref<3x128x256xbf16, #tpu.memory_space<vmem>>, vector<1x128x256xbf16>
    %242 = vector.shape_cast %241 : vector<1x128x256xbf16> to vector<128x256xbf16>
    %cst_71 = arith.constant dense<0.000000e+00> : vector<8x256xf32>
    %243 = tpu.matmul %240, %242, %cst_71 {dimension_numbers = #tpu.dot_dimension_numbers<[1], [0], [0], [1], [0, 0, 1, 1], [], []>} : vector<8x128xbf16>, vector<128x256xbf16>, vector<8x256xf32> -> vector<8x256xf32>
    %244 = arith.addf %243, %15 : vector<8x256xf32>
    %245 = arith.mulf %244, %8 : vector<8x256xf32>
    %246 = arith.negf %245 : vector<8x256xf32>
    %247 = math.exp %246 : vector<8x256xf32>
    %cst_72 = arith.constant 1.000000e+00 : f32
    %248 = vector.broadcast %cst_72 : f32 to vector<8x256xf32>
    %249 = arith.addf %248, %247 : vector<8x256xf32>
    %250 = arith.divf %248, %249 : vector<8x256xf32>
    %251 = arith.mulf %250, %8 : vector<8x256xf32>
    %252 = arith.addf %251, %11 : vector<8x256xf32>
    %253 = vector.extract_strided_slice %252 {offsets = [0, 0], sizes = [8, 64], strides = [1, 1]} : vector<8x256xf32> to vector<8x64xf32>
    %254 = vector.extract_strided_slice %252 {offsets = [0, 64], sizes = [8, 64], strides = [1, 1]} : vector<8x256xf32> to vector<8x64xf32>
    %255 = vector.extract_strided_slice %252 {offsets = [0, 128], sizes = [8, 64], strides = [1, 1]} : vector<8x256xf32> to vector<8x64xf32>
    %256 = vector.extract_strided_slice %252 {offsets = [0, 192], sizes = [8, 64], strides = [1, 1]} : vector<8x256xf32> to vector<8x64xf32>
    %257 = arith.mulf %254, %167 : vector<8x64xf32>
    %258 = arith.mulf %253, %255 : vector<8x64xf32>
    %259 = arith.addf %257, %258 : vector<8x64xf32>
    %260 = math.tanh %259 : vector<8x64xf32>
    %261 = arith.mulf %256, %260 : vector<8x64xf32>
    %262 = tpu.concatenate %261, %192 in 1 : vector<8x64xf32>, vector<8x64xf32> -> vector<8x128xf32>
    %263 = arith.truncf %262 : vector<8x128xf32> to vector<8x128xbf16>
    %c1_73 = arith.constant 1 : index
    %c0_74 = arith.constant 0 : index
    %c0_75 = arith.constant 0 : index
    %264 = vector.load %arg2[%c1_73, %c0_74, %c0_75] : memref<3x128x256xbf16, #tpu.memory_space<vmem>>, vector<1x128x256xbf16>
    %265 = vector.shape_cast %264 : vector<1x128x256xbf16> to vector<128x256xbf16>
    %cst_76 = arith.constant dense<0.000000e+00> : vector<8x256xf32>
    %266 = tpu.matmul %263, %265, %cst_76 {dimension_numbers = #tpu.dot_dimension_numbers<[1], [0], [0], [1], [0, 0, 1, 1], [], []>} : vector<8x128xbf16>, vector<128x256xbf16>, vector<8x256xf32> -> vector<8x256xf32>
    %267 = arith.addf %266, %19 : vector<8x256xf32>
    %268 = arith.mulf %267, %8 : vector<8x256xf32>
    %269 = arith.negf %268 : vector<8x256xf32>
    %270 = math.exp %269 : vector<8x256xf32>
    %cst_77 = arith.constant 1.000000e+00 : f32
    %271 = vector.broadcast %cst_77 : f32 to vector<8x256xf32>
    %272 = arith.addf %271, %270 : vector<8x256xf32>
    %273 = arith.divf %271, %272 : vector<8x256xf32>
    %274 = arith.mulf %273, %8 : vector<8x256xf32>
    %275 = arith.addf %274, %11 : vector<8x256xf32>
    %276 = vector.extract_strided_slice %275 {offsets = [0, 0], sizes = [8, 64], strides = [1, 1]} : vector<8x256xf32> to vector<8x64xf32>
    %277 = vector.extract_strided_slice %275 {offsets = [0, 64], sizes = [8, 64], strides = [1, 1]} : vector<8x256xf32> to vector<8x64xf32>
    %278 = vector.extract_strided_slice %275 {offsets = [0, 128], sizes = [8, 64], strides = [1, 1]} : vector<8x256xf32> to vector<8x64xf32>
    %279 = vector.extract_strided_slice %275 {offsets = [0, 192], sizes = [8, 64], strides = [1, 1]} : vector<8x256xf32> to vector<8x64xf32>
    %280 = arith.mulf %277, %190 : vector<8x64xf32>
    %281 = arith.mulf %276, %278 : vector<8x64xf32>
    %282 = arith.addf %280, %281 : vector<8x64xf32>
    %283 = math.tanh %282 : vector<8x64xf32>
    %284 = arith.mulf %279, %283 : vector<8x64xf32>
    %285 = tpu.concatenate %284, %215 in 1 : vector<8x64xf32>, vector<8x64xf32> -> vector<8x128xf32>
    %286 = arith.truncf %285 : vector<8x128xf32> to vector<8x128xbf16>
    %c2_78 = arith.constant 2 : index
    %c0_79 = arith.constant 0 : index
    %c0_80 = arith.constant 0 : index
    %287 = vector.load %arg2[%c2_78, %c0_79, %c0_80] : memref<3x128x256xbf16, #tpu.memory_space<vmem>>, vector<1x128x256xbf16>
    %288 = vector.shape_cast %287 : vector<1x128x256xbf16> to vector<128x256xbf16>
    %cst_81 = arith.constant dense<0.000000e+00> : vector<8x256xf32>
    %289 = tpu.matmul %286, %288, %cst_81 {dimension_numbers = #tpu.dot_dimension_numbers<[1], [0], [0], [1], [0, 0, 1, 1], [], []>} : vector<8x128xbf16>, vector<128x256xbf16>, vector<8x256xf32> -> vector<8x256xf32>
    %290 = arith.addf %289, %23 : vector<8x256xf32>
    %291 = arith.mulf %290, %8 : vector<8x256xf32>
    %292 = arith.negf %291 : vector<8x256xf32>
    %293 = math.exp %292 : vector<8x256xf32>
    %cst_82 = arith.constant 1.000000e+00 : f32
    %294 = vector.broadcast %cst_82 : f32 to vector<8x256xf32>
    %295 = arith.addf %294, %293 : vector<8x256xf32>
    %296 = arith.divf %294, %295 : vector<8x256xf32>
    %297 = arith.mulf %296, %8 : vector<8x256xf32>
    %298 = arith.addf %297, %11 : vector<8x256xf32>
    %299 = vector.extract_strided_slice %298 {offsets = [0, 0], sizes = [8, 64], strides = [1, 1]} : vector<8x256xf32> to vector<8x64xf32>
    %300 = vector.extract_strided_slice %298 {offsets = [0, 64], sizes = [8, 64], strides = [1, 1]} : vector<8x256xf32> to vector<8x64xf32>
    %301 = vector.extract_strided_slice %298 {offsets = [0, 128], sizes = [8, 64], strides = [1, 1]} : vector<8x256xf32> to vector<8x64xf32>
    %302 = vector.extract_strided_slice %298 {offsets = [0, 192], sizes = [8, 64], strides = [1, 1]} : vector<8x256xf32> to vector<8x64xf32>
    %303 = arith.mulf %300, %213 : vector<8x64xf32>
    %304 = arith.mulf %299, %301 : vector<8x64xf32>
    %305 = arith.addf %303, %304 : vector<8x64xf32>
    %306 = math.tanh %305 : vector<8x64xf32>
    %307 = arith.mulf %302, %306 : vector<8x64xf32>
    %c3 = arith.constant 3 : index
    %c0_83 = arith.constant 0 : index
    %c0_84 = arith.constant 0 : index
    %308 = vector.load %arg0[%c3, %c0_83, %c0_84] : memref<8x8x256xf32, #tpu.memory_space<vmem>>, vector<1x8x256xf32>
    %309 = vector.shape_cast %308 : vector<1x8x256xf32> to vector<8x256xf32>
    %310 = arith.truncf %238 : vector<8x64xf32> to vector<8x64xbf16>
    %c0_85 = arith.constant 0 : index
    %c0_86 = arith.constant 0 : index
    %311 = vector.load %arg1[%c0_85, %c0_86] : memref<64x256xbf16, #tpu.memory_space<vmem>>, vector<64x256xbf16>
    %cst_87 = arith.constant dense<0.000000e+00> : vector<8x256xf32>
    %312 = tpu.matmul %310, %311, %cst_87 {dimension_numbers = #tpu.dot_dimension_numbers<[1], [0], [0], [1], [0, 0, 1, 1], [], []>} : vector<8x64xbf16>, vector<64x256xbf16>, vector<8x256xf32> -> vector<8x256xf32>
    %313 = arith.addf %309, %312 : vector<8x256xf32>
    %314 = arith.mulf %313, %8 : vector<8x256xf32>
    %315 = arith.negf %314 : vector<8x256xf32>
    %316 = math.exp %315 : vector<8x256xf32>
    %cst_88 = arith.constant 1.000000e+00 : f32
    %317 = vector.broadcast %cst_88 : f32 to vector<8x256xf32>
    %318 = arith.addf %317, %316 : vector<8x256xf32>
    %319 = arith.divf %317, %318 : vector<8x256xf32>
    %320 = arith.mulf %319, %8 : vector<8x256xf32>
    %321 = arith.addf %320, %11 : vector<8x256xf32>
    %322 = vector.extract_strided_slice %321 {offsets = [0, 0], sizes = [8, 64], strides = [1, 1]} : vector<8x256xf32> to vector<8x64xf32>
    %323 = vector.extract_strided_slice %321 {offsets = [0, 64], sizes = [8, 64], strides = [1, 1]} : vector<8x256xf32> to vector<8x64xf32>
    %324 = vector.extract_strided_slice %321 {offsets = [0, 128], sizes = [8, 64], strides = [1, 1]} : vector<8x256xf32> to vector<8x64xf32>
    %325 = vector.extract_strided_slice %321 {offsets = [0, 192], sizes = [8, 64], strides = [1, 1]} : vector<8x256xf32> to vector<8x64xf32>
    %326 = arith.mulf %323, %236 : vector<8x64xf32>
    %327 = arith.mulf %322, %324 : vector<8x64xf32>
    %328 = arith.addf %326, %327 : vector<8x64xf32>
    %329 = math.tanh %328 : vector<8x64xf32>
    %330 = arith.mulf %325, %329 : vector<8x64xf32>
    %331 = tpu.concatenate %330, %261 in 1 : vector<8x64xf32>, vector<8x64xf32> -> vector<8x128xf32>
    %332 = arith.truncf %331 : vector<8x128xf32> to vector<8x128xbf16>
    %c0_89 = arith.constant 0 : index
    %c0_90 = arith.constant 0 : index
    %c0_91 = arith.constant 0 : index
    %333 = vector.load %arg2[%c0_89, %c0_90, %c0_91] : memref<3x128x256xbf16, #tpu.memory_space<vmem>>, vector<1x128x256xbf16>
    %334 = vector.shape_cast %333 : vector<1x128x256xbf16> to vector<128x256xbf16>
    %cst_92 = arith.constant dense<0.000000e+00> : vector<8x256xf32>
    %335 = tpu.matmul %332, %334, %cst_92 {dimension_numbers = #tpu.dot_dimension_numbers<[1], [0], [0], [1], [0, 0, 1, 1], [], []>} : vector<8x128xbf16>, vector<128x256xbf16>, vector<8x256xf32> -> vector<8x256xf32>
    %336 = arith.addf %335, %15 : vector<8x256xf32>
    %337 = arith.mulf %336, %8 : vector<8x256xf32>
    %338 = arith.negf %337 : vector<8x256xf32>
    %339 = math.exp %338 : vector<8x256xf32>
    %cst_93 = arith.constant 1.000000e+00 : f32
    %340 = vector.broadcast %cst_93 : f32 to vector<8x256xf32>
    %341 = arith.addf %340, %339 : vector<8x256xf32>
    %342 = arith.divf %340, %341 : vector<8x256xf32>
    %343 = arith.mulf %342, %8 : vector<8x256xf32>
    %344 = arith.addf %343, %11 : vector<8x256xf32>
    %345 = vector.extract_strided_slice %344 {offsets = [0, 0], sizes = [8, 64], strides = [1, 1]} : vector<8x256xf32> to vector<8x64xf32>
    %346 = vector.extract_strided_slice %344 {offsets = [0, 64], sizes = [8, 64], strides = [1, 1]} : vector<8x256xf32> to vector<8x64xf32>
    %347 = vector.extract_strided_slice %344 {offsets = [0, 128], sizes = [8, 64], strides = [1, 1]} : vector<8x256xf32> to vector<8x64xf32>
    %348 = vector.extract_strided_slice %344 {offsets = [0, 192], sizes = [8, 64], strides = [1, 1]} : vector<8x256xf32> to vector<8x64xf32>
    %349 = arith.mulf %346, %259 : vector<8x64xf32>
    %350 = arith.mulf %345, %347 : vector<8x64xf32>
    %351 = arith.addf %349, %350 : vector<8x64xf32>
    %352 = math.tanh %351 : vector<8x64xf32>
    %353 = arith.mulf %348, %352 : vector<8x64xf32>
    %354 = tpu.concatenate %353, %284 in 1 : vector<8x64xf32>, vector<8x64xf32> -> vector<8x128xf32>
    %355 = arith.truncf %354 : vector<8x128xf32> to vector<8x128xbf16>
    %c1_94 = arith.constant 1 : index
    %c0_95 = arith.constant 0 : index
    %c0_96 = arith.constant 0 : index
    %356 = vector.load %arg2[%c1_94, %c0_95, %c0_96] : memref<3x128x256xbf16, #tpu.memory_space<vmem>>, vector<1x128x256xbf16>
    %357 = vector.shape_cast %356 : vector<1x128x256xbf16> to vector<128x256xbf16>
    %cst_97 = arith.constant dense<0.000000e+00> : vector<8x256xf32>
    %358 = tpu.matmul %355, %357, %cst_97 {dimension_numbers = #tpu.dot_dimension_numbers<[1], [0], [0], [1], [0, 0, 1, 1], [], []>} : vector<8x128xbf16>, vector<128x256xbf16>, vector<8x256xf32> -> vector<8x256xf32>
    %359 = arith.addf %358, %19 : vector<8x256xf32>
    %360 = arith.mulf %359, %8 : vector<8x256xf32>
    %361 = arith.negf %360 : vector<8x256xf32>
    %362 = math.exp %361 : vector<8x256xf32>
    %cst_98 = arith.constant 1.000000e+00 : f32
    %363 = vector.broadcast %cst_98 : f32 to vector<8x256xf32>
    %364 = arith.addf %363, %362 : vector<8x256xf32>
    %365 = arith.divf %363, %364 : vector<8x256xf32>
    %366 = arith.mulf %365, %8 : vector<8x256xf32>
    %367 = arith.addf %366, %11 : vector<8x256xf32>
    %368 = vector.extract_strided_slice %367 {offsets = [0, 0], sizes = [8, 64], strides = [1, 1]} : vector<8x256xf32> to vector<8x64xf32>
    %369 = vector.extract_strided_slice %367 {offsets = [0, 64], sizes = [8, 64], strides = [1, 1]} : vector<8x256xf32> to vector<8x64xf32>
    %370 = vector.extract_strided_slice %367 {offsets = [0, 128], sizes = [8, 64], strides = [1, 1]} : vector<8x256xf32> to vector<8x64xf32>
    %371 = vector.extract_strided_slice %367 {offsets = [0, 192], sizes = [8, 64], strides = [1, 1]} : vector<8x256xf32> to vector<8x64xf32>
    %372 = arith.mulf %369, %282 : vector<8x64xf32>
    %373 = arith.mulf %368, %370 : vector<8x64xf32>
    %374 = arith.addf %372, %373 : vector<8x64xf32>
    %375 = math.tanh %374 : vector<8x64xf32>
    %376 = arith.mulf %371, %375 : vector<8x64xf32>
    %377 = tpu.concatenate %376, %307 in 1 : vector<8x64xf32>, vector<8x64xf32> -> vector<8x128xf32>
    %378 = arith.truncf %377 : vector<8x128xf32> to vector<8x128xbf16>
    %c2_99 = arith.constant 2 : index
    %c0_100 = arith.constant 0 : index
    %c0_101 = arith.constant 0 : index
    %379 = vector.load %arg2[%c2_99, %c0_100, %c0_101] : memref<3x128x256xbf16, #tpu.memory_space<vmem>>, vector<1x128x256xbf16>
    %380 = vector.shape_cast %379 : vector<1x128x256xbf16> to vector<128x256xbf16>
    %cst_102 = arith.constant dense<0.000000e+00> : vector<8x256xf32>
    %381 = tpu.matmul %378, %380, %cst_102 {dimension_numbers = #tpu.dot_dimension_numbers<[1], [0], [0], [1], [0, 0, 1, 1], [], []>} : vector<8x128xbf16>, vector<128x256xbf16>, vector<8x256xf32> -> vector<8x256xf32>
    %382 = arith.addf %381, %23 : vector<8x256xf32>
    %383 = arith.mulf %382, %8 : vector<8x256xf32>
    %384 = arith.negf %383 : vector<8x256xf32>
    %385 = math.exp %384 : vector<8x256xf32>
    %cst_103 = arith.constant 1.000000e+00 : f32
    %386 = vector.broadcast %cst_103 : f32 to vector<8x256xf32>
    %387 = arith.addf %386, %385 : vector<8x256xf32>
    %388 = arith.divf %386, %387 : vector<8x256xf32>
    %389 = arith.mulf %388, %8 : vector<8x256xf32>
    %390 = arith.addf %389, %11 : vector<8x256xf32>
    %391 = vector.extract_strided_slice %390 {offsets = [0, 0], sizes = [8, 64], strides = [1, 1]} : vector<8x256xf32> to vector<8x64xf32>
    %392 = vector.extract_strided_slice %390 {offsets = [0, 64], sizes = [8, 64], strides = [1, 1]} : vector<8x256xf32> to vector<8x64xf32>
    %393 = vector.extract_strided_slice %390 {offsets = [0, 128], sizes = [8, 64], strides = [1, 1]} : vector<8x256xf32> to vector<8x64xf32>
    %394 = vector.extract_strided_slice %390 {offsets = [0, 192], sizes = [8, 64], strides = [1, 1]} : vector<8x256xf32> to vector<8x64xf32>
    %395 = arith.mulf %392, %305 : vector<8x64xf32>
    %396 = arith.mulf %391, %393 : vector<8x64xf32>
    %397 = arith.addf %395, %396 : vector<8x64xf32>
    %398 = math.tanh %397 : vector<8x64xf32>
    %399 = arith.mulf %394, %398 : vector<8x64xf32>
    %c4 = arith.constant 4 : index
    %c0_104 = arith.constant 0 : index
    %c0_105 = arith.constant 0 : index
    %400 = vector.load %arg0[%c4, %c0_104, %c0_105] : memref<8x8x256xf32, #tpu.memory_space<vmem>>, vector<1x8x256xf32>
    %401 = vector.shape_cast %400 : vector<1x8x256xf32> to vector<8x256xf32>
    %402 = arith.truncf %330 : vector<8x64xf32> to vector<8x64xbf16>
    %c0_106 = arith.constant 0 : index
    %c0_107 = arith.constant 0 : index
    %403 = vector.load %arg1[%c0_106, %c0_107] : memref<64x256xbf16, #tpu.memory_space<vmem>>, vector<64x256xbf16>
    %cst_108 = arith.constant dense<0.000000e+00> : vector<8x256xf32>
    %404 = tpu.matmul %402, %403, %cst_108 {dimension_numbers = #tpu.dot_dimension_numbers<[1], [0], [0], [1], [0, 0, 1, 1], [], []>} : vector<8x64xbf16>, vector<64x256xbf16>, vector<8x256xf32> -> vector<8x256xf32>
    %405 = arith.addf %401, %404 : vector<8x256xf32>
    %406 = arith.mulf %405, %8 : vector<8x256xf32>
    %407 = arith.negf %406 : vector<8x256xf32>
    %408 = math.exp %407 : vector<8x256xf32>
    %cst_109 = arith.constant 1.000000e+00 : f32
    %409 = vector.broadcast %cst_109 : f32 to vector<8x256xf32>
    %410 = arith.addf %409, %408 : vector<8x256xf32>
    %411 = arith.divf %409, %410 : vector<8x256xf32>
    %412 = arith.mulf %411, %8 : vector<8x256xf32>
    %413 = arith.addf %412, %11 : vector<8x256xf32>
    %414 = vector.extract_strided_slice %413 {offsets = [0, 0], sizes = [8, 64], strides = [1, 1]} : vector<8x256xf32> to vector<8x64xf32>
    %415 = vector.extract_strided_slice %413 {offsets = [0, 64], sizes = [8, 64], strides = [1, 1]} : vector<8x256xf32> to vector<8x64xf32>
    %416 = vector.extract_strided_slice %413 {offsets = [0, 128], sizes = [8, 64], strides = [1, 1]} : vector<8x256xf32> to vector<8x64xf32>
    %417 = vector.extract_strided_slice %413 {offsets = [0, 192], sizes = [8, 64], strides = [1, 1]} : vector<8x256xf32> to vector<8x64xf32>
    %418 = arith.mulf %415, %328 : vector<8x64xf32>
    %419 = arith.mulf %414, %416 : vector<8x64xf32>
    %420 = arith.addf %418, %419 : vector<8x64xf32>
    %421 = math.tanh %420 : vector<8x64xf32>
    %422 = arith.mulf %417, %421 : vector<8x64xf32>
    %423 = tpu.concatenate %422, %353 in 1 : vector<8x64xf32>, vector<8x64xf32> -> vector<8x128xf32>
    %424 = arith.truncf %423 : vector<8x128xf32> to vector<8x128xbf16>
    %c0_110 = arith.constant 0 : index
    %c0_111 = arith.constant 0 : index
    %c0_112 = arith.constant 0 : index
    %425 = vector.load %arg2[%c0_110, %c0_111, %c0_112] : memref<3x128x256xbf16, #tpu.memory_space<vmem>>, vector<1x128x256xbf16>
    %426 = vector.shape_cast %425 : vector<1x128x256xbf16> to vector<128x256xbf16>
    %cst_113 = arith.constant dense<0.000000e+00> : vector<8x256xf32>
    %427 = tpu.matmul %424, %426, %cst_113 {dimension_numbers = #tpu.dot_dimension_numbers<[1], [0], [0], [1], [0, 0, 1, 1], [], []>} : vector<8x128xbf16>, vector<128x256xbf16>, vector<8x256xf32> -> vector<8x256xf32>
    %428 = arith.addf %427, %15 : vector<8x256xf32>
    %429 = arith.mulf %428, %8 : vector<8x256xf32>
    %430 = arith.negf %429 : vector<8x256xf32>
    %431 = math.exp %430 : vector<8x256xf32>
    %cst_114 = arith.constant 1.000000e+00 : f32
    %432 = vector.broadcast %cst_114 : f32 to vector<8x256xf32>
    %433 = arith.addf %432, %431 : vector<8x256xf32>
    %434 = arith.divf %432, %433 : vector<8x256xf32>
    %435 = arith.mulf %434, %8 : vector<8x256xf32>
    %436 = arith.addf %435, %11 : vector<8x256xf32>
    %437 = vector.extract_strided_slice %436 {offsets = [0, 0], sizes = [8, 64], strides = [1, 1]} : vector<8x256xf32> to vector<8x64xf32>
    %438 = vector.extract_strided_slice %436 {offsets = [0, 64], sizes = [8, 64], strides = [1, 1]} : vector<8x256xf32> to vector<8x64xf32>
    %439 = vector.extract_strided_slice %436 {offsets = [0, 128], sizes = [8, 64], strides = [1, 1]} : vector<8x256xf32> to vector<8x64xf32>
    %440 = vector.extract_strided_slice %436 {offsets = [0, 192], sizes = [8, 64], strides = [1, 1]} : vector<8x256xf32> to vector<8x64xf32>
    %441 = arith.mulf %438, %351 : vector<8x64xf32>
    %442 = arith.mulf %437, %439 : vector<8x64xf32>
    %443 = arith.addf %441, %442 : vector<8x64xf32>
    %444 = math.tanh %443 : vector<8x64xf32>
    %445 = arith.mulf %440, %444 : vector<8x64xf32>
    %446 = tpu.concatenate %445, %376 in 1 : vector<8x64xf32>, vector<8x64xf32> -> vector<8x128xf32>
    %447 = arith.truncf %446 : vector<8x128xf32> to vector<8x128xbf16>
    %c1_115 = arith.constant 1 : index
    %c0_116 = arith.constant 0 : index
    %c0_117 = arith.constant 0 : index
    %448 = vector.load %arg2[%c1_115, %c0_116, %c0_117] : memref<3x128x256xbf16, #tpu.memory_space<vmem>>, vector<1x128x256xbf16>
    %449 = vector.shape_cast %448 : vector<1x128x256xbf16> to vector<128x256xbf16>
    %cst_118 = arith.constant dense<0.000000e+00> : vector<8x256xf32>
    %450 = tpu.matmul %447, %449, %cst_118 {dimension_numbers = #tpu.dot_dimension_numbers<[1], [0], [0], [1], [0, 0, 1, 1], [], []>} : vector<8x128xbf16>, vector<128x256xbf16>, vector<8x256xf32> -> vector<8x256xf32>
    %451 = arith.addf %450, %19 : vector<8x256xf32>
    %452 = arith.mulf %451, %8 : vector<8x256xf32>
    %453 = arith.negf %452 : vector<8x256xf32>
    %454 = math.exp %453 : vector<8x256xf32>
    %cst_119 = arith.constant 1.000000e+00 : f32
    %455 = vector.broadcast %cst_119 : f32 to vector<8x256xf32>
    %456 = arith.addf %455, %454 : vector<8x256xf32>
    %457 = arith.divf %455, %456 : vector<8x256xf32>
    %458 = arith.mulf %457, %8 : vector<8x256xf32>
    %459 = arith.addf %458, %11 : vector<8x256xf32>
    %460 = vector.extract_strided_slice %459 {offsets = [0, 0], sizes = [8, 64], strides = [1, 1]} : vector<8x256xf32> to vector<8x64xf32>
    %461 = vector.extract_strided_slice %459 {offsets = [0, 64], sizes = [8, 64], strides = [1, 1]} : vector<8x256xf32> to vector<8x64xf32>
    %462 = vector.extract_strided_slice %459 {offsets = [0, 128], sizes = [8, 64], strides = [1, 1]} : vector<8x256xf32> to vector<8x64xf32>
    %463 = vector.extract_strided_slice %459 {offsets = [0, 192], sizes = [8, 64], strides = [1, 1]} : vector<8x256xf32> to vector<8x64xf32>
    %464 = arith.mulf %461, %374 : vector<8x64xf32>
    %465 = arith.mulf %460, %462 : vector<8x64xf32>
    %466 = arith.addf %464, %465 : vector<8x64xf32>
    %467 = math.tanh %466 : vector<8x64xf32>
    %468 = arith.mulf %463, %467 : vector<8x64xf32>
    %469 = tpu.concatenate %468, %399 in 1 : vector<8x64xf32>, vector<8x64xf32> -> vector<8x128xf32>
    %470 = arith.truncf %469 : vector<8x128xf32> to vector<8x128xbf16>
    %c2_120 = arith.constant 2 : index
    %c0_121 = arith.constant 0 : index
    %c0_122 = arith.constant 0 : index
    %471 = vector.load %arg2[%c2_120, %c0_121, %c0_122] : memref<3x128x256xbf16, #tpu.memory_space<vmem>>, vector<1x128x256xbf16>
    %472 = vector.shape_cast %471 : vector<1x128x256xbf16> to vector<128x256xbf16>
    %cst_123 = arith.constant dense<0.000000e+00> : vector<8x256xf32>
    %473 = tpu.matmul %470, %472, %cst_123 {dimension_numbers = #tpu.dot_dimension_numbers<[1], [0], [0], [1], [0, 0, 1, 1], [], []>} : vector<8x128xbf16>, vector<128x256xbf16>, vector<8x256xf32> -> vector<8x256xf32>
    %474 = arith.addf %473, %23 : vector<8x256xf32>
    %475 = arith.mulf %474, %8 : vector<8x256xf32>
    %476 = arith.negf %475 : vector<8x256xf32>
    %477 = math.exp %476 : vector<8x256xf32>
    %cst_124 = arith.constant 1.000000e+00 : f32
    %478 = vector.broadcast %cst_124 : f32 to vector<8x256xf32>
    %479 = arith.addf %478, %477 : vector<8x256xf32>
    %480 = arith.divf %478, %479 : vector<8x256xf32>
    %481 = arith.mulf %480, %8 : vector<8x256xf32>
    %482 = arith.addf %481, %11 : vector<8x256xf32>
    %483 = vector.extract_strided_slice %482 {offsets = [0, 0], sizes = [8, 64], strides = [1, 1]} : vector<8x256xf32> to vector<8x64xf32>
    %484 = vector.extract_strided_slice %482 {offsets = [0, 64], sizes = [8, 64], strides = [1, 1]} : vector<8x256xf32> to vector<8x64xf32>
    %485 = vector.extract_strided_slice %482 {offsets = [0, 128], sizes = [8, 64], strides = [1, 1]} : vector<8x256xf32> to vector<8x64xf32>
    %486 = vector.extract_strided_slice %482 {offsets = [0, 192], sizes = [8, 64], strides = [1, 1]} : vector<8x256xf32> to vector<8x64xf32>
    %487 = arith.mulf %484, %397 : vector<8x64xf32>
    %488 = arith.mulf %483, %485 : vector<8x64xf32>
    %489 = arith.addf %487, %488 : vector<8x64xf32>
    %490 = math.tanh %489 : vector<8x64xf32>
    %491 = arith.mulf %486, %490 : vector<8x64xf32>
    %c5 = arith.constant 5 : index
    %c0_125 = arith.constant 0 : index
    %c0_126 = arith.constant 0 : index
    %492 = vector.load %arg0[%c5, %c0_125, %c0_126] : memref<8x8x256xf32, #tpu.memory_space<vmem>>, vector<1x8x256xf32>
    %493 = vector.shape_cast %492 : vector<1x8x256xf32> to vector<8x256xf32>
    %494 = arith.truncf %422 : vector<8x64xf32> to vector<8x64xbf16>
    %c0_127 = arith.constant 0 : index
    %c0_128 = arith.constant 0 : index
    %495 = vector.load %arg1[%c0_127, %c0_128] : memref<64x256xbf16, #tpu.memory_space<vmem>>, vector<64x256xbf16>
    %cst_129 = arith.constant dense<0.000000e+00> : vector<8x256xf32>
    %496 = tpu.matmul %494, %495, %cst_129 {dimension_numbers = #tpu.dot_dimension_numbers<[1], [0], [0], [1], [0, 0, 1, 1], [], []>} : vector<8x64xbf16>, vector<64x256xbf16>, vector<8x256xf32> -> vector<8x256xf32>
    %497 = arith.addf %493, %496 : vector<8x256xf32>
    %498 = arith.mulf %497, %8 : vector<8x256xf32>
    %499 = arith.negf %498 : vector<8x256xf32>
    %500 = math.exp %499 : vector<8x256xf32>
    %cst_130 = arith.constant 1.000000e+00 : f32
    %501 = vector.broadcast %cst_130 : f32 to vector<8x256xf32>
    %502 = arith.addf %501, %500 : vector<8x256xf32>
    %503 = arith.divf %501, %502 : vector<8x256xf32>
    %504 = arith.mulf %503, %8 : vector<8x256xf32>
    %505 = arith.addf %504, %11 : vector<8x256xf32>
    %506 = vector.extract_strided_slice %505 {offsets = [0, 0], sizes = [8, 64], strides = [1, 1]} : vector<8x256xf32> to vector<8x64xf32>
    %507 = vector.extract_strided_slice %505 {offsets = [0, 64], sizes = [8, 64], strides = [1, 1]} : vector<8x256xf32> to vector<8x64xf32>
    %508 = vector.extract_strided_slice %505 {offsets = [0, 128], sizes = [8, 64], strides = [1, 1]} : vector<8x256xf32> to vector<8x64xf32>
    %509 = vector.extract_strided_slice %505 {offsets = [0, 192], sizes = [8, 64], strides = [1, 1]} : vector<8x256xf32> to vector<8x64xf32>
    %510 = arith.mulf %507, %420 : vector<8x64xf32>
    %511 = arith.mulf %506, %508 : vector<8x64xf32>
    %512 = arith.addf %510, %511 : vector<8x64xf32>
    %513 = math.tanh %512 : vector<8x64xf32>
    %514 = arith.mulf %509, %513 : vector<8x64xf32>
    %515 = tpu.concatenate %514, %445 in 1 : vector<8x64xf32>, vector<8x64xf32> -> vector<8x128xf32>
    %516 = arith.truncf %515 : vector<8x128xf32> to vector<8x128xbf16>
    %c0_131 = arith.constant 0 : index
    %c0_132 = arith.constant 0 : index
    %c0_133 = arith.constant 0 : index
    %517 = vector.load %arg2[%c0_131, %c0_132, %c0_133] : memref<3x128x256xbf16, #tpu.memory_space<vmem>>, vector<1x128x256xbf16>
    %518 = vector.shape_cast %517 : vector<1x128x256xbf16> to vector<128x256xbf16>
    %cst_134 = arith.constant dense<0.000000e+00> : vector<8x256xf32>
    %519 = tpu.matmul %516, %518, %cst_134 {dimension_numbers = #tpu.dot_dimension_numbers<[1], [0], [0], [1], [0, 0, 1, 1], [], []>} : vector<8x128xbf16>, vector<128x256xbf16>, vector<8x256xf32> -> vector<8x256xf32>
    %520 = arith.addf %519, %15 : vector<8x256xf32>
    %521 = arith.mulf %520, %8 : vector<8x256xf32>
    %522 = arith.negf %521 : vector<8x256xf32>
    %523 = math.exp %522 : vector<8x256xf32>
    %cst_135 = arith.constant 1.000000e+00 : f32
    %524 = vector.broadcast %cst_135 : f32 to vector<8x256xf32>
    %525 = arith.addf %524, %523 : vector<8x256xf32>
    %526 = arith.divf %524, %525 : vector<8x256xf32>
    %527 = arith.mulf %526, %8 : vector<8x256xf32>
    %528 = arith.addf %527, %11 : vector<8x256xf32>
    %529 = vector.extract_strided_slice %528 {offsets = [0, 0], sizes = [8, 64], strides = [1, 1]} : vector<8x256xf32> to vector<8x64xf32>
    %530 = vector.extract_strided_slice %528 {offsets = [0, 64], sizes = [8, 64], strides = [1, 1]} : vector<8x256xf32> to vector<8x64xf32>
    %531 = vector.extract_strided_slice %528 {offsets = [0, 128], sizes = [8, 64], strides = [1, 1]} : vector<8x256xf32> to vector<8x64xf32>
    %532 = vector.extract_strided_slice %528 {offsets = [0, 192], sizes = [8, 64], strides = [1, 1]} : vector<8x256xf32> to vector<8x64xf32>
    %533 = arith.mulf %530, %443 : vector<8x64xf32>
    %534 = arith.mulf %529, %531 : vector<8x64xf32>
    %535 = arith.addf %533, %534 : vector<8x64xf32>
    %536 = math.tanh %535 : vector<8x64xf32>
    %537 = arith.mulf %532, %536 : vector<8x64xf32>
    %538 = tpu.concatenate %537, %468 in 1 : vector<8x64xf32>, vector<8x64xf32> -> vector<8x128xf32>
    %539 = arith.truncf %538 : vector<8x128xf32> to vector<8x128xbf16>
    %c1_136 = arith.constant 1 : index
    %c0_137 = arith.constant 0 : index
    %c0_138 = arith.constant 0 : index
    %540 = vector.load %arg2[%c1_136, %c0_137, %c0_138] : memref<3x128x256xbf16, #tpu.memory_space<vmem>>, vector<1x128x256xbf16>
    %541 = vector.shape_cast %540 : vector<1x128x256xbf16> to vector<128x256xbf16>
    %cst_139 = arith.constant dense<0.000000e+00> : vector<8x256xf32>
    %542 = tpu.matmul %539, %541, %cst_139 {dimension_numbers = #tpu.dot_dimension_numbers<[1], [0], [0], [1], [0, 0, 1, 1], [], []>} : vector<8x128xbf16>, vector<128x256xbf16>, vector<8x256xf32> -> vector<8x256xf32>
    %543 = arith.addf %542, %19 : vector<8x256xf32>
    %544 = arith.mulf %543, %8 : vector<8x256xf32>
    %545 = arith.negf %544 : vector<8x256xf32>
    %546 = math.exp %545 : vector<8x256xf32>
    %cst_140 = arith.constant 1.000000e+00 : f32
    %547 = vector.broadcast %cst_140 : f32 to vector<8x256xf32>
    %548 = arith.addf %547, %546 : vector<8x256xf32>
    %549 = arith.divf %547, %548 : vector<8x256xf32>
    %550 = arith.mulf %549, %8 : vector<8x256xf32>
    %551 = arith.addf %550, %11 : vector<8x256xf32>
    %552 = vector.extract_strided_slice %551 {offsets = [0, 0], sizes = [8, 64], strides = [1, 1]} : vector<8x256xf32> to vector<8x64xf32>
    %553 = vector.extract_strided_slice %551 {offsets = [0, 64], sizes = [8, 64], strides = [1, 1]} : vector<8x256xf32> to vector<8x64xf32>
    %554 = vector.extract_strided_slice %551 {offsets = [0, 128], sizes = [8, 64], strides = [1, 1]} : vector<8x256xf32> to vector<8x64xf32>
    %555 = vector.extract_strided_slice %551 {offsets = [0, 192], sizes = [8, 64], strides = [1, 1]} : vector<8x256xf32> to vector<8x64xf32>
    %556 = arith.mulf %553, %466 : vector<8x64xf32>
    %557 = arith.mulf %552, %554 : vector<8x64xf32>
    %558 = arith.addf %556, %557 : vector<8x64xf32>
    %559 = math.tanh %558 : vector<8x64xf32>
    %560 = arith.mulf %555, %559 : vector<8x64xf32>
    %561 = tpu.concatenate %560, %491 in 1 : vector<8x64xf32>, vector<8x64xf32> -> vector<8x128xf32>
    %562 = arith.truncf %561 : vector<8x128xf32> to vector<8x128xbf16>
    %c2_141 = arith.constant 2 : index
    %c0_142 = arith.constant 0 : index
    %c0_143 = arith.constant 0 : index
    %563 = vector.load %arg2[%c2_141, %c0_142, %c0_143] : memref<3x128x256xbf16, #tpu.memory_space<vmem>>, vector<1x128x256xbf16>
    %564 = vector.shape_cast %563 : vector<1x128x256xbf16> to vector<128x256xbf16>
    %cst_144 = arith.constant dense<0.000000e+00> : vector<8x256xf32>
    %565 = tpu.matmul %562, %564, %cst_144 {dimension_numbers = #tpu.dot_dimension_numbers<[1], [0], [0], [1], [0, 0, 1, 1], [], []>} : vector<8x128xbf16>, vector<128x256xbf16>, vector<8x256xf32> -> vector<8x256xf32>
    %566 = arith.addf %565, %23 : vector<8x256xf32>
    %567 = arith.mulf %566, %8 : vector<8x256xf32>
    %568 = arith.negf %567 : vector<8x256xf32>
    %569 = math.exp %568 : vector<8x256xf32>
    %cst_145 = arith.constant 1.000000e+00 : f32
    %570 = vector.broadcast %cst_145 : f32 to vector<8x256xf32>
    %571 = arith.addf %570, %569 : vector<8x256xf32>
    %572 = arith.divf %570, %571 : vector<8x256xf32>
    %573 = arith.mulf %572, %8 : vector<8x256xf32>
    %574 = arith.addf %573, %11 : vector<8x256xf32>
    %575 = vector.extract_strided_slice %574 {offsets = [0, 0], sizes = [8, 64], strides = [1, 1]} : vector<8x256xf32> to vector<8x64xf32>
    %576 = vector.extract_strided_slice %574 {offsets = [0, 64], sizes = [8, 64], strides = [1, 1]} : vector<8x256xf32> to vector<8x64xf32>
    %577 = vector.extract_strided_slice %574 {offsets = [0, 128], sizes = [8, 64], strides = [1, 1]} : vector<8x256xf32> to vector<8x64xf32>
    %578 = vector.extract_strided_slice %574 {offsets = [0, 192], sizes = [8, 64], strides = [1, 1]} : vector<8x256xf32> to vector<8x64xf32>
    %579 = arith.mulf %576, %489 : vector<8x64xf32>
    %580 = arith.mulf %575, %577 : vector<8x64xf32>
    %581 = arith.addf %579, %580 : vector<8x64xf32>
    %582 = math.tanh %581 : vector<8x64xf32>
    %583 = arith.mulf %578, %582 : vector<8x64xf32>
    %c6 = arith.constant 6 : index
    %c0_146 = arith.constant 0 : index
    %c0_147 = arith.constant 0 : index
    %584 = vector.load %arg0[%c6, %c0_146, %c0_147] : memref<8x8x256xf32, #tpu.memory_space<vmem>>, vector<1x8x256xf32>
    %585 = vector.shape_cast %584 : vector<1x8x256xf32> to vector<8x256xf32>
    %586 = arith.truncf %514 : vector<8x64xf32> to vector<8x64xbf16>
    %c0_148 = arith.constant 0 : index
    %c0_149 = arith.constant 0 : index
    %587 = vector.load %arg1[%c0_148, %c0_149] : memref<64x256xbf16, #tpu.memory_space<vmem>>, vector<64x256xbf16>
    %cst_150 = arith.constant dense<0.000000e+00> : vector<8x256xf32>
    %588 = tpu.matmul %586, %587, %cst_150 {dimension_numbers = #tpu.dot_dimension_numbers<[1], [0], [0], [1], [0, 0, 1, 1], [], []>} : vector<8x64xbf16>, vector<64x256xbf16>, vector<8x256xf32> -> vector<8x256xf32>
    %589 = arith.addf %585, %588 : vector<8x256xf32>
    %590 = arith.mulf %589, %8 : vector<8x256xf32>
    %591 = arith.negf %590 : vector<8x256xf32>
    %592 = math.exp %591 : vector<8x256xf32>
    %cst_151 = arith.constant 1.000000e+00 : f32
    %593 = vector.broadcast %cst_151 : f32 to vector<8x256xf32>
    %594 = arith.addf %593, %592 : vector<8x256xf32>
    %595 = arith.divf %593, %594 : vector<8x256xf32>
    %596 = arith.mulf %595, %8 : vector<8x256xf32>
    %597 = arith.addf %596, %11 : vector<8x256xf32>
    %598 = vector.extract_strided_slice %597 {offsets = [0, 0], sizes = [8, 64], strides = [1, 1]} : vector<8x256xf32> to vector<8x64xf32>
    %599 = vector.extract_strided_slice %597 {offsets = [0, 64], sizes = [8, 64], strides = [1, 1]} : vector<8x256xf32> to vector<8x64xf32>
    %600 = vector.extract_strided_slice %597 {offsets = [0, 128], sizes = [8, 64], strides = [1, 1]} : vector<8x256xf32> to vector<8x64xf32>
    %601 = vector.extract_strided_slice %597 {offsets = [0, 192], sizes = [8, 64], strides = [1, 1]} : vector<8x256xf32> to vector<8x64xf32>
    %602 = arith.mulf %599, %512 : vector<8x64xf32>
    %603 = arith.mulf %598, %600 : vector<8x64xf32>
    %604 = arith.addf %602, %603 : vector<8x64xf32>
    %605 = math.tanh %604 : vector<8x64xf32>
    %606 = arith.mulf %601, %605 : vector<8x64xf32>
    %607 = tpu.concatenate %606, %537 in 1 : vector<8x64xf32>, vector<8x64xf32> -> vector<8x128xf32>
    %608 = arith.truncf %607 : vector<8x128xf32> to vector<8x128xbf16>
    %c0_152 = arith.constant 0 : index
    %c0_153 = arith.constant 0 : index
    %c0_154 = arith.constant 0 : index
    %609 = vector.load %arg2[%c0_152, %c0_153, %c0_154] : memref<3x128x256xbf16, #tpu.memory_space<vmem>>, vector<1x128x256xbf16>
    %610 = vector.shape_cast %609 : vector<1x128x256xbf16> to vector<128x256xbf16>
    %cst_155 = arith.constant dense<0.000000e+00> : vector<8x256xf32>
    %611 = tpu.matmul %608, %610, %cst_155 {dimension_numbers = #tpu.dot_dimension_numbers<[1], [0], [0], [1], [0, 0, 1, 1], [], []>} : vector<8x128xbf16>, vector<128x256xbf16>, vector<8x256xf32> -> vector<8x256xf32>
    %612 = arith.addf %611, %15 : vector<8x256xf32>
    %613 = arith.mulf %612, %8 : vector<8x256xf32>
    %614 = arith.negf %613 : vector<8x256xf32>
    %615 = math.exp %614 : vector<8x256xf32>
    %cst_156 = arith.constant 1.000000e+00 : f32
    %616 = vector.broadcast %cst_156 : f32 to vector<8x256xf32>
    %617 = arith.addf %616, %615 : vector<8x256xf32>
    %618 = arith.divf %616, %617 : vector<8x256xf32>
    %619 = arith.mulf %618, %8 : vector<8x256xf32>
    %620 = arith.addf %619, %11 : vector<8x256xf32>
    %621 = vector.extract_strided_slice %620 {offsets = [0, 0], sizes = [8, 64], strides = [1, 1]} : vector<8x256xf32> to vector<8x64xf32>
    %622 = vector.extract_strided_slice %620 {offsets = [0, 64], sizes = [8, 64], strides = [1, 1]} : vector<8x256xf32> to vector<8x64xf32>
    %623 = vector.extract_strided_slice %620 {offsets = [0, 128], sizes = [8, 64], strides = [1, 1]} : vector<8x256xf32> to vector<8x64xf32>
    %624 = vector.extract_strided_slice %620 {offsets = [0, 192], sizes = [8, 64], strides = [1, 1]} : vector<8x256xf32> to vector<8x64xf32>
    %625 = arith.mulf %622, %535 : vector<8x64xf32>
    %626 = arith.mulf %621, %623 : vector<8x64xf32>
    %627 = arith.addf %625, %626 : vector<8x64xf32>
    %628 = math.tanh %627 : vector<8x64xf32>
    %629 = arith.mulf %624, %628 : vector<8x64xf32>
    %630 = tpu.concatenate %629, %560 in 1 : vector<8x64xf32>, vector<8x64xf32> -> vector<8x128xf32>
    %631 = arith.truncf %630 : vector<8x128xf32> to vector<8x128xbf16>
    %c1_157 = arith.constant 1 : index
    %c0_158 = arith.constant 0 : index
    %c0_159 = arith.constant 0 : index
    %632 = vector.load %arg2[%c1_157, %c0_158, %c0_159] : memref<3x128x256xbf16, #tpu.memory_space<vmem>>, vector<1x128x256xbf16>
    %633 = vector.shape_cast %632 : vector<1x128x256xbf16> to vector<128x256xbf16>
    %cst_160 = arith.constant dense<0.000000e+00> : vector<8x256xf32>
    %634 = tpu.matmul %631, %633, %cst_160 {dimension_numbers = #tpu.dot_dimension_numbers<[1], [0], [0], [1], [0, 0, 1, 1], [], []>} : vector<8x128xbf16>, vector<128x256xbf16>, vector<8x256xf32> -> vector<8x256xf32>
    %635 = arith.addf %634, %19 : vector<8x256xf32>
    %636 = arith.mulf %635, %8 : vector<8x256xf32>
    %637 = arith.negf %636 : vector<8x256xf32>
    %638 = math.exp %637 : vector<8x256xf32>
    %cst_161 = arith.constant 1.000000e+00 : f32
    %639 = vector.broadcast %cst_161 : f32 to vector<8x256xf32>
    %640 = arith.addf %639, %638 : vector<8x256xf32>
    %641 = arith.divf %639, %640 : vector<8x256xf32>
    %642 = arith.mulf %641, %8 : vector<8x256xf32>
    %643 = arith.addf %642, %11 : vector<8x256xf32>
    %644 = vector.extract_strided_slice %643 {offsets = [0, 0], sizes = [8, 64], strides = [1, 1]} : vector<8x256xf32> to vector<8x64xf32>
    %645 = vector.extract_strided_slice %643 {offsets = [0, 64], sizes = [8, 64], strides = [1, 1]} : vector<8x256xf32> to vector<8x64xf32>
    %646 = vector.extract_strided_slice %643 {offsets = [0, 128], sizes = [8, 64], strides = [1, 1]} : vector<8x256xf32> to vector<8x64xf32>
    %647 = vector.extract_strided_slice %643 {offsets = [0, 192], sizes = [8, 64], strides = [1, 1]} : vector<8x256xf32> to vector<8x64xf32>
    %648 = arith.mulf %645, %558 : vector<8x64xf32>
    %649 = arith.mulf %644, %646 : vector<8x64xf32>
    %650 = arith.addf %648, %649 : vector<8x64xf32>
    %651 = math.tanh %650 : vector<8x64xf32>
    %652 = arith.mulf %647, %651 : vector<8x64xf32>
    %653 = tpu.concatenate %652, %583 in 1 : vector<8x64xf32>, vector<8x64xf32> -> vector<8x128xf32>
    %654 = arith.truncf %653 : vector<8x128xf32> to vector<8x128xbf16>
    %c2_162 = arith.constant 2 : index
    %c0_163 = arith.constant 0 : index
    %c0_164 = arith.constant 0 : index
    %655 = vector.load %arg2[%c2_162, %c0_163, %c0_164] : memref<3x128x256xbf16, #tpu.memory_space<vmem>>, vector<1x128x256xbf16>
    %656 = vector.shape_cast %655 : vector<1x128x256xbf16> to vector<128x256xbf16>
    %cst_165 = arith.constant dense<0.000000e+00> : vector<8x256xf32>
    %657 = tpu.matmul %654, %656, %cst_165 {dimension_numbers = #tpu.dot_dimension_numbers<[1], [0], [0], [1], [0, 0, 1, 1], [], []>} : vector<8x128xbf16>, vector<128x256xbf16>, vector<8x256xf32> -> vector<8x256xf32>
    %658 = arith.addf %657, %23 : vector<8x256xf32>
    %659 = arith.mulf %658, %8 : vector<8x256xf32>
    %660 = arith.negf %659 : vector<8x256xf32>
    %661 = math.exp %660 : vector<8x256xf32>
    %cst_166 = arith.constant 1.000000e+00 : f32
    %662 = vector.broadcast %cst_166 : f32 to vector<8x256xf32>
    %663 = arith.addf %662, %661 : vector<8x256xf32>
    %664 = arith.divf %662, %663 : vector<8x256xf32>
    %665 = arith.mulf %664, %8 : vector<8x256xf32>
    %666 = arith.addf %665, %11 : vector<8x256xf32>
    %667 = vector.extract_strided_slice %666 {offsets = [0, 0], sizes = [8, 64], strides = [1, 1]} : vector<8x256xf32> to vector<8x64xf32>
    %668 = vector.extract_strided_slice %666 {offsets = [0, 64], sizes = [8, 64], strides = [1, 1]} : vector<8x256xf32> to vector<8x64xf32>
    %669 = vector.extract_strided_slice %666 {offsets = [0, 128], sizes = [8, 64], strides = [1, 1]} : vector<8x256xf32> to vector<8x64xf32>
    %670 = vector.extract_strided_slice %666 {offsets = [0, 192], sizes = [8, 64], strides = [1, 1]} : vector<8x256xf32> to vector<8x64xf32>
    %671 = arith.mulf %668, %581 : vector<8x64xf32>
    %672 = arith.mulf %667, %669 : vector<8x64xf32>
    %673 = arith.addf %671, %672 : vector<8x64xf32>
    %674 = math.tanh %673 : vector<8x64xf32>
    %675 = arith.mulf %670, %674 : vector<8x64xf32>
    %c7 = arith.constant 7 : index
    %c0_167 = arith.constant 0 : index
    %c0_168 = arith.constant 0 : index
    %676 = vector.load %arg0[%c7, %c0_167, %c0_168] : memref<8x8x256xf32, #tpu.memory_space<vmem>>, vector<1x8x256xf32>
    %677 = vector.shape_cast %676 : vector<1x8x256xf32> to vector<8x256xf32>
    %678 = arith.truncf %606 : vector<8x64xf32> to vector<8x64xbf16>
    %c0_169 = arith.constant 0 : index
    %c0_170 = arith.constant 0 : index
    %679 = vector.load %arg1[%c0_169, %c0_170] : memref<64x256xbf16, #tpu.memory_space<vmem>>, vector<64x256xbf16>
    %cst_171 = arith.constant dense<0.000000e+00> : vector<8x256xf32>
    %680 = tpu.matmul %678, %679, %cst_171 {dimension_numbers = #tpu.dot_dimension_numbers<[1], [0], [0], [1], [0, 0, 1, 1], [], []>} : vector<8x64xbf16>, vector<64x256xbf16>, vector<8x256xf32> -> vector<8x256xf32>
    %681 = arith.addf %677, %680 : vector<8x256xf32>
    %682 = arith.mulf %681, %8 : vector<8x256xf32>
    %683 = arith.negf %682 : vector<8x256xf32>
    %684 = math.exp %683 : vector<8x256xf32>
    %cst_172 = arith.constant 1.000000e+00 : f32
    %685 = vector.broadcast %cst_172 : f32 to vector<8x256xf32>
    %686 = arith.addf %685, %684 : vector<8x256xf32>
    %687 = arith.divf %685, %686 : vector<8x256xf32>
    %688 = arith.mulf %687, %8 : vector<8x256xf32>
    %689 = arith.addf %688, %11 : vector<8x256xf32>
    %690 = vector.extract_strided_slice %689 {offsets = [0, 0], sizes = [8, 64], strides = [1, 1]} : vector<8x256xf32> to vector<8x64xf32>
    %691 = vector.extract_strided_slice %689 {offsets = [0, 64], sizes = [8, 64], strides = [1, 1]} : vector<8x256xf32> to vector<8x64xf32>
    %692 = vector.extract_strided_slice %689 {offsets = [0, 128], sizes = [8, 64], strides = [1, 1]} : vector<8x256xf32> to vector<8x64xf32>
    %693 = vector.extract_strided_slice %689 {offsets = [0, 192], sizes = [8, 64], strides = [1, 1]} : vector<8x256xf32> to vector<8x64xf32>
    %694 = arith.mulf %691, %604 : vector<8x64xf32>
    %695 = arith.mulf %690, %692 : vector<8x64xf32>
    %696 = arith.addf %694, %695 : vector<8x64xf32>
    %697 = math.tanh %696 : vector<8x64xf32>
    %698 = arith.mulf %693, %697 : vector<8x64xf32>
    %699 = tpu.concatenate %698, %629 in 1 : vector<8x64xf32>, vector<8x64xf32> -> vector<8x128xf32>
    %700 = arith.truncf %699 : vector<8x128xf32> to vector<8x128xbf16>
    %c0_173 = arith.constant 0 : index
    %c0_174 = arith.constant 0 : index
    %c0_175 = arith.constant 0 : index
    %701 = vector.load %arg2[%c0_173, %c0_174, %c0_175] : memref<3x128x256xbf16, #tpu.memory_space<vmem>>, vector<1x128x256xbf16>
    %702 = vector.shape_cast %701 : vector<1x128x256xbf16> to vector<128x256xbf16>
    %cst_176 = arith.constant dense<0.000000e+00> : vector<8x256xf32>
    %703 = tpu.matmul %700, %702, %cst_176 {dimension_numbers = #tpu.dot_dimension_numbers<[1], [0], [0], [1], [0, 0, 1, 1], [], []>} : vector<8x128xbf16>, vector<128x256xbf16>, vector<8x256xf32> -> vector<8x256xf32>
    %704 = arith.addf %703, %15 : vector<8x256xf32>
    %705 = arith.mulf %704, %8 : vector<8x256xf32>
    %706 = arith.negf %705 : vector<8x256xf32>
    %707 = math.exp %706 : vector<8x256xf32>
    %cst_177 = arith.constant 1.000000e+00 : f32
    %708 = vector.broadcast %cst_177 : f32 to vector<8x256xf32>
    %709 = arith.addf %708, %707 : vector<8x256xf32>
    %710 = arith.divf %708, %709 : vector<8x256xf32>
    %711 = arith.mulf %710, %8 : vector<8x256xf32>
    %712 = arith.addf %711, %11 : vector<8x256xf32>
    %713 = vector.extract_strided_slice %712 {offsets = [0, 0], sizes = [8, 64], strides = [1, 1]} : vector<8x256xf32> to vector<8x64xf32>
    %714 = vector.extract_strided_slice %712 {offsets = [0, 64], sizes = [8, 64], strides = [1, 1]} : vector<8x256xf32> to vector<8x64xf32>
    %715 = vector.extract_strided_slice %712 {offsets = [0, 128], sizes = [8, 64], strides = [1, 1]} : vector<8x256xf32> to vector<8x64xf32>
    %716 = vector.extract_strided_slice %712 {offsets = [0, 192], sizes = [8, 64], strides = [1, 1]} : vector<8x256xf32> to vector<8x64xf32>
    %717 = arith.mulf %714, %627 : vector<8x64xf32>
    %718 = arith.mulf %713, %715 : vector<8x64xf32>
    %719 = arith.addf %717, %718 : vector<8x64xf32>
    %720 = math.tanh %719 : vector<8x64xf32>
    %721 = arith.mulf %716, %720 : vector<8x64xf32>
    %722 = tpu.concatenate %721, %652 in 1 : vector<8x64xf32>, vector<8x64xf32> -> vector<8x128xf32>
    %723 = arith.truncf %722 : vector<8x128xf32> to vector<8x128xbf16>
    %c1_178 = arith.constant 1 : index
    %c0_179 = arith.constant 0 : index
    %c0_180 = arith.constant 0 : index
    %724 = vector.load %arg2[%c1_178, %c0_179, %c0_180] : memref<3x128x256xbf16, #tpu.memory_space<vmem>>, vector<1x128x256xbf16>
    %725 = vector.shape_cast %724 : vector<1x128x256xbf16> to vector<128x256xbf16>
    %cst_181 = arith.constant dense<0.000000e+00> : vector<8x256xf32>
    %726 = tpu.matmul %723, %725, %cst_181 {dimension_numbers = #tpu.dot_dimension_numbers<[1], [0], [0], [1], [0, 0, 1, 1], [], []>} : vector<8x128xbf16>, vector<128x256xbf16>, vector<8x256xf32> -> vector<8x256xf32>
    %727 = arith.addf %726, %19 : vector<8x256xf32>
    %728 = arith.mulf %727, %8 : vector<8x256xf32>
    %729 = arith.negf %728 : vector<8x256xf32>
    %730 = math.exp %729 : vector<8x256xf32>
    %cst_182 = arith.constant 1.000000e+00 : f32
    %731 = vector.broadcast %cst_182 : f32 to vector<8x256xf32>
    %732 = arith.addf %731, %730 : vector<8x256xf32>
    %733 = arith.divf %731, %732 : vector<8x256xf32>
    %734 = arith.mulf %733, %8 : vector<8x256xf32>
    %735 = arith.addf %734, %11 : vector<8x256xf32>
    %736 = vector.extract_strided_slice %735 {offsets = [0, 0], sizes = [8, 64], strides = [1, 1]} : vector<8x256xf32> to vector<8x64xf32>
    %737 = vector.extract_strided_slice %735 {offsets = [0, 64], sizes = [8, 64], strides = [1, 1]} : vector<8x256xf32> to vector<8x64xf32>
    %738 = vector.extract_strided_slice %735 {offsets = [0, 128], sizes = [8, 64], strides = [1, 1]} : vector<8x256xf32> to vector<8x64xf32>
    %739 = vector.extract_strided_slice %735 {offsets = [0, 192], sizes = [8, 64], strides = [1, 1]} : vector<8x256xf32> to vector<8x64xf32>
    %740 = arith.mulf %737, %650 : vector<8x64xf32>
    %741 = arith.mulf %736, %738 : vector<8x64xf32>
    %742 = arith.addf %740, %741 : vector<8x64xf32>
    %743 = math.tanh %742 : vector<8x64xf32>
    %744 = arith.mulf %739, %743 : vector<8x64xf32>
    %745 = tpu.concatenate %744, %675 in 1 : vector<8x64xf32>, vector<8x64xf32> -> vector<8x128xf32>
    %746 = arith.truncf %745 : vector<8x128xf32> to vector<8x128xbf16>
    %c2_183 = arith.constant 2 : index
    %c0_184 = arith.constant 0 : index
    %c0_185 = arith.constant 0 : index
    %747 = vector.load %arg2[%c2_183, %c0_184, %c0_185] : memref<3x128x256xbf16, #tpu.memory_space<vmem>>, vector<1x128x256xbf16>
    %748 = vector.shape_cast %747 : vector<1x128x256xbf16> to vector<128x256xbf16>
    %cst_186 = arith.constant dense<0.000000e+00> : vector<8x256xf32>
    %749 = tpu.matmul %746, %748, %cst_186 {dimension_numbers = #tpu.dot_dimension_numbers<[1], [0], [0], [1], [0, 0, 1, 1], [], []>} : vector<8x128xbf16>, vector<128x256xbf16>, vector<8x256xf32> -> vector<8x256xf32>
    %750 = arith.addf %749, %23 : vector<8x256xf32>
    %751 = arith.mulf %750, %8 : vector<8x256xf32>
    %752 = arith.negf %751 : vector<8x256xf32>
    %753 = math.exp %752 : vector<8x256xf32>
    %cst_187 = arith.constant 1.000000e+00 : f32
    %754 = vector.broadcast %cst_187 : f32 to vector<8x256xf32>
    %755 = arith.addf %754, %753 : vector<8x256xf32>
    %756 = arith.divf %754, %755 : vector<8x256xf32>
    %757 = arith.mulf %756, %8 : vector<8x256xf32>
    %758 = arith.addf %757, %11 : vector<8x256xf32>
    %759 = vector.extract_strided_slice %758 {offsets = [0, 0], sizes = [8, 64], strides = [1, 1]} : vector<8x256xf32> to vector<8x64xf32>
    %760 = vector.extract_strided_slice %758 {offsets = [0, 64], sizes = [8, 64], strides = [1, 1]} : vector<8x256xf32> to vector<8x64xf32>
    %761 = vector.extract_strided_slice %758 {offsets = [0, 128], sizes = [8, 64], strides = [1, 1]} : vector<8x256xf32> to vector<8x64xf32>
    %762 = vector.extract_strided_slice %758 {offsets = [0, 192], sizes = [8, 64], strides = [1, 1]} : vector<8x256xf32> to vector<8x64xf32>
    %763 = arith.mulf %760, %673 : vector<8x64xf32>
    %764 = arith.mulf %759, %761 : vector<8x64xf32>
    %765 = arith.addf %763, %764 : vector<8x64xf32>
    %766 = math.tanh %765 : vector<8x64xf32>
    %767 = arith.mulf %762, %766 : vector<8x64xf32>
    %c0_188 = arith.constant 0 : index
    %c0_189 = arith.constant 0 : index
    %768 = vector.load %arg5[%c0_188, %c0_189] : memref<1x128xf32, #tpu.memory_space<vmem>>, vector<1x128xf32>
    %769 = vector.shape_cast %768 : vector<1x128xf32> to vector<1x128xf32>
    %770 = vector.broadcast %769 : vector<1x128xf32> to vector<8x128xf32>
    %771 = arith.truncf %698 : vector<8x64xf32> to vector<8x64xbf16>
    %c0_190 = arith.constant 0 : index
    %c0_191 = arith.constant 0 : index
    %c0_192 = arith.constant 0 : index
    %772 = vector.load %arg4[%c0_190, %c0_191, %c0_192] : memref<8x64x128xbf16, #tpu.memory_space<vmem>>, vector<1x64x128xbf16>
    %773 = vector.shape_cast %772 : vector<1x64x128xbf16> to vector<64x128xbf16>
    %cst_193 = arith.constant dense<0.000000e+00> : vector<8x128xf32>
    %774 = tpu.matmul %771, %773, %cst_193 {dimension_numbers = #tpu.dot_dimension_numbers<[1], [0], [0], [1], [0, 0, 1, 1], [], []>} : vector<8x64xbf16>, vector<64x128xbf16>, vector<8x128xf32> -> vector<8x128xf32>
    %775 = arith.addf %770, %774 : vector<8x128xf32>
    %776 = arith.truncf %696 : vector<8x64xf32> to vector<8x64xbf16>
    %c1_194 = arith.constant 1 : index
    %c0_195 = arith.constant 0 : index
    %c0_196 = arith.constant 0 : index
    %777 = vector.load %arg4[%c1_194, %c0_195, %c0_196] : memref<8x64x128xbf16, #tpu.memory_space<vmem>>, vector<1x64x128xbf16>
    %778 = vector.shape_cast %777 : vector<1x64x128xbf16> to vector<64x128xbf16>
    %cst_197 = arith.constant dense<0.000000e+00> : vector<8x128xf32>
    %779 = tpu.matmul %776, %778, %cst_197 {dimension_numbers = #tpu.dot_dimension_numbers<[1], [0], [0], [1], [0, 0, 1, 1], [], []>} : vector<8x64xbf16>, vector<64x128xbf16>, vector<8x128xf32> -> vector<8x128xf32>
    %780 = arith.addf %775, %779 : vector<8x128xf32>
    %781 = arith.truncf %721 : vector<8x64xf32> to vector<8x64xbf16>
    %c2_198 = arith.constant 2 : index
    %c0_199 = arith.constant 0 : index
    %c0_200 = arith.constant 0 : index
    %782 = vector.load %arg4[%c2_198, %c0_199, %c0_200] : memref<8x64x128xbf16, #tpu.memory_space<vmem>>, vector<1x64x128xbf16>
    %783 = vector.shape_cast %782 : vector<1x64x128xbf16> to vector<64x128xbf16>
    %cst_201 = arith.constant dense<0.000000e+00> : vector<8x128xf32>
    %784 = tpu.matmul %781, %783, %cst_201 {dimension_numbers = #tpu.dot_dimension_numbers<[1], [0], [0], [1], [0, 0, 1, 1], [], []>} : vector<8x64xbf16>, vector<64x128xbf16>, vector<8x128xf32> -> vector<8x128xf32>
    %785 = arith.addf %780, %784 : vector<8x128xf32>
    %786 = arith.truncf %719 : vector<8x64xf32> to vector<8x64xbf16>
    %c3_202 = arith.constant 3 : index
    %c0_203 = arith.constant 0 : index
    %c0_204 = arith.constant 0 : index
    %787 = vector.load %arg4[%c3_202, %c0_203, %c0_204] : memref<8x64x128xbf16, #tpu.memory_space<vmem>>, vector<1x64x128xbf16>
    %788 = vector.shape_cast %787 : vector<1x64x128xbf16> to vector<64x128xbf16>
    %cst_205 = arith.constant dense<0.000000e+00> : vector<8x128xf32>
    %789 = tpu.matmul %786, %788, %cst_205 {dimension_numbers = #tpu.dot_dimension_numbers<[1], [0], [0], [1], [0, 0, 1, 1], [], []>} : vector<8x64xbf16>, vector<64x128xbf16>, vector<8x128xf32> -> vector<8x128xf32>
    %790 = arith.addf %785, %789 : vector<8x128xf32>
    %791 = arith.truncf %744 : vector<8x64xf32> to vector<8x64xbf16>
    %c4_206 = arith.constant 4 : index
    %c0_207 = arith.constant 0 : index
    %c0_208 = arith.constant 0 : index
    %792 = vector.load %arg4[%c4_206, %c0_207, %c0_208] : memref<8x64x128xbf16, #tpu.memory_space<vmem>>, vector<1x64x128xbf16>
    %793 = vector.shape_cast %792 : vector<1x64x128xbf16> to vector<64x128xbf16>
    %cst_209 = arith.constant dense<0.000000e+00> : vector<8x128xf32>
    %794 = tpu.matmul %791, %793, %cst_209 {dimension_numbers = #tpu.dot_dimension_numbers<[1], [0], [0], [1], [0, 0, 1, 1], [], []>} : vector<8x64xbf16>, vector<64x128xbf16>, vector<8x128xf32> -> vector<8x128xf32>
    %795 = arith.addf %790, %794 : vector<8x128xf32>
    %796 = arith.truncf %742 : vector<8x64xf32> to vector<8x64xbf16>
    %c5_210 = arith.constant 5 : index
    %c0_211 = arith.constant 0 : index
    %c0_212 = arith.constant 0 : index
    %797 = vector.load %arg4[%c5_210, %c0_211, %c0_212] : memref<8x64x128xbf16, #tpu.memory_space<vmem>>, vector<1x64x128xbf16>
    %798 = vector.shape_cast %797 : vector<1x64x128xbf16> to vector<64x128xbf16>
    %cst_213 = arith.constant dense<0.000000e+00> : vector<8x128xf32>
    %799 = tpu.matmul %796, %798, %cst_213 {dimension_numbers = #tpu.dot_dimension_numbers<[1], [0], [0], [1], [0, 0, 1, 1], [], []>} : vector<8x64xbf16>, vector<64x128xbf16>, vector<8x128xf32> -> vector<8x128xf32>
    %800 = arith.addf %795, %799 : vector<8x128xf32>
    %801 = arith.truncf %767 : vector<8x64xf32> to vector<8x64xbf16>
    %c6_214 = arith.constant 6 : index
    %c0_215 = arith.constant 0 : index
    %c0_216 = arith.constant 0 : index
    %802 = vector.load %arg4[%c6_214, %c0_215, %c0_216] : memref<8x64x128xbf16, #tpu.memory_space<vmem>>, vector<1x64x128xbf16>
    %803 = vector.shape_cast %802 : vector<1x64x128xbf16> to vector<64x128xbf16>
    %cst_217 = arith.constant dense<0.000000e+00> : vector<8x128xf32>
    %804 = tpu.matmul %801, %803, %cst_217 {dimension_numbers = #tpu.dot_dimension_numbers<[1], [0], [0], [1], [0, 0, 1, 1], [], []>} : vector<8x64xbf16>, vector<64x128xbf16>, vector<8x128xf32> -> vector<8x128xf32>
    %805 = arith.addf %800, %804 : vector<8x128xf32>
    %806 = arith.truncf %765 : vector<8x64xf32> to vector<8x64xbf16>
    %c7_218 = arith.constant 7 : index
    %c0_219 = arith.constant 0 : index
    %c0_220 = arith.constant 0 : index
    %807 = vector.load %arg4[%c7_218, %c0_219, %c0_220] : memref<8x64x128xbf16, #tpu.memory_space<vmem>>, vector<1x64x128xbf16>
    %808 = vector.shape_cast %807 : vector<1x64x128xbf16> to vector<64x128xbf16>
    %cst_221 = arith.constant dense<0.000000e+00> : vector<8x128xf32>
    %809 = tpu.matmul %806, %808, %cst_221 {dimension_numbers = #tpu.dot_dimension_numbers<[1], [0], [0], [1], [0, 0, 1, 1], [], []>} : vector<8x64xbf16>, vector<64x128xbf16>, vector<8x128xf32> -> vector<8x128xf32>
    %810 = arith.addf %805, %809 : vector<8x128xf32>
    %cst_222 = arith.constant dense<0xFF800000> : vector<8xf32>
    %811 = vector.multi_reduction <maximumf>, %810, %cst_222 [1] : vector<8x128xf32> to vector<8xf32>
    %812 = vector.shape_cast %811 : vector<8xf32> to vector<8x1xf32>
    %813 = vector.broadcast %812 : vector<8x1xf32> to vector<8x128xf32>
    %814 = arith.subf %810, %813 : vector<8x128xf32>
    %815 = math.exp %814 : vector<8x128xf32>
    %cst_223 = arith.constant dense<0.000000e+00> : vector<8xf32>
    %816 = vector.multi_reduction <add>, %815, %cst_223 [1] : vector<8x128xf32> to vector<8xf32>
    %817 = vector.shape_cast %816 : vector<8xf32> to vector<8x1xf32>
    %818 = vector.broadcast %817 : vector<8x1xf32> to vector<8x128xf32>
    %819 = arith.divf %815, %818 : vector<8x128xf32>
    %c0_224 = arith.constant 0 : index
    %c0_225 = arith.constant 0 : index
    %820 = vector.load %arg6[%c0_224, %c0_225] : memref<8x128xf32, #tpu.memory_space<vmem>>, vector<8x128xf32>
    tpu.vector_store %arg6[%c0_224, %c0_225], %819 {strides = array<i32>} : memref<8x128xf32, #tpu.memory_space<vmem>>, vector<8x128xf32>,
    return
  }
}

</mosaic_0001>

<bundles_post_ra>
// kernel: name_format_forward.1
= control target key start
LH: loop header
LB: loop body
LE: loop exit
PB: predicated region body
PF: predicated region fallthrough
CT: control target
= control target key end

     0   :  { %11 = vsyncpa [#allocation3], 0  ;;  %s4481_s21 = smov [#allocation2]   ;;  %s6473_s0 = inlined_call_operand.vmem [shape: f32[8,8,256], index: 0, kind: input, shape index: {}]   ;;  %s6474_s1 = inlined_call_operand.vmem [shape: bf16[64,256], index: 1, kind: input, shape index: {}]   ;;  %s6475_s2 = inlined_call_operand.vmem [shape: bf16[3,128,256], index: 2, kind: input, shape index: {}]   ;;  %s6476_s3 = inlined_call_operand.vmem [shape: f32[3,1,256], index: 3, kind: input, shape index: {}]   ;;  %s6477_s4 = inlined_call_operand.hbm [shape: bf16[8,64,128], index: 4, kind: input, shape index: {}]   ;;  %s6478_s5 = inlined_call_operand.vmem [shape: f32[1,128], index: 5, kind: input, shape index: {}]   ;;  %s6479_s6 = inlined_call_operand.vmem [shape: f32[8,128], index: 6, kind: output, shape index: {}]  }
   0x1   :  { %s25_s22 = sshll.u32 %s4481_s21, 4  ;;  %s4457_s25 = scalar_lea.hbm %s6477_s4, 4096  ;;  %s26_s22 = int_to_ptr.vmem [resolvable:$true] %s25_s22 }
   0x2   :  { %p4458_p0 = scmp.ne.s32.totalorder %s6477_s4, %s4457_s25  ;;  %p4461_p1 = scmp.lt.u32.totalorder %s4457_s25, %s6477_s4 }
   0x4   :  { %p4463_p2 = pnand %p4461_p1, %p4458_p0 }
   0x6   :  { %4466 = shalt.err (!%p4463_p2)
}
   0x7   :  { %s4467_s30 = scalar_lea.vmem %s26_s22, 4096  ;;  %p4472_p4 = scmp.lt.s32.totalorder %s26_s22, %s26_s22 }
   0x8   :  { %p4468_p3 = scmp.ne.s32.totalorder %s26_s22, %s4467_s30  ;;  %p4473_p5 = scmp.lt.s32.totalorder %s4467_s30, %s4467_s30 }
   0xa   :  { %p4474_p6 = por %p4473_p5, %p4472_p4 }
   0xc   :  { %p4475_p7 = pnand %p4474_p6, %p4468_p3 }
   0xe   :  { %4478 = shalt.err (!%p4475_p7)
}
   0xf   :  { %s4482_s7 = smov 64   ;;  %s4483_s8 = smov 4  }
  0x10   :  { %31 = dma.hbm_to_vmem [thread:$0]  %s6477_s4, 4096, %s26_s22, [#allocation3], %s4482_s7, %s4482_s7, %s4483_s8  }
  0x11   :  { %4479 = dma.done.wait [#allocation3], 4096  }
  0x12   :  { %4480 = vsyncadd [#allocation3], 4294963200  ;;  %v6482_v0 = vmov 0   ;;  %v4542_v1 = vld [vmem:[%s6474_s1 + $0x4] ss:$8 sps:$4 sm:$0xff]   ;;  %v38_v9 = vlaneseq  ;;  %v4485_v16 = vmov 1.0  }
  0x13   :  { %175 = vmatprep.mubr.bf16.mxu0 %v6482_v0  ;;  %689 = vmatprep.mubr.bf16.mxu1 %v6482_v0  ;;  %v4547_v2 = vld [vmem:[%s6474_s1] ss:$8 sps:$4 sm:$0xff]   ;;  %v4553_v3 = vld [vmem:[%s6474_s1 + $0x14] ss:$8 sps:$4 sm:$0xff]   ;;  %v4559_v4 = vld [vmem:[%s6474_s1 + $0x10] ss:$8 sps:$4 sm:$0xff]  }
  0x14   :  { %143 = vmatprep.subr.bf16.mxu0 %v4542_v1  ;;  %v4565_v5 = vld [vmem:[%s6474_s1 + $0x24] ss:$8 sps:$4 sm:$0xff]   ;;  %v4570_v6 = vld [vmem:[%s6474_s1 + $0x20] ss:$8 sps:$4 sm:$0xff]   ;;  %v4575_v7 = vld [vmem:[%s6474_s1 + $0x34] ss:$8 sps:$4 sm:$0xff]  }
  0x15   :  { %144 = vmatpush1.bf16.msra.mxu0 %v4547_v2  ;;  %v4582_v8 = vld [vmem:[%s6474_s1 + $0x30] ss:$8 sps:$4 sm:$0xff]   ;;  %v39_v10 = vand.u32 127, %v38_v9  ;;  %v89_v12 = vld [vmem:[%s6473_s0] sm:$0xff]  ;;  %v90_v13 = vld [vmem:[%s6473_s0 + $0x8] sm:$0xff]  ;;  %v6480_v30 = vmov 0.0  }
  0x16   :  { %145 = vmatprep.subr.bf16.mxu0 %v4553_v3  ;;  %v4610_v36 = vld [vmem:[%s6475_s2 + $0x4] ss:$8 sps:$4 sm:$0xff]   ;;  %v4615_v37 = vld [vmem:[%s6475_s2] ss:$8 sps:$4 sm:$0xff]   ;;  %v4620_v38 = vld [vmem:[%s6475_s2 + $0x14] ss:$8 sps:$4 sm:$0xff]  }
  0x17   :  { %v40_v11 = vadd.s32 128, %v39_v10  ;;  %v4627_v39 = vld [vmem:[%s6475_s2 + $0x10] ss:$8 sps:$4 sm:$0xff]   ;;  %v4633_v40 = vld [vmem:[%s6475_s2 + $0x24] ss:$8 sps:$4 sm:$0xff]   ;;  %vm139_vm1 = vcmask 523264  }
  0x18   :  { %v4639_v41 = vld [vmem:[%s6475_s2 + $0x20] ss:$8 sps:$4 sm:$0xff]   ;;  %v4645_v42 = vld [vmem:[%s6475_s2 + $0x34] ss:$8 sps:$4 sm:$0xff]   ;;  %v4651_v43 = vld [vmem:[%s6475_s2 + $0x30] ss:$8 sps:$4 sm:$0xff]  }
  0x19   :  { %146 = vmatpush1.bf16.msra.mxu0 %v4559_v4  ;;  %vm44_vm0 = vcmp.lt.s32.totalorder %v40_v11, 192  ;;  %v4657_v44 = vld [vmem:[%s6475_s2 + $0x44] ss:$8 sps:$4 sm:$0xff]   ;;  %v4663_v45 = vld [vmem:[%s6475_s2 + $0x40] ss:$8 sps:$4 sm:$0xff]   ;;  %vm4710_vm2 = vmpackc.low %vm139_vm1, %vm139_vm1  ;;  %v54_v61 = vshrl.u32 %v38_v9, 7 }
  0x1a   :  { %147 = vmatprep.subr.bf16.mxu0 %v4565_v5  ;;  %v4597_v17 = vsel %vm44_vm0, 2.0, %v4485_v16  ;;  %v4602_v31 = vsel %vm44_vm0, -1.0, %v6480_v30  ;;  %v4669_v46 = vld [vmem:[%s6475_s2 + $0x54] ss:$8 sps:$4 sm:$0xff]   ;;  %v4675_v47 = vld [vmem:[%s6475_s2 + $0x50] ss:$8 sps:$4 sm:$0xff]  }
  0x1b   :  { %v4681_v48 = vld [vmem:[%s6475_s2 + $0x64] ss:$8 sps:$4 sm:$0xff]   ;;  %v4687_v49 = vld [vmem:[%s6475_s2 + $0x60] ss:$8 sps:$4 sm:$0xff]   ;;  %v4693_v50 = vld [vmem:[%s6475_s2 + $0x74] ss:$8 sps:$4 sm:$0xff]  }
  0x1c   :  { %6562 = vst [vmem:[#allocation5_spill] sm:$0xff] %v4681_v48  ;;  %6563 = vst [vmem:[#allocation6_spill] sm:$0xff] %v4687_v49  ;;  %v4699_v51 = vld [vmem:[%s6475_s2 + $0x70] ss:$8 sps:$4 sm:$0xff]   ;;  %v4718_v62 = vsub.s32 0, %v54_v61  ;;  %v4723_v10 = vsub.s32 1, %v54_v61 }
  0x1d   :  { %148 = vmatpush1.bf16.msra.mxu0 %v4570_v6  ;;  %6564 = vst [vmem:[#allocation7_spill] sm:$0xff] %v4693_v50  ;;  %6565 = vst [vmem:[#allocation8_spill] sm:$0xff] %v4699_v51  ;;  %v51_v63 = vld [vmem:[%s6476_s3] sm:$0x3]  ;;  %v4799_v61 = vld [vmem:[%s6475_s2 + $0xd4] ss:$8 sps:$4 sm:$0xff]  }
  0x1e   :  { %149 = vmatprep.subr.bf16.mxu0 %v4575_v7  ;;  %v4726_v11 = vrot.slane %v51_v63, %v4718_v62  ;;  %vm4487_vm3 = vmmov 0  }
  0x21   :  { %150 = vmatpush1.bf16.msra.mxu0 %v4582_v8 }
  0x22   :  { %315 = vmatprep.subr.bf16.mxu0 %v4610_v36 }
  0x24   :  { %176 = vmatmul.mubr.bf16.vlgmr.msra.gmra.mrb[0].mxu0 %v6482_v0 }
  0x25   :  { %347 = vmatprep.mubr.bf16.mxu0 %v6482_v0  ;;  %316 = vmatpush1.bf16.msra.mxu0 %v4615_v37 }
  0x26   :  { %317 = vmatprep.subr.bf16.mxu0 %v4620_v38 }
  0x29   :  { %318 = vmatpush1.bf16.msra.mxu0 %v4627_v39 }
  0x2a   :  { %319 = vmatprep.subr.bf16.mxu0 %v4633_v40 }
  0x2d   :  { %320 = vmatpush1.bf16.msra.mxu0 %v4639_v41 }
  0x2e   :  { %321 = vmatprep.subr.bf16.mxu0 %v4645_v42 }
  0x31   :  { %322 = vmatpush1.bf16.msra.mxu0 %v4651_v43 }
  0x32   :  { %323 = vmatprep.subr.bf16.mxu0 %v4657_v44 }
  0x35   :  { %324 = vmatpush1.bf16.msra.mxu0 %v4663_v45 }
  0x36   :  { %325 = vmatprep.subr.bf16.mxu0 %v4669_v46 }
  0x39   :  { %326 = vmatpush1.bf16.msra.mxu0 %v4675_v47 }
  0x3a   :  { %327 = vmatprep.subr.bf16.mxu0 %v4681_v48 }
  0x3d   :  { %328 = vmatpush1.bf16.msra.mxu0 %v4687_v49 }
  0x3e   :  { %329 = vmatprep.subr.bf16.mxu0 %v4693_v50 }
  0x41   :  { %330 = vmatpush1.bf16.msra.mxu0 %v4699_v51 }
  0xf7   :  { %v177_v14 = vpop.f32.mrb[0].mxu0 }
  0xf8   :  { %v184_v15 = vadd.f32 %v177_v14, %v89_v12  ;;  %v179_v18 = vpop.f32.mrb[1].mxu0  ;;  %v4729_v12 = vrot.slane %v51_v63, %v4723_v10  ;;  %v4805_v63 = vld [vmem:[%s6475_s2 + $0xd0] ss:$8 sps:$4 sm:$0xff]  }
  0xf9   :  { %v185_v19 = vadd.f32 %v179_v18, %v90_v13  ;;  %v181_v20 = vpop.f32.mrb[2].mxu0 }
  0xfa   :  { %v3518_v21 = vmul.f32 -1.442695, %v184_v15  ;;  %v182_v22 = vpop.f32.mrb[3].mxu0 }
  0xfb   :  { %v187_v23 = vmul.f32 %v185_v19, %v4597_v17 }
  0xfc   :  { %4021 = vpow2.f32 %v3518_v21 }
  0xfd   :  { %v3519_v24 = vmul.f32 -1.442695, %v187_v23 }
  0xff   :  { %4023 = vpow2.f32 %v3519_v24 }
 0x106   :  { %v4022_v25 = vpop.eup %4021 }
 0x107   :  { %v194_v28 = vadd.f32 1.0, %v4022_v25 }
 0x109   :  { %v4024_v26 = vpop.eup %4023 }
 0x10a   :  { %v195_v27 = vadd.f32 1.0, %v4024_v26 }
 0x10c   :  { %4025 = vrcp.f32 %v195_v27 }
 0x10d   :  { %4027 = vrcp.f32 %v194_v28 }
 0x116   :  { %v4026_v29 = vpop.eup %4025 }
 0x117   :  { %v201_v32 = vmul.f32 %v4026_v29, %v4597_v17  ;;  %v4028_v34 = vpop.eup %4027 }
 0x118   :  { %v204_v52 = vmul.f32 0.0, %v4028_v34 }
 0x119   :  { %v203_v33 = vadd.f32 %v201_v32, %v4602_v31 }
 0x11b   :  { %v205_v35 = vmul.f32 %v4028_v34, %v203_v33  ;;  %v4745_v34 = vld [vmem:[%s6475_s2 + $0x80] ss:$8 sps:$4 sm:$0xff]  }
 0x11d   :  { %207 = vrot.lane.b32.xlu0 %v205_v35, %s4482_s7  ;;  %v4750_v35 = vld [vmem:[%s6475_s2 + $0x94] ss:$8 sps:$4 sm:$0xff]  }
 0x18f   :  { %v208_v53 = vpop.permute.xlu0 %207 }
 0x190   :  { %v4703_v54 = vadd.f32 %v208_v53, %v204_v52  ;;  %v4757_v52 = vld [vmem:[%s6475_s2 + $0x90] ss:$8 sps:$4 sm:$0xff]   ;;  %v4763_v53 = vld [vmem:[%s6475_s2 + $0xa4] ss:$8 sps:$4 sm:$0xff]  }
 0x192   :  { %4029 = vtanh.f32 %v4703_v54 }
 0x19c   :  { %v4030_v55 = vpop.eup %4029 }
 0x19d   :  { %v212_v56 = vmul.f32 %v4030_v55, %v203_v33  ;;  %v4740_v33 = vld [vmem:[%s6475_s2 + $0x84] ss:$8 sps:$4 sm:$0xff]   ;;  %v4769_v55 = vld [vmem:[%s6475_s2 + $0xa0] ss:$8 sps:$4 sm:$0xff]  }
 0x19e   :  { %6568 = vst [vmem:[#allocation9_spill] sm:$0xff] %v4740_v33  ;;  %486 = vmatprep.subr.bf16.mxu0 %v4740_v33 }
 0x19f   :  { %214 = vrot.lane.b32.xlu0 %v212_v56, %s4482_s7  ;;  %v728_v57 = vpack.c.bf16 %v212_v56, %v212_v56  ;;  %v4775_v56 = vld [vmem:[%s6475_s2 + $0xb4] ss:$8 sps:$4 sm:$0xff]  }
 0x1a3   :  { %730 = vrot.lane.b32.xlu0 %v728_v57, %s4482_s7  ;;  %v4781_v57 = vld [vmem:[%s6475_s2 + $0xb0] ss:$8 sps:$4 sm:$0xff]  }
 0x211   :  { %v215_v58 = vpop.permute.xlu0 %214 }
 0x212   :  { %v3537_v60 = vpack.c.bf16 %v215_v58, %v215_v58  ;;  %v4787_v58 = vld [vmem:[%s6475_s2 + $0xc4] ss:$8 sps:$4 sm:$0xff]  }
 0x214   :  { %3538 = vmatmul.mubr.msk.bf16.vlgmr.msra.gmra.mrb[4].mxu0 %vm4710_vm2, %v3537_v60  ;;  %v4793_v60 = vld [vmem:[%s6475_s2 + $0xc0] ss:$8 sps:$4 sm:$0xff]  }
 0x215   :  { %518 = vmatprep.mubr.bf16.mxu0 %v6482_v0  ;;  %487 = vmatpush1.bf16.msra.mxu0 %v4745_v34 }
 0x216   :  { %488 = vmatprep.subr.bf16.mxu0 %v4750_v35 }
 0x219   :  { %489 = vmatpush1.bf16.msra.mxu0 %v4757_v52 }
 0x21a   :  { %490 = vmatprep.subr.bf16.mxu0 %v4763_v53 }
 0x21d   :  { %491 = vmatpush1.bf16.msra.mxu0 %v4769_v55 }
 0x21e   :  { %492 = vmatprep.subr.bf16.mxu0 %v4775_v56 }
 0x221   :  { %493 = vmatpush1.bf16.msra.mxu0 %v4781_v57 }
 0x222   :  { %494 = vmatprep.subr.bf16.mxu0 %v4787_v58 }
 0x225   :  { %495 = vmatpush1.bf16.msra.mxu0 %v4793_v60 }
 0x226   :  { %496 = vmatprep.subr.bf16.mxu0 %v4799_v61 }
 0x229   :  { %497 = vmatpush1.bf16.msra.mxu0 %v4805_v63 }
 0x2e7   :  { %v349_v13 = vpop.f32.mrb[4].mxu0 }
 0x2e8   :  { %v350_v14 = vadd.f32 %v349_v13, %v4726_v11  ;;  %v351_v15 = vpop.f32.mrb[5].mxu0  ;;  %v4811_v13 = vld [vmem:[%s6475_s2 + $0xe4] ss:$8 sps:$4 sm:$0xff]  }
 0x2e9   :  { %v352_v9 = vadd.f32 %v351_v15, %v4729_v12  ;;  %v353_v16 = vpop.f32.mrb[6].mxu0  ;;  %498 = vmatprep.subr.bf16.mxu0 %v4811_v13  ;;  %v4823_v15 = vld [vmem:[%s6475_s2 + $0xf4] ss:$8 sps:$4 sm:$0xff]  }
 0x2ea   :  { %v3539_v18 = vmul.f32 -1.442695, %v350_v14  ;;  %v354_v19 = vpop.f32.mrb[7].mxu0  ;;  %v4817_v14 = vld [vmem:[%s6475_s2 + $0xe0] ss:$8 sps:$4 sm:$0xff]  }
 0x2eb   :  { %v357_v20 = vmul.f32 %v352_v9, %v4597_v17  ;;  %499 = vmatpush1.bf16.msra.mxu0 %v4817_v14  ;;  %v4829_v9 = vld [vmem:[%s6475_s2 + $0xf0] ss:$8 sps:$4 sm:$0xff]  }
 0x2ec   :  { %4031 = vpow2.f32 %v3539_v18  ;;  %500 = vmatprep.subr.bf16.mxu0 %v4823_v15 }
 0x2ed   :  { %v3540_v21 = vmul.f32 -1.442695, %v357_v20 }
 0x2ef   :  { %4033 = vpow2.f32 %v3540_v21  ;;  %501 = vmatpush1.bf16.msra.mxu0 %v4829_v9 }
 0x2f0   :  { %735 = vmatprep.subr.bf16.mxu0 %v4542_v1 }
 0x2f6   :  { %v4032_v22 = vpop.eup %4031 }
 0x2f7   :  { %v364_v25 = vadd.f32 1.0, %v4032_v22 }
 0x2f9   :  { %v4034_v23 = vpop.eup %4033 }
 0x2fa   :  { %v365_v24 = vadd.f32 1.0, %v4034_v23 }
 0x2fc   :  { %4035 = vrcp.f32 %v365_v24  ;;  %v731_v24 = vpop.permute.xlu0 %730 }
 0x2fd   :  { %4037 = vrcp.f32 %v364_v25 }
 0x306   :  { %v4036_v26 = vpop.eup %4035 }
 0x307   :  { %v371_v27 = vmul.f32 %v4036_v26, %v4597_v17  ;;  %v4038_v29 = vpop.eup %4037 }
 0x308   :  { %v374_v16 = vmul.f32 0.0, %v4038_v29 }
 0x309   :  { %v373_v28 = vadd.f32 %v371_v27, %v4602_v31  ;;  %v3615_v27 = vld [vmem:[%s6473_s0 + $0x10] sm:$0xff] }
 0x30b   :  { %v375_v32 = vmul.f32 %v4038_v29, %v373_v28 }
 0x30d   :  { %377 = vrot.lane.b32.xlu1 %v375_v32, %s4482_s7 }
 0x37f   :  { %v378_v18 = vpop.permute.xlu1 %377 }
 0x380   :  { %v4834_v19 = vadd.f32 %v378_v18, %v374_v16 }
 0x382   :  { %4039 = vtanh.f32 %v4834_v19 }
 0x38c   :  { %v4040_v20 = vpop.eup %4039 }
 0x38d   :  { %v4837_v21 = vmul.f32 %v4040_v20, %v373_v28  ;;  %v3616_v28 = vld [vmem:[%s6473_s0 + $0x18] sm:$0xff] }
 0x38f   :  { %384 = vrot.lane.b32.xlu1 %v4837_v21, %s4482_s7 }
 0x401   :  { %v385_v22 = vpop.permute.xlu1 %384 }
 0x402   :  { %v3574_v23 = vpack.c.bf16 %v385_v22, %v385_v22 }
 0x404   :  { %3575 = vmatmul.mubr.msk.bf16.vlgmr.msra.gmra.mrb[8].mxu0 %vm4710_vm2, %v3574_v23 }
 0x405   :  { %736 = vmatpush1.bf16.msra.mxu0 %v4547_v2  ;;  %767 = vmatprep.mubr.bf16.mxu0 %v6482_v0  ;;  %v3508_v2 = vld [vmem:[%s6476_s3 + $0x2] sm:$0x3] }
 0x406   :  { %737 = vmatprep.subr.bf16.mxu0 %v4553_v3  ;;  %v4884_v29 = vrot.slane %v3508_v2, %v4718_v62 }
 0x408   :  { %6570 = vst [vmem:[#allocation11_spill] sm:$0xff] %v4884_v29 }
 0x409   :  { %738 = vmatpush1.bf16.msra.mxu0 %v4559_v4 }
 0x40a   :  { %739 = vmatprep.subr.bf16.mxu0 %v4565_v5  ;;  %v4873_v5 = vrot.slane %v3508_v2, %v4723_v10 }
 0x40c   :  { %6569 = vst [vmem:[#allocation10_spill] sm:$0xff] %v4873_v5 }
 0x40d   :  { %740 = vmatpush1.bf16.msra.mxu0 %v4570_v6 }
 0x40e   :  { %741 = vmatprep.subr.bf16.mxu0 %v4575_v7 }
 0x411   :  { %742 = vmatpush1.bf16.msra.mxu0 %v4582_v8 }
 0x412   :  { %811 = vmatprep.subr.bf16.mxu0 %v4610_v36 }
 0x414   :  { %3617 = vmatmul.mubr.msk.bf16.vlgmr.msra.gmra.mrb[12].mxu0 %vm139_vm1, %v731_v24 }
 0x415   :  { %812 = vmatpush1.bf16.msra.mxu0 %v4615_v37  ;;  %843 = vmatprep.mubr.bf16.mxu0 %v6482_v0 }
 0x416   :  { %813 = vmatprep.subr.bf16.mxu0 %v4620_v38 }
 0x419   :  { %814 = vmatpush1.bf16.msra.mxu0 %v4627_v39 }
 0x41a   :  { %815 = vmatprep.subr.bf16.mxu0 %v4633_v40 }
 0x41d   :  { %816 = vmatpush1.bf16.msra.mxu0 %v4639_v41 }
 0x41e   :  { %817 = vmatprep.subr.bf16.mxu0 %v4645_v42 }
 0x421   :  { %818 = vmatpush1.bf16.msra.mxu0 %v4651_v43 }
 0x422   :  { %819 = vmatprep.subr.bf16.mxu0 %v4657_v44 }
 0x425   :  { %820 = vmatpush1.bf16.msra.mxu0 %v4663_v45 }
 0x426   :  { %821 = vmatprep.subr.bf16.mxu0 %v4669_v46 }
 0x429   :  { %822 = vmatpush1.bf16.msra.mxu0 %v4675_v47 }
 0x42a   :  { %823 = vmatprep.subr.bf16.mxu0 %v4681_v48 }
 0x42d   :  { %824 = vmatpush1.bf16.msra.mxu0 %v4687_v49  ;;  %v4991_v49 = vld [vmem:[%s6475_s2 + $0x170] ss:$8 sps:$4 sm:$0xff]  }
 0x42e   :  { %825 = vmatprep.subr.bf16.mxu0 %v4693_v50  ;;  %v4986_v50 = vld [vmem:[%s6475_s2 + $0x174] ss:$8 sps:$4 sm:$0xff]   ;;  %6577 = vst [vmem:[#allocation18_spill] sm:$0xff] %v4991_v49 }
 0x42f   :  { %6576 = vst [vmem:[#allocation17_spill] sm:$0xff] %v4986_v50 }
 0x431   :  { %826 = vmatpush1.bf16.msra.mxu0 %v4699_v51 }
 0x4d7   :  { %v520_v3 = vpop.f32.mrb[8].mxu0 }
 0x4d8   :  { %v522_v4 = vpop.f32.mrb[9].mxu0 }
 0x4d9   :  { %v524_v6 = vpop.f32.mrb[10].mxu0  ;;  %v523_v8 = vadd.f32 %v522_v4, %v4873_v5  ;;  %v521_v4 = vadd.f32 %v520_v3, %v4884_v29 }
 0x4da   :  { %v525_v7 = vpop.f32.mrb[11].mxu0 }
 0x4db   :  { %v528_v25 = vmul.f32 %v523_v8, %v4597_v17  ;;  %v3576_v8 = vmul.f32 -1.442695, %v521_v4 }
 0x4dd   :  { %v3577_v26 = vmul.f32 -1.442695, %v528_v25 }
 0x4df   :  { %4041 = vpow2.f32 %v3577_v26 }
 0x4e7   :  { %v769_v32 = vpop.f32.mrb[12].mxu0 }
 0x4e8   :  { %v776_v16 = vadd.f32 %v3615_v27, %v769_v32  ;;  %v771_v18 = vpop.f32.mrb[13].mxu0 }
 0x4e9   :  { %v777_v20 = vadd.f32 %v3616_v28, %v771_v18  ;;  %v773_v22 = vpop.f32.mrb[14].mxu0  ;;  %v4042_v25 = vpop.eup %4041 }
 0x4ea   :  { %v3618_v23 = vmul.f32 -1.442695, %v776_v16  ;;  %v774_v24 = vpop.f32.mrb[15].mxu0  ;;  %v536_v2 = vadd.f32 1.0, %v4042_v25  ;;  %v4915_v25 = vld [vmem:[%s6475_s2 + $0x110] ss:$8 sps:$4 sm:$0xff]  }
 0x4eb   :  { %v779_v6 = vmul.f32 %v777_v20, %v4597_v17 }
 0x4ec   :  { %4043 = vpow2.f32 %v3618_v23 }
 0x4ed   :  { %v3619_v7 = vmul.f32 -1.442695, %v779_v6  ;;  %v4897_v6 = vld [vmem:[%s6475_s2 + $0x104] ss:$8 sps:$4 sm:$0xff]  }
 0x4ee   :  { %6571 = vst [vmem:[#allocation12_spill] sm:$0xff] %v4897_v6  ;;  %657 = vmatprep.subr.bf16.mxu1 %v4897_v6  ;;  %959 = vmatprep.subr.bf16.mxu0 %v4897_v6 }
 0x4ef   :  { %4045 = vpow2.f32 %v3619_v7  ;;  %v4902_v7 = vld [vmem:[%s6475_s2 + $0x100] ss:$8 sps:$4 sm:$0xff]  }
 0x4f0   :  { %4047 = vpow2.f32 %v3576_v8  ;;  %v4907_v8 = vld [vmem:[%s6475_s2 + $0x114] ss:$8 sps:$4 sm:$0xff]   ;;  %658 = vmatpush1.bf16.msra.mxu1 %v4902_v7 }
 0x4f1   :  { %4049 = vrcp.f32 %v536_v2  ;;  %659 = vmatprep.subr.bf16.mxu1 %v4907_v8  ;;  %v4921_v2 = vld [vmem:[%s6475_s2 + $0x124] ss:$8 sps:$4 sm:$0xff]  }
 0x4f4   :  { %660 = vmatpush1.bf16.msra.mxu1 %v4915_v25 }
 0x4f5   :  { %661 = vmatprep.subr.bf16.mxu1 %v4921_v2 }
 0x4f6   :  { %v4044_v30 = vpop.eup %4043 }
 0x4f7   :  { %v786_v26 = vadd.f32 1.0, %v4044_v30 }
 0x4f9   :  { %v4046_v0 = vpop.eup %4045 }
 0x4fa   :  { %v787_v27 = vadd.f32 1.0, %v4046_v0  ;;  %v4048_v28 = vpop.eup %4047 }
 0x4fb   :  { %v535_v32 = vadd.f32 1.0, %v4048_v28  ;;  %v4050_v16 = vpop.eup %4049  ;;  %v4939_v28 = vld [vmem:[%s6475_s2 + $0x130] ss:$8 sps:$4 sm:$0xff]  }
 0x4fc   :  { %4051 = vrcp.f32 %v787_v27  ;;  %v542_v20 = vmul.f32 %v4050_v16, %v4597_v17  ;;  %v4927_v27 = vld [vmem:[%s6475_s2 + $0x120] ss:$8 sps:$4 sm:$0xff]  }
 0x4fd   :  { %4053 = vrcp.f32 %v786_v26  ;;  %v4933_v26 = vld [vmem:[%s6475_s2 + $0x134] ss:$8 sps:$4 sm:$0xff]   ;;  %662 = vmatpush1.bf16.msra.mxu1 %v4927_v27  ;;  %v4951_v16 = vld [vmem:[%s6475_s2 + $0x140] ss:$8 sps:$4 sm:$0xff]  }
 0x4fe   :  { %4055 = vrcp.f32 %v535_v32  ;;  %v544_v4 = vadd.f32 %v542_v20, %v4602_v31  ;;  %663 = vmatprep.subr.bf16.mxu1 %v4933_v26  ;;  %v4945_v32 = vld [vmem:[%s6475_s2 + $0x144] ss:$8 sps:$4 sm:$0xff]  }
 0x4ff   :  { %v4969_v20 = vld [vmem:[%s6475_s2 + $0x164] ss:$8 sps:$4 sm:$0xff]  }
 0x500   :  { %6573 = vst [vmem:[#allocation14_spill] sm:$0xff] %v4969_v20 }
 0x501   :  { %664 = vmatpush1.bf16.msra.mxu1 %v4939_v28 }
 0x502   :  { %665 = vmatprep.subr.bf16.mxu1 %v4945_v32 }
 0x505   :  { %666 = vmatpush1.bf16.msra.mxu1 %v4951_v16 }
 0x506   :  { %v4052_v3 = vpop.eup %4051 }
 0x507   :  { %v793_v18 = vmul.f32 %v4052_v3, %v4597_v17  ;;  %v4054_v23 = vpop.eup %4053  ;;  %v4957_v3 = vld [vmem:[%s6475_s2 + $0x154] ss:$8 sps:$4 sm:$0xff]  }
 0x508   :  { %v4056_v0 = vpop.eup %4055  ;;  %667 = vmatprep.subr.bf16.mxu1 %v4957_v3 }
 0x509   :  { %v795_v22 = vadd.f32 %v793_v18, %v4602_v31  ;;  %v546_v30 = vmul.f32 %v4056_v0, %v544_v4  ;;  %v4963_v18 = vld [vmem:[%s6475_s2 + $0x150] ss:$8 sps:$4 sm:$0xff]   ;;  %v545_v6 = vmul.f32 0.0, %v4056_v0 }
 0x50a   :  { %6572 = vst [vmem:[#allocation13_spill] sm:$0xff] %v4963_v18  ;;  %668 = vmatpush1.bf16.msra.mxu1 %v4963_v18 }
 0x50b   :  { %v797_v24 = vmul.f32 %v4054_v23, %v795_v22  ;;  %669 = vmatprep.subr.bf16.mxu1 %v4969_v20 }
 0x50d   :  { %799 = vrot.lane.b32.xlu1 %v797_v24, %s4482_s7  ;;  %v4975_v24 = vld [vmem:[%s6475_s2 + $0x160] ss:$8 sps:$4 sm:$0xff]  }
 0x50e   :  { %6574 = vst [vmem:[#allocation15_spill] sm:$0xff] %v4975_v24  ;;  %670 = vmatpush1.bf16.msra.mxu1 %v4975_v24 }
 0x50f   :  { %671 = vmatprep.subr.bf16.mxu1 %v4986_v50 }
 0x511   :  { %548 = vrot.lane.b32.xlu1 %v546_v30, %s4482_s7  ;;  %v796_v30 = vmul.f32 %v4054_v23, %v4703_v54 }
 0x512   :  { %672 = vmatpush1.bf16.msra.mxu1 %v4991_v49 }
 0x513   :  { %885 = vmatprep.subr.bf16.mxu1 %v4740_v33 }
 0x57f   :  { %v800_v5 = vpop.permute.xlu1 %799 }
 0x580   :  { %v4980_v29 = vadd.f32 %v800_v5, %v796_v30 }
 0x582   :  { %6575 = vst [vmem:[#allocation16_spill] sm:$0xff] %v4980_v29  ;;  %4057 = vtanh.f32 %v4980_v29 }
 0x583   :  { %v549_v51 = vpop.permute.xlu1 %548 }
 0x584   :  { %v4993_v48 = vadd.f32 %v549_v51, %v545_v6 }
 0x586   :  { %4059 = vtanh.f32 %v4993_v48 }
 0x58c   :  { %v4058_v54 = vpop.eup %4057 }
 0x58d   :  { %v4999_v5 = vmul.f32 %v4058_v54, %v795_v22  ;;  %v6578_v22 = vmov 0  }
 0x58f   :  { %806 = vrot.lane.b32.xlu0 %v4999_v5, %s4482_s7 }
 0x590   :  { %v4060_v23 = vpop.eup %4059 }
 0x591   :  { %v5003_v0 = vmul.f32 %v4060_v23, %v544_v4 }
 0x593   :  { %555 = vrot.lane.b32.xlu1 %v5003_v0, %s4482_s7 }
 0x601   :  { %v807_v51 = vpop.permute.xlu0 %806 }
 0x602   :  { %v809_v6 = vsel %vm139_vm1, %v807_v51, %v4837_v21 }
 0x603   :  { %v810_v30 = vpack.c.bf16 %v809_v6, %v809_v6 }
 0x605   :  { %844 = vmatmul.mubr.bf16.vlgmr.msra.gmra.mrb[16].mxu0 %v810_v30  ;;  %v556_v29 = vpop.permute.xlu1 %555 }
 0x606   :  { %v3611_v33 = vpack.c.bf16 %v556_v29, %v556_v29  ;;  %960 = vmatpush1.bf16.msra.mxu0 %v4902_v7  ;;  %991 = vmatprep.mubr.bf16.mxu0 %v6578_v22 }
 0x607   :  { %961 = vmatprep.subr.bf16.mxu0 %v4907_v8 }
 0x608   :  { %3612 = vmatmul.mubr.msk.bf16.vlgmr.msra.gmra.mrb[0].mxu1 %vm4710_vm2, %v3611_v33 }
 0x609   :  { %886 = vmatpush1.bf16.msra.mxu1 %v4745_v34  ;;  %917 = vmatprep.mubr.bf16.mxu1 %v6578_v22 }
 0x60a   :  { %887 = vmatprep.subr.bf16.mxu1 %v4750_v35  ;;  %962 = vmatpush1.bf16.msra.mxu0 %v4915_v25 }
 0x60b   :  { %963 = vmatprep.subr.bf16.mxu0 %v4921_v2 }
 0x60d   :  { %888 = vmatpush1.bf16.msra.mxu1 %v4757_v52 }
 0x60e   :  { %889 = vmatprep.subr.bf16.mxu1 %v4763_v53  ;;  %964 = vmatpush1.bf16.msra.mxu0 %v4927_v27 }
 0x60f   :  { %965 = vmatprep.subr.bf16.mxu0 %v4933_v26 }
 0x611   :  { %890 = vmatpush1.bf16.msra.mxu1 %v4769_v55 }
 0x612   :  { %891 = vmatprep.subr.bf16.mxu1 %v4775_v56  ;;  %966 = vmatpush1.bf16.msra.mxu0 %v4939_v28 }
 0x613   :  { %967 = vmatprep.subr.bf16.mxu0 %v4945_v32 }
 0x615   :  { %892 = vmatpush1.bf16.msra.mxu1 %v4781_v57 }
 0x616   :  { %893 = vmatprep.subr.bf16.mxu1 %v4787_v58  ;;  %968 = vmatpush1.bf16.msra.mxu0 %v4951_v16 }
 0x617   :  { %969 = vmatprep.subr.bf16.mxu0 %v4957_v3 }
 0x619   :  { %894 = vmatpush1.bf16.msra.mxu1 %v4793_v60 }
 0x61a   :  { %895 = vmatprep.subr.bf16.mxu1 %v4799_v61  ;;  %970 = vmatpush1.bf16.msra.mxu0 %v4963_v18 }
 0x61b   :  { %971 = vmatprep.subr.bf16.mxu0 %v4969_v20 }
 0x61d   :  { %896 = vmatpush1.bf16.msra.mxu1 %v4805_v63 }
 0x61e   :  { %897 = vmatprep.subr.bf16.mxu1 %v4811_v13  ;;  %972 = vmatpush1.bf16.msra.mxu0 %v4975_v24 }
 0x61f   :  { %973 = vmatprep.subr.bf16.mxu0 %v4986_v50 }
 0x621   :  { %898 = vmatpush1.bf16.msra.mxu1 %v4817_v14 }
 0x622   :  { %899 = vmatprep.subr.bf16.mxu1 %v4823_v15  ;;  %974 = vmatpush1.bf16.msra.mxu0 %v4991_v49 }
 0x623   :  { %1037 = vmatprep.subr.bf16.mxu0 %v4542_v1 }
 0x625   :  { %900 = vmatpush1.bf16.msra.mxu1 %v4829_v9 }
 0x626   :  { %1113 = vmatprep.subr.bf16.mxu1 %v4610_v36 }
 0x6d8   :  { %v845_v59 = vpop.f32.mrb[16].mxu0 }
 0x6d9   :  { %v846_v33 = vadd.f32 %v845_v59, %v4726_v11  ;;  %v847_v21 = vpop.f32.mrb[17].mxu0 }
 0x6da   :  { %v848_v29 = vadd.f32 %v847_v21, %v4729_v12  ;;  %v849_v4 = vpop.f32.mrb[18].mxu0 }
 0x6db   :  { %v3620_v54 = vmul.f32 -1.442695, %v846_v33  ;;  %v691_v23 = vpop.f32.mrb[0].mxu1  ;;  %v850_v51 = vpop.f32.mrb[19].mxu0 }
 0x6dc   :  { %v853_v6 = vmul.f32 %v848_v29, %v4597_v17  ;;  %v693_v30 = vpop.f32.mrb[1].mxu1 }
 0x6dd   :  { %v695_v49 = vpop.f32.mrb[2].mxu1  ;;  %4061 = vpow2.f32 %v3620_v54 }
 0x6de   :  { %v3621_v50 = vmul.f32 -1.442695, %v853_v6  ;;  %v696_v1 = vpop.f32.mrb[3].mxu1  ;;  %v3509_v49 = vld [vmem:[%s6476_s3 + $0x4] sm:$0x3] }
 0x6df   :  { %v5060_v29 = vrot.slane %v3509_v49, %v4718_v62 }
 0x6e0   :  { %4063 = vpow2.f32 %v3621_v50  ;;  %v5055_v50 = vrot.slane %v3509_v49, %v4723_v10 }
 0x6e1   :  { %v692_v54 = vadd.f32 %v691_v23, %v5060_v29 }
 0x6e2   :  { %6579 = vst [vmem:[#allocation19_spill] sm:$0xff] %v5055_v50 }
 0x6e3   :  { %v3613_v6 = vmul.f32 -1.442695, %v692_v54 }
 0x6e7   :  { %v4062_v24 = vpop.eup %4061 }
 0x6e8   :  { %v860_v18 = vadd.f32 1.0, %v4062_v24  ;;  %v694_v24 = vadd.f32 %v693_v30, %v5055_v50 }
 0x6ea   :  { %v4064_v36 = vpop.eup %4063 }
 0x6eb   :  { %v861_v20 = vadd.f32 1.0, %v4064_v36 }
 0x6ed   :  { %4065 = vrcp.f32 %v861_v20 }
 0x6ee   :  { %4067 = vrcp.f32 %v860_v18  ;;  %v699_v18 = vmul.f32 %v694_v24, %v4597_v17 }
 0x6f0   :  { %v3614_v20 = vmul.f32 -1.442695, %v699_v18 }
 0x6f2   :  { %4069 = vpow2.f32 %v3614_v20  ;;  %v1030_v20 = vpack.c.bf16 %v4999_v5, %v4999_v5 }
 0x6f3   :  { %4071 = vpow2.f32 %v3613_v6 }
 0x6f7   :  { %v4066_v59 = vpop.eup %4065 }
 0x6f8   :  { %v867_v21 = vmul.f32 %v4066_v59, %v4597_v17  ;;  %v4068_v4 = vpop.eup %4067 }
 0x6f9   :  { %v870_v59 = vmul.f32 %v4068_v4, %v4834_v19 }
 0x6fa   :  { %v869_v33 = vadd.f32 %v867_v21, %v4602_v31 }
 0x6fc   :  { %v871_v51 = vmul.f32 %v4068_v4, %v869_v33  ;;  %v4070_v1 = vpop.eup %4069 }
 0x6fd   :  { %v707_v36 = vadd.f32 1.0, %v4070_v1  ;;  %v4072_v10 = vpop.eup %4071 }
 0x6fe   :  { %873 = vrot.lane.b32.xlu0 %v871_v51, %s4482_s7  ;;  %v706_v30 = vadd.f32 1.0, %v4072_v10 }
 0x6ff   :  { %4073 = vrcp.f32 %v707_v36 }
 0x709   :  { %v4074_v24 = vpop.eup %4073 }
 0x70a   :  { %v713_v62 = vmul.f32 %v4074_v24, %v4597_v17 }
 0x70c   :  { %v5071_v18 = vadd.f32 %v713_v62, %v4602_v31 }
 0x770   :  { %v874_v21 = vpop.permute.xlu0 %873 }
 0x771   :  { %v5064_v51 = vadd.f32 %v874_v21, %v870_v59 }
 0x773   :  { %4075 = vtanh.f32 %v5064_v51 }
 0x774   :  { %4077 = vrcp.f32 %v706_v30 }
 0x77d   :  { %v4076_v49 = vpop.eup %4075 }
 0x77e   :  { %v5068_v23 = vmul.f32 %v4076_v49, %v869_v33  ;;  %v4078_v19 = vpop.eup %4077 }
 0x77f   :  { %v717_v4 = vmul.f32 %v4078_v19, %v5071_v18 }
 0x780   :  { %880 = vrot.lane.b32.xlu0 %v5068_v23, %s4482_s7 }
 0x784   :  { %719 = vrot.lane.b32.xlu0 %v717_v4, %s4482_s7 }
 0x788   :  { %1032 = vrot.lane.b32.xlu0 %v1030_v20, %s4482_s7 }
 0x7f2   :  { %v881_v54 = vpop.permute.xlu0 %880 }
 0x7f3   :  { %v883_v33 = vsel %vm139_vm1, %v881_v54, %v5003_v0  ;;  %v6586_v0 = vld [vmem:[#allocation10_spill] sm:$0xff] }
 0x7f4   :  { %v884_v6 = vpack.c.bf16 %v883_v33, %v883_v33 }
 0x7f6   :  { %918 = vmatmul.mubr.bf16.vlgmr.msra.gmra.mrb[4].mxu1 %v884_v6 }
 0x7f7   :  { %1114 = vmatpush1.bf16.msra.mxu1 %v4615_v37  ;;  %1145 = vmatprep.mubr.bf16.mxu1 %v6578_v22  ;;  %v6580_v37 = vld [vmem:[#allocation5_spill] sm:$0xff] }
 0x7f8   :  { %1115 = vmatprep.subr.bf16.mxu1 %v4620_v38  ;;  %v6581_v38 = vld [vmem:[#allocation6_spill] sm:$0xff] }
 0x7fb   :  { %1116 = vmatpush1.bf16.msra.mxu1 %v4627_v39  ;;  %v6582_v39 = vld [vmem:[#allocation7_spill] sm:$0xff] }
 0x7fc   :  { %1117 = vmatprep.subr.bf16.mxu1 %v4633_v40  ;;  %v6583_v40 = vld [vmem:[#allocation8_spill] sm:$0xff] }
 0x7ff   :  { %1118 = vmatpush1.bf16.msra.mxu1 %v4639_v41  ;;  %v6584_v41 = vld [vmem:[#allocation12_spill] sm:$0xff] }
 0x800   :  { %1119 = vmatprep.subr.bf16.mxu1 %v4645_v42 }
 0x803   :  { %1120 = vmatpush1.bf16.msra.mxu1 %v4651_v43  ;;  %v6585_v43 = vld [vmem:[#allocation11_spill] sm:$0xff] }
 0x804   :  { %1121 = vmatprep.subr.bf16.mxu1 %v4657_v44 }
 0x807   :  { %1122 = vmatpush1.bf16.msra.mxu1 %v4663_v45 }
 0x808   :  { %1123 = vmatprep.subr.bf16.mxu1 %v4669_v46 }
 0x80b   :  { %1124 = vmatpush1.bf16.msra.mxu1 %v4675_v47 }
 0x80c   :  { %1125 = vmatprep.subr.bf16.mxu1 %v6580_v37 }
 0x80f   :  { %1126 = vmatpush1.bf16.msra.mxu1 %v6581_v38 }
 0x810   :  { %1127 = vmatprep.subr.bf16.mxu1 %v6582_v39 }
 0x813   :  { %1128 = vmatpush1.bf16.msra.mxu1 %v6583_v40  ;;  %v720_v40 = vpop.permute.xlu0 %719 }
 0x814   :  { %1261 = vmatprep.subr.bf16.mxu1 %v6584_v41 }
 0x8c9   :  { %v919_v42 = vpop.f32.mrb[4].mxu1 }
 0x8ca   :  { %v920_v5 = vadd.f32 %v919_v42, %v6585_v43  ;;  %v921_v44 = vpop.f32.mrb[5].mxu1  ;;  %v716_v42 = vmul.f32 0.0, %v4078_v19  ;;  %v5128_v19 = vld [vmem:[%s6474_s1 + $0x14] ss:$8 sps:$4 sm:$0xff]  }
 0x8cb   :  { %v922_v45 = vadd.f32 %v921_v44, %v6586_v0  ;;  %v923_v1 = vpop.f32.mrb[6].mxu1 }
 0x8cc   :  { %v3622_v46 = vmul.f32 -1.442695, %v920_v5  ;;  %v924_v36 = vpop.f32.mrb[7].mxu1  ;;  %v5113_v5 = vadd.f32 %v720_v40, %v716_v42 }
 0x8cd   :  { %v927_v47 = vmul.f32 %v922_v45, %v4597_v17  ;;  %v5121_v36 = vld [vmem:[%s6474_s1] ss:$8 sps:$4 sm:$0xff]  }
 0x8ce   :  { %4079 = vpow2.f32 %v3622_v46 }
 0x8cf   :  { %v3623_v59 = vmul.f32 -1.442695, %v927_v47  ;;  %v5140_v47 = vld [vmem:[%s6474_s1 + $0x24] ss:$8 sps:$4 sm:$0xff]  }
 0x8d1   :  { %4081 = vpow2.f32 %v3623_v59  ;;  %v5146_v59 = vld [vmem:[%s6474_s1 + $0x20] ss:$8 sps:$4 sm:$0xff]  }
 0x8d8   :  { %v4080_v10 = vpop.eup %4079 }
 0x8d9   :  { %v934_v24 = vadd.f32 1.0, %v4080_v10  ;;  %v5152_v10 = vld [vmem:[%s6474_s1 + $0x34] ss:$8 sps:$4 sm:$0xff]  }
 0x8db   :  { %v4082_v21 = vpop.eup %4081 }
 0x8dc   :  { %v935_v30 = vadd.f32 1.0, %v4082_v21  ;;  %v5158_v21 = vld [vmem:[%s6474_s1 + $0x30] ss:$8 sps:$4 sm:$0xff]  }
 0x8de   :  { %4083 = vrcp.f32 %v935_v30  ;;  %v6587_v30 = vld [vmem:[#allocation9_spill] sm:$0xff] }
 0x8df   :  { %4085 = vrcp.f32 %v934_v24  ;;  %v1033_v24 = vpop.permute.xlu0 %1032 }
 0x8e8   :  { %v4084_v62 = vpop.eup %4083 }
 0x8e9   :  { %v941_v49 = vmul.f32 %v4084_v62, %v4597_v17  ;;  %v4086_v20 = vpop.eup %4085 }
 0x8ea   :  { %v944_v33 = vmul.f32 %v4086_v20, %v4993_v48 }
 0x8eb   :  { %v943_v4 = vadd.f32 %v941_v49, %v4602_v31 }
 0x8ed   :  { %v945_v54 = vmul.f32 %v4086_v20, %v943_v4 }
 0x8ef   :  { %947 = vrot.lane.b32.xlu1 %v945_v54, %s4482_s7 }
 0x961   :  { %v948_v6 = vpop.permute.xlu1 %947 }
 0x962   :  { %v5106_v37 = vadd.f32 %v948_v6, %v944_v33 }
 0x964   :  { %4087 = vtanh.f32 %v5106_v37 }
 0x965   :  { %4089 = vtanh.f32 %v5113_v5 }
 0x96e   :  { %v4088_v38 = vpop.eup %4087 }
 0x96f   :  { %v5109_v39 = vmul.f32 %v4088_v38, %v943_v4  ;;  %v4090_v44 = vpop.eup %4089 }
 0x970   :  { %v724_v48 = vmul.f32 %v4090_v44, %v5071_v18  ;;  %v5134_v18 = vld [vmem:[%s6474_s1 + $0x10] ss:$8 sps:$4 sm:$0xff]   ;;  %v6588_v44 = vld [vmem:[#allocation16_spill] sm:$0xff] }
 0x971   :  { %954 = vrot.lane.b32.xlu1 %v5109_v39, %s4482_s7 }
 0x9e3   :  { %v955_v45 = vpop.permute.xlu1 %954 }
 0x9e4   :  { %v957_v1 = vsel %vm139_vm1, %v955_v45, %v724_v48 }
 0x9e5   :  { %v958_v46 = vpack.c.bf16 %v957_v1, %v957_v1 }
 0x9e7   :  { %992 = vmatmul.mubr.bf16.vlgmr.msra.gmra.mrb[20].mxu0 %v958_v46 }
 0x9e8   :  { %1038 = vmatpush1.bf16.msra.mxu0 %v5121_v36  ;;  %1069 = vmatprep.mubr.bf16.mxu0 %v6578_v22 }
 0x9e9   :  { %1039 = vmatprep.subr.bf16.mxu0 %v5128_v19 }
 0x9ec   :  { %1040 = vmatpush1.bf16.msra.mxu0 %v5134_v18 }
 0x9ed   :  { %1041 = vmatprep.subr.bf16.mxu0 %v5140_v47 }
 0x9f0   :  { %1042 = vmatpush1.bf16.msra.mxu0 %v5146_v59 }
 0x9f1   :  { %1043 = vmatprep.subr.bf16.mxu0 %v5152_v10 }
 0x9f4   :  { %1044 = vmatpush1.bf16.msra.mxu0 %v5158_v21 }
 0x9f5   :  { %1187 = vmatprep.subr.bf16.mxu0 %v6587_v30 }
 0x9f7   :  { %3628 = vmatmul.mubr.msk.bf16.vlgmr.msra.gmra.mrb[24].mxu0 %vm139_vm1, %v1033_v24 }
 0x9f8   :  { %1188 = vmatpush1.bf16.msra.mxu0 %v4745_v34  ;;  %1219 = vmatprep.mubr.bf16.mxu0 %v6578_v22  ;;  %v5182_v34 = vld [vmem:[%s6474_s1 + $0x4] ss:$8 sps:$4 sm:$0xff]  }
 0x9f9   :  { %1189 = vmatprep.subr.bf16.mxu0 %v4750_v35 }
 0x9fc   :  { %1190 = vmatpush1.bf16.msra.mxu0 %v4757_v52 }
 0x9fd   :  { %1191 = vmatprep.subr.bf16.mxu0 %v4763_v53 }
 0xa00   :  { %1192 = vmatpush1.bf16.msra.mxu0 %v4769_v55 }
 0xa01   :  { %1193 = vmatprep.subr.bf16.mxu0 %v4775_v56  ;;  %v3626_v56 = vld [vmem:[%s6473_s0 + $0x20] sm:$0xff] }
 0xa04   :  { %1194 = vmatpush1.bf16.msra.mxu0 %v4781_v57  ;;  %v3627_v57 = vld [vmem:[%s6473_s0 + $0x28] sm:$0xff] }
 0xa05   :  { %1195 = vmatprep.subr.bf16.mxu0 %v4787_v58 }
 0xa08   :  { %1196 = vmatpush1.bf16.msra.mxu0 %v4793_v60 }
 0xa09   :  { %1197 = vmatprep.subr.bf16.mxu0 %v4799_v61 }
 0xa0c   :  { %1198 = vmatpush1.bf16.msra.mxu0 %v4805_v63 }
 0xa0d   :  { %1199 = vmatprep.subr.bf16.mxu0 %v4811_v13 }
 0xa10   :  { %1200 = vmatpush1.bf16.msra.mxu0 %v4817_v14 }
 0xa11   :  { %1201 = vmatprep.subr.bf16.mxu0 %v4823_v15 }
 0xa14   :  { %1202 = vmatpush1.bf16.msra.mxu0 %v4829_v9 }
 0xa15   :  { %1339 = vmatprep.subr.bf16.mxu0 %v5182_v34 }
 0xaba   :  { %v5185_v35 = vpop.f32.mrb[20].mxu0 }
 0xabb   :  { %v5187_v52 = vpop.f32.mrb[21].mxu0 }
 0xabc   :  { %v997_v53 = vpop.f32.mrb[22].mxu0 }
 0xabd   :  { %v998_v55 = vpop.f32.mrb[23].mxu0 }
 0xaca   :  { %v1071_v58 = vpop.f32.mrb[24].mxu0 }
 0xacb   :  { %v1078_v60 = vadd.f32 %v3626_v56, %v1071_v58  ;;  %v1073_v61 = vpop.f32.mrb[25].mxu0  ;;  %v6591_v58 = vld [vmem:[#allocation15_spill] sm:$0xff] }
 0xacc   :  { %v1079_v63 = vadd.f32 %v3627_v57, %v1073_v61  ;;  %v1075_v13 = vpop.f32.mrb[26].mxu0  ;;  %v6590_v57 = vld [vmem:[#allocation14_spill] sm:$0xff] }
 0xacd   :  { %v3629_v14 = vmul.f32 -1.442695, %v1078_v60  ;;  %v1076_v15 = vpop.f32.mrb[27].mxu0  ;;  %v6592_v60 = vld [vmem:[#allocation17_spill] sm:$0xff]  ;;  %v6593_v61 = vld [vmem:[#allocation18_spill] sm:$0xff] }
 0xace   :  { %v1081_v9 = vmul.f32 %v1079_v63, %v4597_v17 }
 0xacf   :  { %4091 = vpow2.f32 %v3629_v14 }
 0xad0   :  { %v3630_v62 = vmul.f32 -1.442695, %v1081_v9 }
 0xad2   :  { %4093 = vpow2.f32 %v3630_v62 }
 0xad9   :  { %v4092_v49 = vpop.eup %4091 }
 0xada   :  { %v1088_v54 = vadd.f32 1.0, %v4092_v49 }
 0xadc   :  { %v4094_v4 = vpop.eup %4093 }
 0xadd   :  { %v1089_v20 = vadd.f32 1.0, %v4094_v4 }
 0xadf   :  { %4095 = vrcp.f32 %v1089_v20 }
 0xae0   :  { %4097 = vrcp.f32 %v1088_v54 }
 0xae9   :  { %v4096_v33 = vpop.eup %4095 }
 0xaea   :  { %v1095_v6 = vmul.f32 %v4096_v33, %v4597_v17  ;;  %v4098_v40 = vpop.eup %4097 }
 0xaeb   :  { %v1098_v48 = vmul.f32 %v4098_v40, %v6588_v44 }
 0xaec   :  { %v1097_v38 = vadd.f32 %v1095_v6, %v4602_v31 }
 0xaee   :  { %v1099_v42 = vmul.f32 %v4098_v40, %v1097_v38 }
 0xaf0   :  { %1101 = vrot.lane.b32.xlu1 %v1099_v42, %s4482_s7 }
 0xb62   :  { %v1102_v45 = vpop.permute.xlu1 %1101 }
 0xb63   :  { %v5200_v1 = vadd.f32 %v1102_v45, %v1098_v48 }
 0xb65   :  { %4099 = vtanh.f32 %v5200_v1 }
 0xb6f   :  { %v4100_v46 = vpop.eup %4099 }
 0xb70   :  { %v1106_v24 = vmul.f32 %v4100_v46, %v1097_v38 }
 0xb72   :  { %1108 = vrot.lane.b32.xlu0 %v1106_v24, %s4482_s7  ;;  %v1332_v45 = vpack.c.bf16 %v1106_v24, %v1106_v24 }
 0xbe4   :  { %v1109_v53 = vpop.permute.xlu0 %1108 }
 0xbe5   :  { %v1111_v55 = vsel %vm139_vm1, %v1109_v53, %v5068_v23  ;;  %v6589_v23 = vld [vmem:[#allocation13_spill] sm:$0xff] }
 0xbe6   :  { %v1112_v56 = vpack.c.bf16 %v1111_v55, %v1111_v55 }
 0xbe8   :  { %1146 = vmatmul.mubr.bf16.vlgmr.msra.gmra.mrb[8].mxu1 %v1112_v56 }
 0xbe9   :  { %1262 = vmatpush1.bf16.msra.mxu1 %v4902_v7  ;;  %1293 = vmatprep.mubr.bf16.mxu1 %v6578_v22 }
 0xbea   :  { %1263 = vmatprep.subr.bf16.mxu1 %v4907_v8 }
 0xbed   :  { %1264 = vmatpush1.bf16.msra.mxu1 %v4915_v25 }
 0xbee   :  { %1265 = vmatprep.subr.bf16.mxu1 %v4921_v2 }
 0xbf1   :  { %1266 = vmatpush1.bf16.msra.mxu1 %v4927_v27 }
 0xbf2   :  { %1267 = vmatprep.subr.bf16.mxu1 %v4933_v26 }
 0xbf5   :  { %1268 = vmatpush1.bf16.msra.mxu1 %v4939_v28 }
 0xbf6   :  { %1269 = vmatprep.subr.bf16.mxu1 %v4945_v32 }
 0xbf9   :  { %1270 = vmatpush1.bf16.msra.mxu1 %v4951_v16 }
 0xbfa   :  { %1271 = vmatprep.subr.bf16.mxu1 %v4957_v3 }
 0xbfd   :  { %1272 = vmatpush1.bf16.msra.mxu1 %v6589_v23 }
 0xbfe   :  { %1273 = vmatprep.subr.bf16.mxu1 %v6590_v57 }
 0xc01   :  { %1274 = vmatpush1.bf16.msra.mxu1 %v6591_v58 }
 0xc02   :  { %1275 = vmatprep.subr.bf16.mxu1 %v6592_v60 }
 0xc05   :  { %1276 = vmatpush1.bf16.msra.mxu1 %v6593_v61 }
 0xc06   :  { %1489 = vmatprep.subr.bf16.mxu1 %v6587_v30 }
 0xcbb   :  { %v1147_v63 = vpop.f32.mrb[8].mxu1 }
 0xcbc   :  { %v1148_v13 = vadd.f32 %v1147_v63, %v4726_v11  ;;  %v1149_v14 = vpop.f32.mrb[9].mxu1 }
 0xcbd   :  { %v1150_v15 = vadd.f32 %v1149_v14, %v4729_v12  ;;  %v1151_v9 = vpop.f32.mrb[10].mxu1 }
 0xcbe   :  { %v3631_v62 = vmul.f32 -1.442695, %v1148_v13  ;;  %v1152_v49 = vpop.f32.mrb[11].mxu1  ;;  %v5265_v9 = vld [vmem:[%s6475_s2 + $0x14] ss:$8 sps:$4 sm:$0xff]  }
 0xcbf   :  { %v1155_v4 = vmul.f32 %v1150_v15, %v4597_v17  ;;  %v5258_v15 = vld [vmem:[%s6475_s2] ss:$8 sps:$4 sm:$0xff]   ;;  %v5277_v49 = vld [vmem:[%s6475_s2 + $0x24] ss:$8 sps:$4 sm:$0xff]  }
 0xcc0   :  { %4101 = vpow2.f32 %v3631_v62  ;;  %v5271_v62 = vld [vmem:[%s6475_s2 + $0x10] ss:$8 sps:$4 sm:$0xff]  }
 0xcc1   :  { %v3632_v20 = vmul.f32 -1.442695, %v1155_v4  ;;  %v5283_v4 = vld [vmem:[%s6475_s2 + $0x20] ss:$8 sps:$4 sm:$0xff]  }
 0xcc3   :  { %4103 = vpow2.f32 %v3632_v20  ;;  %v5289_v20 = vld [vmem:[%s6475_s2 + $0x34] ss:$8 sps:$4 sm:$0xff]  }
 0xcca   :  { %v4102_v54 = vpop.eup %4101 }
 0xccb   :  { %v1162_v38 = vadd.f32 1.0, %v4102_v54  ;;  %v5295_v54 = vld [vmem:[%s6475_s2 + $0x30] ss:$8 sps:$4 sm:$0xff]  }
 0xccd   :  { %v4104_v33 = vpop.eup %4103 }
 0xcce   :  { %v1163_v6 = vadd.f32 1.0, %v4104_v33  ;;  %v5301_v33 = vld [vmem:[%s6475_s2 + $0x44] ss:$8 sps:$4 sm:$0xff]  }
 0xccf   :  { %6594 = vst [vmem:[#allocation5_spill] sm:$0xff] %v5301_v33 }
 0xcd0   :  { %4105 = vrcp.f32 %v1163_v6  ;;  %v5307_v6 = vld [vmem:[%s6475_s2 + $0x40] ss:$8 sps:$4 sm:$0xff]  }
 0xcd1   :  { %4107 = vrcp.f32 %v1162_v38  ;;  %6595 = vst [vmem:[#allocation6_spill] sm:$0xff] %v5307_v6  ;;  %v5313_v38 = vld [vmem:[%s6475_s2 + $0x54] ss:$8 sps:$4 sm:$0xff]  }
 0xcd2   :  { %6596 = vst [vmem:[#allocation7_spill] sm:$0xff] %v5313_v38 }
 0xcda   :  { %v4106_v30 = vpop.eup %4105 }
 0xcdb   :  { %v1169_v40 = vmul.f32 %v4106_v30, %v4597_v17  ;;  %v4108_v44 = vpop.eup %4107  ;;  %v5319_v30 = vld [vmem:[%s6475_s2 + $0x50] ss:$8 sps:$4 sm:$0xff]  }
 0xcdc   :  { %v1172_v46 = vmul.f32 %v4108_v44, %v5064_v51  ;;  %v5251_v51 = vld [vmem:[%s6475_s2 + $0x4] ss:$8 sps:$4 sm:$0xff]   ;;  %6597 = vst [vmem:[#allocation8_spill] sm:$0xff] %v5319_v30 }
 0xcdd   :  { %v1171_v42 = vadd.f32 %v1169_v40, %v4602_v31  ;;  %v5325_v40 = vld [vmem:[%s6475_s2 + $0x64] ss:$8 sps:$4 sm:$0xff]  }
 0xcde   :  { %6598 = vst [vmem:[#allocation12_spill] sm:$0xff] %v5325_v40 }
 0xcdf   :  { %v1173_v48 = vmul.f32 %v4108_v44, %v1171_v42  ;;  %v5337_v44 = vld [vmem:[%s6475_s2 + $0x74] ss:$8 sps:$4 sm:$0xff]  }
 0xce0   :  { %6600 = vst [vmem:[#allocation9_spill] sm:$0xff] %v5337_v44 }
 0xce1   :  { %1175 = vrot.lane.b32.xlu1 %v1173_v48, %s4482_s7  ;;  %v5343_v48 = vld [vmem:[%s6475_s2 + $0x70] ss:$8 sps:$4 sm:$0xff]  }
 0xce2   :  { %6601 = vst [vmem:[#allocation16_spill] sm:$0xff] %v5343_v48 }
 0xce5   :  { %1334 = vrot.lane.b32.xlu1 %v1332_v45, %s4482_s7 }
 0xd53   :  { %v1176_v53 = vpop.permute.xlu1 %1175 }
 0xd54   :  { %v5231_v55 = vadd.f32 %v1176_v53, %v1172_v46 }
 0xd56   :  { %4109 = vtanh.f32 %v5231_v55 }
 0xd60   :  { %v4110_v56 = vpop.eup %4109 }
 0xd61   :  { %v5234_v63 = vmul.f32 %v4110_v56, %v1171_v42  ;;  %v5331_v42 = vld [vmem:[%s6475_s2 + $0x60] ss:$8 sps:$4 sm:$0xff]  }
 0xd62   :  { %6599 = vst [vmem:[#allocation11_spill] sm:$0xff] %v5331_v42 }
 0xd63   :  { %1182 = vrot.lane.b32.xlu0 %v5234_v63, %s4482_s7 }
 0xdd5   :  { %v1183_v13 = vpop.permute.xlu0 %1182 }
 0xdd6   :  { %v1185_v14 = vsel %vm139_vm1, %v1183_v13, %v5109_v39  ;;  %v1335_v39 = vpop.permute.xlu1 %1334 }
 0xdd7   :  { %v1186_v24 = vpack.c.bf16 %v1185_v14, %v1185_v14  ;;  %v996_v14 = vadd.f32 %v5187_v52, %v5055_v50 }
 0xdd9   :  { %1220 = vmatmul.mubr.bf16.vlgmr.msra.gmra.mrb[28].mxu0 %v1186_v24 }
 0xdda   :  { %1340 = vmatpush1.bf16.msra.mxu0 %v5121_v36  ;;  %1371 = vmatprep.mubr.bf16.mxu0 %v6578_v22 }
 0xddb   :  { %1341 = vmatprep.subr.bf16.mxu0 %v5128_v19 }
 0xdde   :  { %1342 = vmatpush1.bf16.msra.mxu0 %v5134_v18 }
 0xddf   :  { %1343 = vmatprep.subr.bf16.mxu0 %v5140_v47 }
 0xde2   :  { %1344 = vmatpush1.bf16.msra.mxu0 %v5146_v59 }
 0xde3   :  { %1345 = vmatprep.subr.bf16.mxu0 %v5152_v10 }
 0xde6   :  { %1346 = vmatpush1.bf16.msra.mxu0 %v5158_v21 }
 0xde7   :  { %1415 = vmatprep.subr.bf16.mxu0 %v5251_v51 }
 0xde9   :  { %3639 = vmatmul.mubr.msk.bf16.vlgmr.msra.gmra.mrb[32].mxu0 %vm139_vm1, %v1335_v39  ;;  %v1001_v39 = vmul.f32 %v996_v14, %v4597_v17 }
 0xdea   :  { %1416 = vmatpush1.bf16.msra.mxu0 %v5258_v15  ;;  %1447 = vmatprep.mubr.bf16.mxu0 %v6578_v22 }
 0xdeb   :  { %1417 = vmatprep.subr.bf16.mxu0 %v5265_v9 }
 0xdee   :  { %1418 = vmatpush1.bf16.msra.mxu0 %v5271_v62 }
 0xdef   :  { %1419 = vmatprep.subr.bf16.mxu0 %v5277_v49 }
 0xdf2   :  { %1420 = vmatpush1.bf16.msra.mxu0 %v5283_v4 }
 0xdf3   :  { %1421 = vmatprep.subr.bf16.mxu0 %v5289_v20 }
 0xdf6   :  { %1422 = vmatpush1.bf16.msra.mxu0 %v5295_v54 }
 0xdf7   :  { %1423 = vmatprep.subr.bf16.mxu0 %v5301_v33 }
 0xdfa   :  { %1424 = vmatpush1.bf16.msra.mxu0 %v5307_v6 }
 0xdfb   :  { %1425 = vmatprep.subr.bf16.mxu0 %v5313_v38 }
 0xdfe   :  { %1426 = vmatpush1.bf16.msra.mxu0 %v5319_v30  ;;  %v994_v30 = vadd.f32 %v5185_v35, %v5060_v29 }
 0xdff   :  { %1427 = vmatprep.subr.bf16.mxu0 %v5325_v40 }
 0xe02   :  { %1428 = vmatpush1.bf16.msra.mxu0 %v5331_v42 }
 0xe03   :  { %1429 = vmatprep.subr.bf16.mxu0 %v5337_v44 }
 0xe06   :  { %1430 = vmatpush1.bf16.msra.mxu0 %v5343_v48  ;;  %v3637_v48 = vld [vmem:[%s6473_s0 + $0x30] sm:$0xff] }
 0xe07   :  { %1563 = vmatprep.subr.bf16.mxu0 %v6584_v41  ;;  %v3638_v41 = vld [vmem:[%s6473_s0 + $0x38] sm:$0xff] }
 0xeac   :  { %v1221_v45 = vpop.f32.mrb[28].mxu0 }
 0xead   :  { %v1223_v46 = vpop.f32.mrb[29].mxu0  ;;  %v1222_v14 = vadd.f32 %v1221_v45, %v6585_v43 }
 0xeae   :  { %v1225_v53 = vpop.f32.mrb[30].mxu0  ;;  %v1224_v13 = vadd.f32 %v1223_v46, %v6586_v0  ;;  %v3625_v46 = vmul.f32 -1.442695, %v1001_v39 }
 0xeaf   :  { %v1226_v56 = vpop.f32.mrb[31].mxu0  ;;  %v3633_v38 = vmul.f32 -1.442695, %v1222_v14 }
 0xeb0   :  { %v1229_v24 = vmul.f32 %v1224_v13, %v4597_v17 }
 0xeb2   :  { %v3634_v44 = vmul.f32 -1.442695, %v1229_v24 }
 0xeb4   :  { %4111 = vpow2.f32 %v3634_v44 }
 0xeb5   :  { %4113 = vpow2.f32 %v3625_v46 }
 0xebc   :  { %v1373_v53 = vpop.f32.mrb[32].mxu0 }
 0xebd   :  { %v1380_v56 = vadd.f32 %v3637_v48, %v1373_v53  ;;  %v1375_v42 = vpop.f32.mrb[33].mxu0  ;;  %v3624_v53 = vmul.f32 -1.442695, %v994_v30 }
 0xebe   :  { %v1381_v0 = vadd.f32 %v3638_v41, %v1375_v42  ;;  %v1377_v52 = vpop.f32.mrb[34].mxu0  ;;  %v4112_v48 = vpop.eup %4111 }
 0xebf   :  { %v3640_v50 = vmul.f32 -1.442695, %v1380_v56  ;;  %v1378_v13 = vpop.f32.mrb[35].mxu0  ;;  %v1237_v44 = vadd.f32 1.0, %v4112_v48  ;;  %v4114_v42 = vpop.eup %4113 }
 0xec0   :  { %v1383_v24 = vmul.f32 %v1381_v0, %v4597_v17  ;;  %v1009_v56 = vadd.f32 1.0, %v4114_v42 }
 0xec1   :  { %4115 = vpow2.f32 %v3640_v50 }
 0xec2   :  { %v3641_v40 = vmul.f32 -1.442695, %v1383_v24 }
 0xec4   :  { %4117 = vpow2.f32 %v3641_v40 }
 0xec5   :  { %4119 = vpow2.f32 %v3633_v38 }
 0xec6   :  { %4121 = vpow2.f32 %v3624_v53 }
 0xec7   :  { %4123 = vrcp.f32 %v1237_v44 }
 0xecb   :  { %v4116_v39 = vpop.eup %4115 }
 0xecc   :  { %v1390_v0 = vadd.f32 1.0, %v4116_v39 }
 0xece   :  { %v4118_v41 = vpop.eup %4117 }
 0xecf   :  { %v1391_v45 = vadd.f32 1.0, %v4118_v41  ;;  %v4120_v46 = vpop.eup %4119 }
 0xed0   :  { %v1236_v50 = vadd.f32 1.0, %v4120_v46  ;;  %v4122_v35 = vpop.eup %4121 }
 0xed1   :  { %4125 = vrcp.f32 %v1391_v45  ;;  %v4124_v52 = vpop.eup %4123  ;;  %v1008_v40 = vadd.f32 1.0, %v4122_v35 }
 0xed2   :  { %4127 = vrcp.f32 %v1009_v56  ;;  %v1243_v13 = vmul.f32 %v4124_v52, %v4597_v17 }
 0xed3   :  { %4129 = vrcp.f32 %v1390_v0 }
 0xed4   :  { %4131 = vrcp.f32 %v1236_v50  ;;  %v5366_v44 = vadd.f32 %v1243_v13, %v4602_v31 }
 0xed5   :  { %4133 = vrcp.f32 %v1008_v40 }
 0xedb   :  { %v4126_v30 = vpop.eup %4125 }
 0xedc   :  { %v1397_v38 = vmul.f32 %v4126_v30, %v4597_v17  ;;  %v4128_v14 = vpop.eup %4127 }
 0xedd   :  { %v4130_v48 = vpop.eup %4129  ;;  %v1015_v42 = vmul.f32 %v4128_v14, %v4597_v17 }
 0xede   :  { %v1399_v24 = vadd.f32 %v1397_v38, %v4602_v31  ;;  %v4132_v39 = vpop.eup %4131  ;;  %v1400_v46 = vmul.f32 %v4130_v48, %v5200_v1 }
 0xedf   :  { %v1247_v41 = vmul.f32 %v4132_v39, %v5366_v44  ;;  %v5372_v56 = vadd.f32 %v1015_v42, %v4602_v31  ;;  %v5375_v45 = vpop.eup %4133 }
 0xee0   :  { %v1401_v53 = vmul.f32 %v4130_v48, %v1399_v24 }
 0xee1   :  { %v1019_v0 = vmul.f32 %v5375_v45, %v5372_v56 }
 0xee2   :  { %1403 = vrot.lane.b32.xlu0 %v1401_v53, %s4482_s7 }
 0xee6   :  { %1249 = vrot.lane.b32.xlu0 %v1247_v41, %s4482_s7 }
 0xeea   :  { %1021 = vrot.lane.b32.xlu0 %v1019_v0, %s4482_s7 }
 0xf54   :  { %v1404_v50 = vpop.permute.xlu0 %1403 }
 0xf55   :  { %v5381_v35 = vadd.f32 %v1404_v50, %v1400_v46  ;;  %v1018_v46 = vmul.f32 %v5375_v45, %v5113_v5  ;;  %v5436_v5 = vld [vmem:[%s6475_s2 + $0x80] ss:$8 sps:$4 sm:$0xff]   ;;  %v5449_v45 = vld [vmem:[%s6475_s2 + $0x90] ss:$8 sps:$4 sm:$0xff]  }
 0xf57   :  { %4135 = vtanh.f32 %v5381_v35 }
 0xf61   :  { %v4136_v52 = vpop.eup %4135 }
 0xf62   :  { %v1408_v40 = vmul.f32 %v4136_v52, %v1399_v24 }
 0xf64   :  { %1410 = vrot.lane.b32.xlu1 %v1408_v40, %s4482_s7 }
 0xfd6   :  { %v1411_v30 = vpop.permute.xlu1 %1410 }
 0xfd7   :  { %v1413_v38 = vsel %vm139_vm1, %v1411_v30, %v5234_v63 }
 0xfd8   :  { %v1414_v13 = vpack.c.bf16 %v1413_v38, %v1413_v38 }
 0xfda   :  { %1448 = vmatmul.mubr.bf16.vlgmr.msra.gmra.mrb[36].mxu0 %v1414_v13 }
 0xfdb   :  { %1564 = vmatpush1.bf16.msra.mxu0 %v4902_v7  ;;  %1595 = vmatprep.mubr.bf16.mxu0 %v6578_v22  ;;  %v5406_v7 = vld [vmem:[%s6475_s2 + $0x84] ss:$8 sps:$4 sm:$0xff]  }
 0xfdc   :  { %1565 = vmatprep.subr.bf16.mxu0 %v4907_v8  ;;  %6602 = vst [vmem:[#allocation13_spill] sm:$0xff] %v5406_v7 }
 0xfdf   :  { %1566 = vmatpush1.bf16.msra.mxu0 %v4915_v25 }
 0xfe0   :  { %1567 = vmatprep.subr.bf16.mxu0 %v4921_v2 }
 0xfe3   :  { %1568 = vmatpush1.bf16.msra.mxu0 %v4927_v27 }
 0xfe4   :  { %1569 = vmatprep.subr.bf16.mxu0 %v4933_v26 }
 0xfe7   :  { %1570 = vmatpush1.bf16.msra.mxu0 %v4939_v28 }
 0xfe8   :  { %1571 = vmatprep.subr.bf16.mxu0 %v4945_v32 }
 0xfeb   :  { %1572 = vmatpush1.bf16.msra.mxu0 %v4951_v16 }
 0xfec   :  { %1573 = vmatprep.subr.bf16.mxu0 %v4957_v3 }
 0xfef   :  { %1574 = vmatpush1.bf16.msra.mxu0 %v6589_v23 }
 0xff0   :  { %1575 = vmatprep.subr.bf16.mxu0 %v6590_v57 }
 0xff3   :  { %1576 = vmatpush1.bf16.msra.mxu0 %v6591_v58  ;;  %v1250_v58 = vpop.permute.xlu0 %1249 }
 0xff4   :  { %1577 = vmatprep.subr.bf16.mxu0 %v6592_v60  ;;  %v1246_v60 = vmul.f32 %v4132_v39, %v5106_v37  ;;  %v1634_v37 = vpack.c.bf16 %v1408_v40, %v1408_v40 }
 0xff6   :  { %v5413_v63 = vadd.f32 %v1250_v58, %v1246_v60  ;;  %v5513_v58 = vld [vmem:[%s6475_s2 + $0xe0] ss:$8 sps:$4 sm:$0xff]   ;;  %v5519_v60 = vld [vmem:[%s6475_s2 + $0xf4] ss:$8 sps:$4 sm:$0xff]  }
 0xff7   :  { %1578 = vmatpush1.bf16.msra.mxu0 %v6593_v61  ;;  %v1022_v39 = vpop.permute.xlu0 %1021 }
 0xff8   :  { %1791 = vmatprep.subr.bf16.mxu0 %v5406_v7  ;;  %v5424_v50 = vadd.f32 %v1022_v39, %v1018_v46  ;;  %v6607_v39 = vld [vmem:[#allocation9_spill] sm:$0xff]  ;;  %v6608_v46 = vld [vmem:[#allocation16_spill] sm:$0xff] }
0x10ad   :  { %v1449_v8 = vpop.f32.mrb[36].mxu0 }
0x10ae   :  { %v1450_v25 = vadd.f32 %v1449_v8, %v4726_v11  ;;  %v1451_v2 = vpop.f32.mrb[37].mxu0 }
0x10af   :  { %v1452_v27 = vadd.f32 %v1451_v2, %v4729_v12  ;;  %v1453_v26 = vpop.f32.mrb[38].mxu0 }
0x10b0   :  { %v3642_v28 = vmul.f32 -1.442695, %v1450_v25  ;;  %v1454_v32 = vpop.f32.mrb[39].mxu0  ;;  %v5465_v26 = vld [vmem:[%s6475_s2 + $0xa0] ss:$8 sps:$4 sm:$0xff]  }
0x10b1   :  { %v1457_v16 = vmul.f32 %v1452_v27, %v4597_v17  ;;  %v5457_v27 = vld [vmem:[%s6475_s2 + $0xa4] ss:$8 sps:$4 sm:$0xff]   ;;  %v5477_v32 = vld [vmem:[%s6475_s2 + $0xb0] ss:$8 sps:$4 sm:$0xff]  }
0x10b2   :  { %4137 = vpow2.f32 %v3642_v28  ;;  %v5471_v28 = vld [vmem:[%s6475_s2 + $0xb4] ss:$8 sps:$4 sm:$0xff]  }
0x10b3   :  { %v3643_v3 = vmul.f32 -1.442695, %v1457_v16  ;;  %v5483_v16 = vld [vmem:[%s6475_s2 + $0xc4] ss:$8 sps:$4 sm:$0xff]  }
0x10b5   :  { %4139 = vpow2.f32 %v3643_v3  ;;  %v5489_v3 = vld [vmem:[%s6475_s2 + $0xc0] ss:$8 sps:$4 sm:$0xff]  }
0x10bc   :  { %v4138_v1 = vpop.eup %4137 }
0x10bd   :  { %v1464_v61 = vadd.f32 1.0, %v4138_v1  ;;  %v5495_v1 = vld [vmem:[%s6475_s2 + $0xd4] ss:$8 sps:$4 sm:$0xff]  }
0x10bf   :  { %v4140_v23 = vpop.eup %4139 }
0x10c0   :  { %v1465_v57 = vadd.f32 1.0, %v4140_v23  ;;  %v5501_v23 = vld [vmem:[%s6475_s2 + $0xd0] ss:$8 sps:$4 sm:$0xff]  }
0x10c2   :  { %4141 = vrcp.f32 %v1465_v57  ;;  %v5507_v57 = vld [vmem:[%s6475_s2 + $0xe4] ss:$8 sps:$4 sm:$0xff]  }
0x10c3   :  { %4143 = vrcp.f32 %v1464_v61  ;;  %v5525_v61 = vld [vmem:[%s6475_s2 + $0xf0] ss:$8 sps:$4 sm:$0xff]  }
0x10c4   :  { %4145 = vtanh.f32 %v5413_v63 }
0x10c5   :  { %4147 = vtanh.f32 %v5424_v50 }
0x10cc   :  { %v4142_v14 = vpop.eup %4141 }
0x10cd   :  { %v1471_v24 = vmul.f32 %v4142_v14, %v4597_v17  ;;  %v4144_v53 = vpop.eup %4143 }
0x10ce   :  { %v4146_v41 = vpop.eup %4145  ;;  %v1474_v52 = vmul.f32 %v4144_v53, %v5231_v55  ;;  %v5443_v55 = vld [vmem:[%s6475_s2 + $0x94] ss:$8 sps:$4 sm:$0xff]  }
0x10cf   :  { %v1473_v48 = vadd.f32 %v1471_v24, %v4602_v31  ;;  %v1254_v0 = vmul.f32 %v4146_v41, %v5366_v44  ;;  %v4148_v30 = vpop.eup %4147  ;;  %v6604_v41 = vld [vmem:[#allocation8_spill] sm:$0xff] }
0x10d0   :  { %v1026_v44 = vmul.f32 %v4148_v30, %v5372_v56 }
0x10d1   :  { %v1475_v42 = vmul.f32 %v4144_v53, %v1473_v48 }
0x10d3   :  { %1477 = vrot.lane.b32.xlu1 %v1475_v42, %s4482_s7  ;;  %v6603_v42 = vld [vmem:[#allocation7_spill] sm:$0xff] }
0x10d7   :  { %1256 = vrot.lane.b32.xlu1 %v1254_v0, %s4482_s7 }
0x10db   :  { %1636 = vrot.lane.b32.xlu1 %v1634_v37, %s4482_s7  ;;  %v6606_v37 = vld [vmem:[#allocation11_spill] sm:$0xff] }
0x1145   :  { %v1478_v38 = vpop.permute.xlu1 %1477 }
0x1146   :  { %v5428_v13 = vadd.f32 %v1478_v38, %v1474_v52  ;;  %v5559_v52 = vld [vmem:[%s6475_s2 + $0x104] ss:$8 sps:$4 sm:$0xff]  }
0x1147   :  { %6609 = vst [vmem:[#allocation14_spill] sm:$0xff] %v5559_v52 }
0x1148   :  { %4149 = vtanh.f32 %v5428_v13 }
0x1149   :  { %v1257_v40 = vpop.permute.xlu1 %1256 }
0x114a   :  { %v1259_v8 = vsel %vm139_vm1, %v1257_v40, %v1026_v44 }
0x114b   :  { %v1260_v25 = vpack.c.bf16 %v1259_v8, %v1259_v8 }
0x114d   :  { %1294 = vmatmul.mubr.bf16.vlgmr.msra.gmra.mrb[12].mxu1 %v1260_v25  ;;  %v1637_v53 = vpop.permute.xlu1 %1636 }
0x114e   :  { %1490 = vmatpush1.bf16.msra.mxu1 %v5436_v5  ;;  %1521 = vmatprep.mubr.bf16.mxu1 %v6578_v22 }
0x114f   :  { %1491 = vmatprep.subr.bf16.mxu1 %v5443_v55 }
0x1152   :  { %v4150_v56 = vpop.eup %4149  ;;  %1492 = vmatpush1.bf16.msra.mxu1 %v5449_v45 }
0x1153   :  { %v5452_v2 = vmul.f32 %v4150_v56, %v1473_v48  ;;  %1493 = vmatprep.subr.bf16.mxu1 %v5457_v27 }
0x1155   :  { %1484 = vrot.lane.b32.xlu0 %v5452_v2, %s4482_s7 }
0x1156   :  { %1494 = vmatpush1.bf16.msra.mxu1 %v5465_v26 }
0x1157   :  { %1495 = vmatprep.subr.bf16.mxu1 %v5471_v28 }
0x115a   :  { %1496 = vmatpush1.bf16.msra.mxu1 %v5477_v32 }
0x115b   :  { %1497 = vmatprep.subr.bf16.mxu1 %v5483_v16 }
0x115e   :  { %1498 = vmatpush1.bf16.msra.mxu1 %v5489_v3 }
0x115f   :  { %1499 = vmatprep.subr.bf16.mxu1 %v5495_v1 }
0x1162   :  { %1500 = vmatpush1.bf16.msra.mxu1 %v5501_v23 }
0x1163   :  { %1501 = vmatprep.subr.bf16.mxu1 %v5507_v57 }
0x1166   :  { %1502 = vmatpush1.bf16.msra.mxu1 %v5513_v58 }
0x1167   :  { %1503 = vmatprep.subr.bf16.mxu1 %v5519_v60 }
0x116a   :  { %1504 = vmatpush1.bf16.msra.mxu1 %v5525_v61 }
0x116b   :  { %1641 = vmatprep.subr.bf16.mxu1 %v5182_v34 }
0x11c7   :  { %v1485_v14 = vpop.permute.xlu0 %1484 }
0x11c8   :  { %v1487_v24 = vsel %vm139_vm1, %v1485_v14, %v1254_v0  ;;  %v6605_v0 = vld [vmem:[#allocation12_spill] sm:$0xff] }
0x11c9   :  { %v1488_v48 = vpack.c.bf16 %v1487_v24, %v1487_v24  ;;  %v6610_v24 = vld [vmem:[#allocation10_spill] sm:$0xff] }
0x11cb   :  { %1522 = vmatmul.mubr.bf16.vlgmr.msra.gmra.mrb[16].mxu1 %v1488_v48 }
0x11cc   :  { %1642 = vmatpush1.bf16.msra.mxu1 %v5121_v36  ;;  %1673 = vmatprep.mubr.bf16.mxu1 %v6578_v22 }
0x11cd   :  { %1643 = vmatprep.subr.bf16.mxu1 %v5128_v19 }
0x11d0   :  { %1644 = vmatpush1.bf16.msra.mxu1 %v5134_v18 }
0x11d1   :  { %1645 = vmatprep.subr.bf16.mxu1 %v5140_v47 }
0x11d4   :  { %1646 = vmatpush1.bf16.msra.mxu1 %v5146_v59 }
0x11d5   :  { %1647 = vmatprep.subr.bf16.mxu1 %v5152_v10 }
0x11d8   :  { %1648 = vmatpush1.bf16.msra.mxu1 %v5158_v21 }
0x11d9   :  { %1717 = vmatprep.subr.bf16.mxu1 %v5251_v51 }
0x11db   :  { %3650 = vmatmul.mubr.msk.bf16.vlgmr.msra.gmra.mrb[20].mxu1 %vm139_vm1, %v1637_v53  ;;  %v6611_v53 = vld [vmem:[#allocation19_spill] sm:$0xff] }
0x11dc   :  { %1718 = vmatpush1.bf16.msra.mxu1 %v5258_v15  ;;  %1749 = vmatprep.mubr.bf16.mxu1 %v6578_v22 }
0x11dd   :  { %1719 = vmatprep.subr.bf16.mxu1 %v5265_v9 }
0x11e0   :  { %1720 = vmatpush1.bf16.msra.mxu1 %v5271_v62 }
0x11e1   :  { %1721 = vmatprep.subr.bf16.mxu1 %v5277_v49 }
0x11e4   :  { %1722 = vmatpush1.bf16.msra.mxu1 %v5283_v4 }
0x11e5   :  { %1723 = vmatprep.subr.bf16.mxu1 %v5289_v20 }
0x11e8   :  { %1724 = vmatpush1.bf16.msra.mxu1 %v5295_v54 }
0x11e9   :  { %1725 = vmatprep.subr.bf16.mxu1 %v5301_v33 }
0x11ec   :  { %1726 = vmatpush1.bf16.msra.mxu1 %v5307_v6 }
0x11ed   :  { %1727 = vmatprep.subr.bf16.mxu1 %v6603_v42 }
0x11f0   :  { %1728 = vmatpush1.bf16.msra.mxu1 %v6604_v41 }
0x11f1   :  { %1729 = vmatprep.subr.bf16.mxu1 %v6605_v0 }
0x11f4   :  { %1730 = vmatpush1.bf16.msra.mxu1 %v6606_v37 }
0x11f5   :  { %1731 = vmatprep.subr.bf16.mxu1 %v6607_v39 }
0x11f8   :  { %1732 = vmatpush1.bf16.msra.mxu1 %v6608_v46 }
0x11f9   :  { %1865 = vmatprep.subr.bf16.mxu1 %v5559_v52  ;;  %v3648_v52 = vld [vmem:[%s6473_s0 + $0x40] sm:$0xff] }
0x1220   :  { %v1295_v30 = vpop.f32.mrb[12].mxu1 }
0x1221   :  { %v1297_v38 = vpop.f32.mrb[13].mxu1  ;;  %v1296_v42 = vadd.f32 %v1295_v30, %v5060_v29 }
0x1222   :  { %v1299_v44 = vpop.f32.mrb[14].mxu1  ;;  %v1298_v39 = vadd.f32 %v1297_v38, %v6611_v53 }
0x1223   :  { %v1300_v40 = vpop.f32.mrb[15].mxu1  ;;  %v3649_v44 = vld [vmem:[%s6473_s0 + $0x48] sm:$0xff] }
0x1224   :  { %v1303_v37 = vmul.f32 %v1298_v39, %v4597_v17 }
0x1226   :  { %v3636_v41 = vmul.f32 -1.442695, %v1303_v37 }
0x129e   :  { %v1523_v8 = vpop.f32.mrb[16].mxu1 }
0x129f   :  { %v1525_v25 = vpop.f32.mrb[17].mxu1  ;;  %v1524_v39 = vadd.f32 %v1523_v8, %v6585_v43 }
0x12a0   :  { %v1527_v56 = vpop.f32.mrb[18].mxu1  ;;  %v1526_v48 = vadd.f32 %v1525_v25, %v6610_v24 }
0x12a1   :  { %v1528_v14 = vpop.f32.mrb[19].mxu1  ;;  %v3644_v6 = vmul.f32 -1.442695, %v1524_v39 }
0x12a2   :  { %v1531_v46 = vmul.f32 %v1526_v48, %v4597_v17 }
0x12a4   :  { %v3645_v0 = vmul.f32 -1.442695, %v1531_v46 }
0x12a6   :  { %4151 = vpow2.f32 %v3645_v0 }
0x12a7   :  { %4153 = vpow2.f32 %v3636_v41 }
0x12ae   :  { %v1675_v40 = vpop.f32.mrb[20].mxu1 }
0x12af   :  { %v1682_v56 = vadd.f32 %v3648_v52, %v1675_v40  ;;  %v1677_v14 = vpop.f32.mrb[21].mxu1  ;;  %v3635_v52 = vmul.f32 -1.442695, %v1296_v42 }
0x12b0   :  { %v1683_v25 = vadd.f32 %v3649_v44, %v1677_v14  ;;  %v1679_v38 = vpop.f32.mrb[22].mxu1  ;;  %v4152_v33 = vpop.eup %4151 }
0x12b1   :  { %v3651_v53 = vmul.f32 -1.442695, %v1682_v56  ;;  %v1680_v48 = vpop.f32.mrb[23].mxu1  ;;  %v1539_v37 = vadd.f32 1.0, %v4152_v33  ;;  %v4154_v0 = vpop.eup %4153 }
0x12b2   :  { %v1685_v46 = vmul.f32 %v1683_v25, %v4597_v17  ;;  %v1311_v56 = vadd.f32 1.0, %v4154_v0 }
0x12b3   :  { %4155 = vpow2.f32 %v3651_v53 }
0x12b4   :  { %v3652_v24 = vmul.f32 -1.442695, %v1685_v46 }
0x12b6   :  { %4157 = vpow2.f32 %v3652_v24 }
0x12b7   :  { %4159 = vpow2.f32 %v3644_v6 }
0x12b8   :  { %4161 = vpow2.f32 %v3635_v52 }
0x12b9   :  { %4163 = vrcp.f32 %v1539_v37 }
0x12bd   :  { %v4156_v44 = vpop.eup %4155 }
0x12be   :  { %v1692_v14 = vadd.f32 1.0, %v4156_v44 }
0x12c0   :  { %v4158_v40 = vpop.eup %4157 }
0x12c1   :  { %v1693_v8 = vadd.f32 1.0, %v4158_v40  ;;  %v4160_v41 = vpop.eup %4159 }
0x12c2   :  { %v1538_v53 = vadd.f32 1.0, %v4160_v41  ;;  %v4162_v30 = vpop.eup %4161 }
0x12c3   :  { %4165 = vrcp.f32 %v1693_v8  ;;  %v4164_v25 = vpop.eup %4163  ;;  %v1310_v24 = vadd.f32 1.0, %v4162_v30 }
0x12c4   :  { %4167 = vrcp.f32 %v1311_v56  ;;  %v1545_v6 = vmul.f32 %v4164_v25, %v4597_v17 }
0x12c5   :  { %4169 = vrcp.f32 %v1692_v14 }
0x12c6   :  { %4171 = vrcp.f32 %v1538_v53  ;;  %v5579_v52 = vadd.f32 %v1545_v6, %v4602_v31  ;;  %v5616_v6 = vld [vmem:[%s6475_s2 + $0x114] ss:$8 sps:$4 sm:$0xff]  }
0x12c7   :  { %4173 = vrcp.f32 %v1310_v24 }
0x12cd   :  { %v4166_v42 = vpop.eup %4165 }
0x12ce   :  { %v1699_v33 = vmul.f32 %v4166_v42, %v4597_v17  ;;  %v4168_v38 = vpop.eup %4167 }
0x12cf   :  { %v4170_v39 = vpop.eup %4169  ;;  %v1317_v37 = vmul.f32 %v4168_v38, %v4597_v17  ;;  %v5628_v38 = vld [vmem:[%s6475_s2 + $0x124] ss:$8 sps:$4 sm:$0xff]  }
0x12d0   :  { %v1701_v48 = vadd.f32 %v1699_v33, %v4602_v31  ;;  %v5583_v0 = vpop.eup %4171  ;;  %v1702_v14 = vmul.f32 %v4170_v39, %v5381_v35  ;;  %v5609_v35 = vld [vmem:[%s6475_s2 + $0x100] ss:$8 sps:$4 sm:$0xff]   ;;  %6613 = vst [vmem:[#allocation17_spill] sm:$0xff] %v5628_v38 }
0x12d1   :  { %v1549_v44 = vmul.f32 %v5583_v0, %v5579_v52  ;;  %v5588_v40 = vadd.f32 %v1317_v37, %v4602_v31  ;;  %v5591_v56 = vpop.eup %4173  ;;  %v5652_v37 = vld [vmem:[%s6475_s2 + $0x144] ss:$8 sps:$4 sm:$0xff]  }
0x12d2   :  { %v1703_v46 = vmul.f32 %v4170_v39, %v1701_v48  ;;  %v5640_v39 = vld [vmem:[%s6475_s2 + $0x134] ss:$8 sps:$4 sm:$0xff]   ;;  %6617 = vst [vmem:[#allocation22_spill] sm:$0xff] %v5652_v37 }
0x12d3   :  { %v1321_v8 = vmul.f32 %v5591_v56, %v5588_v40  ;;  %6615 = vst [vmem:[#allocation20_spill] sm:$0xff] %v5640_v39 }
0x12d4   :  { %1705 = vrot.lane.b32.xlu0 %v1703_v46, %s4482_s7  ;;  %v5646_v46 = vld [vmem:[%s6475_s2 + $0x130] ss:$8 sps:$4 sm:$0xff]  }
0x12d5   :  { %6616 = vst [vmem:[#allocation21_spill] sm:$0xff] %v5646_v46 }
0x12d8   :  { %1551 = vrot.lane.b32.xlu0 %v1549_v44, %s4482_s7  ;;  %v5658_v44 = vld [vmem:[%s6475_s2 + $0x140] ss:$8 sps:$4 sm:$0xff]  }
0x12d9   :  { %6618 = vst [vmem:[#allocation23_spill] sm:$0xff] %v5658_v44 }
0x12dc   :  { %1323 = vrot.lane.b32.xlu0 %v1321_v8, %s4482_s7  ;;  %v5664_v8 = vld [vmem:[%s6475_s2 + $0x154] ss:$8 sps:$4 sm:$0xff]  }
0x12dd   :  { %6619 = vst [vmem:[#allocation24_spill] sm:$0xff] %v5664_v8 }
0x1346   :  { %v1706_v41 = vpop.permute.xlu0 %1705 }
0x1347   :  { %v5597_v53 = vadd.f32 %v1706_v41, %v1702_v14  ;;  %v5670_v14 = vld [vmem:[%s6475_s2 + $0x150] ss:$8 sps:$4 sm:$0xff]   ;;  %v5676_v41 = vld [vmem:[%s6475_s2 + $0x164] ss:$8 sps:$4 sm:$0xff]  }
0x1348   :  { %6620 = vst [vmem:[#allocation25_spill] sm:$0xff] %v5670_v14  ;;  %6621 = vst [vmem:[#allocation26_spill] sm:$0xff] %v5676_v41 }
0x1349   :  { %4175 = vtanh.f32 %v5597_v53 }
0x1353   :  { %v4176_v30 = vpop.eup %4175 }
0x1354   :  { %v5600_v25 = vmul.f32 %v4176_v30, %v1701_v48  ;;  %v5634_v48 = vld [vmem:[%s6475_s2 + $0x120] ss:$8 sps:$4 sm:$0xff]  }
0x1355   :  { %6614 = vst [vmem:[#allocation18_spill] sm:$0xff] %v5634_v48  ;;  %v5682_v30 = vld [vmem:[%s6475_s2 + $0x160] ss:$8 sps:$4 sm:$0xff]  }
0x1356   :  { %1712 = vrot.lane.b32.xlu1 %v5600_v25, %s4482_s7  ;;  %6622 = vst [vmem:[#allocation27_spill] sm:$0xff] %v5682_v30 }
0x13c8   :  { %v1713_v24 = vpop.permute.xlu1 %1712 }
0x13c9   :  { %v1715_v42 = vsel %vm139_vm1, %v1713_v24, %v5452_v2  ;;  %v5622_v2 = vld [vmem:[%s6475_s2 + $0x110] ss:$8 sps:$4 sm:$0xff]   ;;  %v5688_v24 = vld [vmem:[%s6475_s2 + $0x174] ss:$8 sps:$4 sm:$0xff]  }
0x13ca   :  { %v1716_v33 = vpack.c.bf16 %v1715_v42, %v1715_v42  ;;  %6612 = vst [vmem:[#allocation15_spill] sm:$0xff] %v5622_v2  ;;  %6623 = vst [vmem:[#allocation28_spill] sm:$0xff] %v5688_v24  ;;  %v5694_v42 = vld [vmem:[%s6475_s2 + $0x170] ss:$8 sps:$4 sm:$0xff]  }
0x13cb   :  { %6624 = vst [vmem:[#allocation29_spill] sm:$0xff] %v5694_v42 }
0x13cc   :  { %1750 = vmatmul.mubr.bf16.vlgmr.msra.gmra.mrb[24].mxu1 %v1716_v33 }
0x13cd   :  { %1866 = vmatpush1.bf16.msra.mxu1 %v5609_v35  ;;  %1897 = vmatprep.mubr.bf16.mxu1 %v6578_v22 }
0x13ce   :  { %1867 = vmatprep.subr.bf16.mxu1 %v5616_v6 }
0x13d1   :  { %1868 = vmatpush1.bf16.msra.mxu1 %v5622_v2 }
0x13d2   :  { %1869 = vmatprep.subr.bf16.mxu1 %v5628_v38 }
0x13d5   :  { %1870 = vmatpush1.bf16.msra.mxu1 %v5634_v48 }
0x13d6   :  { %1871 = vmatprep.subr.bf16.mxu1 %v5640_v39 }
0x13d9   :  { %1872 = vmatpush1.bf16.msra.mxu1 %v5646_v46 }
0x13da   :  { %1873 = vmatprep.subr.bf16.mxu1 %v5652_v37 }
0x13dd   :  { %1874 = vmatpush1.bf16.msra.mxu1 %v5658_v44 }
0x13de   :  { %1875 = vmatprep.subr.bf16.mxu1 %v5664_v8 }
0x13e1   :  { %1876 = vmatpush1.bf16.msra.mxu1 %v5670_v14 }
0x13e2   :  { %1877 = vmatprep.subr.bf16.mxu1 %v5676_v41 }
0x13e5   :  { %1878 = vmatpush1.bf16.msra.mxu1 %v5682_v30 }
0x13e6   :  { %1879 = vmatprep.subr.bf16.mxu1 %v5688_v24 }
0x13e9   :  { %1880 = vmatpush1.bf16.msra.mxu1 %v5694_v42  ;;  %v1552_v42 = vpop.permute.xlu0 %1551 }
0x13ea   :  { %2093 = vmatprep.subr.bf16.mxu1 %v5406_v7  ;;  %v1548_v7 = vmul.f32 %v5583_v0, %v5413_v63  ;;  %v1320_v0 = vmul.f32 %v5591_v56, %v5424_v50 }
0x13ed   :  { %v1324_v63 = vpop.permute.xlu0 %1323 }
0x149f   :  { %v1751_v33 = vpop.f32.mrb[24].mxu1 }
0x14a0   :  { %v1752_v41 = vadd.f32 %v1751_v33, %v4726_v11  ;;  %v1753_v30 = vpop.f32.mrb[25].mxu1  ;;  %v5703_v33 = vadd.f32 %v1552_v42, %v1548_v7  ;;  %v1936_v7 = vpack.c.bf16 %v5600_v25, %v5600_v25 }
0x14a1   :  { %v1754_v14 = vadd.f32 %v1753_v30, %v4729_v12  ;;  %v1755_v8 = vpop.f32.mrb[26].mxu1 }
0x14a2   :  { %v3653_v44 = vmul.f32 -1.442695, %v1752_v41  ;;  %v1756_v37 = vpop.f32.mrb[27].mxu1 }
0x14a3   :  { %v1759_v24 = vmul.f32 %v1754_v14, %v4597_v17 }
0x14a4   :  { %4177 = vpow2.f32 %v3653_v44 }
0x14a5   :  { %v3654_v46 = vmul.f32 -1.442695, %v1759_v24 }
0x14a7   :  { %4179 = vpow2.f32 %v3654_v46 }
0x14ae   :  { %v4178_v39 = vpop.eup %4177 }
0x14af   :  { %v1766_v2 = vadd.f32 1.0, %v4178_v39 }
0x14b1   :  { %v4180_v48 = vpop.eup %4179 }
0x14b2   :  { %v1767_v38 = vadd.f32 1.0, %v4180_v48 }
0x14b4   :  { %4181 = vrcp.f32 %v1767_v38 }
0x14b5   :  { %4183 = vrcp.f32 %v1766_v2  ;;  %v5716_v2 = vadd.f32 %v1324_v63, %v1320_v0 }
0x14b6   :  { %4185 = vtanh.f32 %v5703_v33 }
0x14b7   :  { %4187 = vtanh.f32 %v5716_v2 }
0x14be   :  { %v4182_v37 = vpop.eup %4181 }
0x14bf   :  { %v1773_v8 = vmul.f32 %v4182_v37, %v4597_v17  ;;  %v4184_v46 = vpop.eup %4183 }
0x14c0   :  { %v4186_v41 = vpop.eup %4185  ;;  %v1776_v38 = vmul.f32 %v4184_v46, %v5428_v13 }
0x14c1   :  { %v1775_v44 = vadd.f32 %v1773_v8, %v4602_v31  ;;  %v1556_v48 = vmul.f32 %v4186_v41, %v5579_v52  ;;  %v4188_v39 = vpop.eup %4187 }
0x14c2   :  { %v1328_v25 = vmul.f32 %v4188_v39, %v5588_v40  ;;  %v3659_v39 = vld [vmem:[%s6473_s0 + $0x50] sm:$0xff] }
0x14c3   :  { %v1777_v14 = vmul.f32 %v4184_v46, %v1775_v44 }
0x14c5   :  { %1779 = vrot.lane.b32.xlu1 %v1777_v14, %s4482_s7  ;;  %v6634_v14 = vld [vmem:[#allocation10_spill] sm:$0xff] }
0x14c9   :  { %1558 = vrot.lane.b32.xlu1 %v1556_v48, %s4482_s7 }
0x14cd   :  { %1938 = vrot.lane.b32.xlu1 %v1936_v7, %s4482_s7 }
0x1537   :  { %v1780_v30 = vpop.permute.xlu1 %1779 }
0x1538   :  { %v5720_v52 = vadd.f32 %v1780_v30, %v1776_v38  ;;  %v3660_v30 = vld [vmem:[%s6473_s0 + $0x58] sm:$0xff] }
0x153a   :  { %4189 = vtanh.f32 %v5720_v52 }
0x153b   :  { %v1559_v24 = vpop.permute.xlu1 %1558 }
0x153c   :  { %v1561_v42 = vsel %vm139_vm1, %v1559_v24, %v1328_v25 }
0x153d   :  { %v1562_v37 = vpack.c.bf16 %v1561_v42, %v1561_v42 }
0x153f   :  { %1596 = vmatmul.mubr.bf16.vlgmr.msra.gmra.mrb[40].mxu0 %v1562_v37 }
0x1540   :  { %1792 = vmatpush1.bf16.msra.mxu0 %v5436_v5  ;;  %1823 = vmatprep.mubr.bf16.mxu0 %v6578_v22 }
0x1541   :  { %1793 = vmatprep.subr.bf16.mxu0 %v5443_v55 }
0x1544   :  { %v4190_v50 = vpop.eup %4189  ;;  %1794 = vmatpush1.bf16.msra.mxu0 %v5449_v45 }
0x1545   :  { %v5729_v13 = vmul.f32 %v4190_v50, %v1775_v44  ;;  %1795 = vmatprep.subr.bf16.mxu0 %v5457_v27 }
0x1547   :  { %1786 = vrot.lane.b32.xlu0 %v5729_v13, %s4482_s7 }
0x1548   :  { %1796 = vmatpush1.bf16.msra.mxu0 %v5465_v26 }
0x1549   :  { %1797 = vmatprep.subr.bf16.mxu0 %v5471_v28 }
0x154c   :  { %1798 = vmatpush1.bf16.msra.mxu0 %v5477_v32 }
0x154d   :  { %1799 = vmatprep.subr.bf16.mxu0 %v5483_v16 }
0x1550   :  { %1800 = vmatpush1.bf16.msra.mxu0 %v5489_v3 }
0x1551   :  { %1801 = vmatprep.subr.bf16.mxu0 %v5495_v1 }
0x1554   :  { %1802 = vmatpush1.bf16.msra.mxu0 %v5501_v23 }
0x1555   :  { %1803 = vmatprep.subr.bf16.mxu0 %v5507_v57 }
0x1558   :  { %1804 = vmatpush1.bf16.msra.mxu0 %v5513_v58 }
0x1559   :  { %1805 = vmatprep.subr.bf16.mxu0 %v5519_v60 }
0x155c   :  { %1806 = vmatpush1.bf16.msra.mxu0 %v5525_v61 }
0x155d   :  { %1943 = vmatprep.subr.bf16.mxu0 %v5182_v34  ;;  %v1939_v34 = vpop.permute.xlu1 %1938 }
0x15b9   :  { %v1787_v40 = vpop.permute.xlu0 %1786 }
0x15ba   :  { %v1789_v56 = vsel %vm139_vm1, %v1787_v40, %v1556_v48  ;;  %v6635_v48 = vld [vmem:[#allocation19_spill] sm:$0xff] }
0x15bb   :  { %v1790_v8 = vpack.c.bf16 %v1789_v56, %v1789_v56 }
0x15bd   :  { %1824 = vmatmul.mubr.bf16.vlgmr.msra.gmra.mrb[44].mxu0 %v1790_v8 }
0x15be   :  { %1944 = vmatpush1.bf16.msra.mxu0 %v5121_v36  ;;  %1975 = vmatprep.mubr.bf16.mxu0 %v6578_v22  ;;  %v6625_v36 = vld [vmem:[#allocation5_spill] sm:$0xff] }
0x15bf   :  { %1945 = vmatprep.subr.bf16.mxu0 %v5128_v19  ;;  %v6626_v19 = vld [vmem:[#allocation6_spill] sm:$0xff] }
0x15c2   :  { %1946 = vmatpush1.bf16.msra.mxu0 %v5134_v18  ;;  %v6627_v18 = vld [vmem:[#allocation7_spill] sm:$0xff] }
0x15c3   :  { %1947 = vmatprep.subr.bf16.mxu0 %v5140_v47  ;;  %v6628_v47 = vld [vmem:[#allocation8_spill] sm:$0xff] }
0x15c6   :  { %1948 = vmatpush1.bf16.msra.mxu0 %v5146_v59  ;;  %v6629_v59 = vld [vmem:[#allocation12_spill] sm:$0xff] }
0x15c7   :  { %1949 = vmatprep.subr.bf16.mxu0 %v5152_v10  ;;  %v6630_v10 = vld [vmem:[#allocation11_spill] sm:$0xff] }
0x15ca   :  { %1950 = vmatpush1.bf16.msra.mxu0 %v5158_v21  ;;  %v6631_v21 = vld [vmem:[#allocation9_spill] sm:$0xff] }
0x15cb   :  { %2019 = vmatprep.subr.bf16.mxu0 %v5251_v51  ;;  %v6632_v51 = vld [vmem:[#allocation16_spill] sm:$0xff] }
0x15cd   :  { %3661 = vmatmul.mubr.msk.bf16.vlgmr.msra.gmra.mrb[48].mxu0 %vm139_vm1, %v1939_v34 }
0x15ce   :  { %2020 = vmatpush1.bf16.msra.mxu0 %v5258_v15  ;;  %2051 = vmatprep.mubr.bf16.mxu0 %v6578_v22  ;;  %v6633_v15 = vld [vmem:[#allocation14_spill] sm:$0xff] }
0x15cf   :  { %2021 = vmatprep.subr.bf16.mxu0 %v5265_v9 }
0x15d2   :  { %2022 = vmatpush1.bf16.msra.mxu0 %v5271_v62 }
0x15d3   :  { %2023 = vmatprep.subr.bf16.mxu0 %v5277_v49 }
0x15d6   :  { %2024 = vmatpush1.bf16.msra.mxu0 %v5283_v4 }
0x15d7   :  { %2025 = vmatprep.subr.bf16.mxu0 %v5289_v20 }
0x15da   :  { %2026 = vmatpush1.bf16.msra.mxu0 %v5295_v54 }
0x15db   :  { %2027 = vmatprep.subr.bf16.mxu0 %v6625_v36 }
0x15de   :  { %2028 = vmatpush1.bf16.msra.mxu0 %v6626_v19 }
0x15df   :  { %2029 = vmatprep.subr.bf16.mxu0 %v6627_v18 }
0x15e2   :  { %2030 = vmatpush1.bf16.msra.mxu0 %v6628_v47 }
0x15e3   :  { %2031 = vmatprep.subr.bf16.mxu0 %v6629_v59 }
0x15e6   :  { %2032 = vmatpush1.bf16.msra.mxu0 %v6630_v10 }
0x15e7   :  { %2033 = vmatprep.subr.bf16.mxu0 %v6631_v21 }
0x15ea   :  { %2034 = vmatpush1.bf16.msra.mxu0 %v6632_v51 }
0x15eb   :  { %2167 = vmatprep.subr.bf16.mxu0 %v6633_v15 }
0x1612   :  { %v1597_v9 = vpop.f32.mrb[40].mxu0 }
0x1613   :  { %v1599_v62 = vpop.f32.mrb[41].mxu0  ;;  %v1598_v18 = vadd.f32 %v1597_v9, %v5060_v29 }
0x1614   :  { %v1601_v49 = vpop.f32.mrb[42].mxu0  ;;  %v1600_v7 = vadd.f32 %v1599_v62, %v6635_v48 }
0x1615   :  { %v1602_v4 = vpop.f32.mrb[43].mxu0  ;;  %v3646_v10 = vmul.f32 -1.442695, %v1598_v18 }
0x1616   :  { %v1605_v0 = vmul.f32 %v1600_v7, %v4597_v17 }
0x1618   :  { %v3647_v37 = vmul.f32 -1.442695, %v1605_v0 }
0x1690   :  { %v1825_v20 = vpop.f32.mrb[44].mxu0 }
0x1691   :  { %v1827_v54 = vpop.f32.mrb[45].mxu0  ;;  %v1826_v34 = vadd.f32 %v1825_v20, %v6585_v43 }
0x1692   :  { %v1829_v44 = vpop.f32.mrb[46].mxu0  ;;  %v1828_v41 = vadd.f32 %v1827_v54, %v6634_v14 }
0x1693   :  { %v1830_v46 = vpop.f32.mrb[47].mxu0  ;;  %v3655_v47 = vmul.f32 -1.442695, %v1826_v34 }
0x1694   :  { %v1833_v63 = vmul.f32 %v1828_v41, %v4597_v17 }
0x1696   :  { %v3656_v38 = vmul.f32 -1.442695, %v1833_v63 }
0x1698   :  { %4191 = vpow2.f32 %v3656_v38 }
0x1699   :  { %4193 = vpow2.f32 %v3647_v37 }
0x16a0   :  { %v1977_v25 = vpop.f32.mrb[48].mxu0 }
0x16a1   :  { %v1984_v24 = vadd.f32 %v3659_v39, %v1977_v25  ;;  %v1979_v42 = vpop.f32.mrb[49].mxu0 }
0x16a2   :  { %v1985_v50 = vadd.f32 %v3660_v30, %v1979_v42  ;;  %v1981_v40 = vpop.f32.mrb[50].mxu0  ;;  %v4192_v59 = vpop.eup %4191 }
0x16a3   :  { %v3662_v56 = vmul.f32 -1.442695, %v1984_v24  ;;  %v1982_v8 = vpop.f32.mrb[51].mxu0  ;;  %v1841_v21 = vadd.f32 1.0, %v4192_v59  ;;  %v4194_v51 = vpop.eup %4193 }
0x16a4   :  { %v1987_v36 = vmul.f32 %v1985_v50, %v4597_v17  ;;  %v1613_v4 = vadd.f32 1.0, %v4194_v51 }
0x16a5   :  { %4195 = vpow2.f32 %v3662_v56 }
0x16a6   :  { %v3663_v19 = vmul.f32 -1.442695, %v1987_v36 }
0x16a8   :  { %4197 = vpow2.f32 %v3663_v19 }
0x16a9   :  { %4199 = vpow2.f32 %v3655_v47 }
0x16aa   :  { %4201 = vpow2.f32 %v3646_v10 }
0x16ab   :  { %4203 = vrcp.f32 %v1841_v21 }
0x16af   :  { %v4196_v62 = vpop.eup %4195 }
0x16b0   :  { %v1994_v54 = vadd.f32 1.0, %v4196_v62  ;;  %v6637_v62 = vld [vmem:[#allocation17_spill] sm:$0xff] }
0x16b2   :  { %v4198_v49 = vpop.eup %4197 }
0x16b3   :  { %v1995_v20 = vadd.f32 1.0, %v4198_v49  ;;  %v4200_v44 = vpop.eup %4199  ;;  %v6638_v49 = vld [vmem:[#allocation18_spill] sm:$0xff] }
0x16b4   :  { %v1840_v46 = vadd.f32 1.0, %v4200_v44  ;;  %v4202_v9 = vpop.eup %4201  ;;  %v6643_v44 = vld [vmem:[#allocation24_spill] sm:$0xff] }
0x16b5   :  { %4205 = vrcp.f32 %v1995_v20  ;;  %v4204_v41 = vpop.eup %4203  ;;  %v1612_v7 = vadd.f32 1.0, %v4202_v9  ;;  %v6640_v20 = vld [vmem:[#allocation21_spill] sm:$0xff]  ;;  %v6645_v9 = vld [vmem:[#allocation26_spill] sm:$0xff] }
0x16b6   :  { %4207 = vrcp.f32 %v1613_v4  ;;  %v1847_v38 = vmul.f32 %v4204_v41, %v4597_v17  ;;  %v6639_v4 = vld [vmem:[#allocation20_spill] sm:$0xff]  ;;  %v6646_v41 = vld [vmem:[#allocation27_spill] sm:$0xff] }
0x16b7   :  { %4209 = vrcp.f32 %v1994_v54  ;;  %v6641_v54 = vld [vmem:[#allocation22_spill] sm:$0xff] }
0x16b8   :  { %4211 = vrcp.f32 %v1840_v46  ;;  %v5791_v42 = vadd.f32 %v1847_v38, %v4602_v31  ;;  %v6644_v46 = vld [vmem:[#allocation25_spill] sm:$0xff] }
0x16b9   :  { %4213 = vrcp.f32 %v1612_v7  ;;  %v6647_v7 = vld [vmem:[#allocation28_spill] sm:$0xff] }
0x16bf   :  { %v4206_v63 = vpop.eup %4205 }
0x16c0   :  { %v2001_v0 = vmul.f32 %v4206_v63, %v4597_v17  ;;  %v4208_v39 = vpop.eup %4207  ;;  %v6648_v63 = vld [vmem:[#allocation29_spill] sm:$0xff] }
0x16c1   :  { %v4210_v25 = vpop.eup %4209  ;;  %v1619_v37 = vmul.f32 %v4208_v39, %v4597_v17 }
0x16c2   :  { %v2003_v30 = vadd.f32 %v2001_v0, %v4602_v31  ;;  %v4212_v50 = vpop.eup %4211  ;;  %v2004_v36 = vmul.f32 %v4210_v25, %v5597_v53  ;;  %v6636_v53 = vld [vmem:[#allocation15_spill] sm:$0xff]  ;;  %v6649_v0 = vld [vmem:[#allocation13_spill] sm:$0xff] }
0x16c3   :  { %v1851_v40 = vmul.f32 %v4212_v50, %v5791_v42  ;;  %v5797_v56 = vadd.f32 %v1619_v37, %v4602_v31  ;;  %v5800_v8 = vpop.eup %4213 }
0x16c4   :  { %v2005_v24 = vmul.f32 %v4210_v25, %v2003_v30 }
0x16c5   :  { %v1623_v34 = vmul.f32 %v5800_v8, %v5797_v56 }
0x16c6   :  { %2007 = vrot.lane.b32.xlu0 %v2005_v24, %s4482_s7 }
0x16ca   :  { %1853 = vrot.lane.b32.xlu0 %v1851_v40, %s4482_s7 }
0x16ce   :  { %1625 = vrot.lane.b32.xlu0 %v1623_v34, %s4482_s7 }
0x1738   :  { %v2008_v19 = vpop.permute.xlu0 %2007 }
0x1739   :  { %v5806_v18 = vadd.f32 %v2008_v19, %v2004_v36 }
0x173b   :  { %4215 = vtanh.f32 %v5806_v18 }
0x1745   :  { %v4216_v47 = vpop.eup %4215 }
0x1746   :  { %v2012_v59 = vmul.f32 %v4216_v47, %v2003_v30 }
0x1748   :  { %2014 = vrot.lane.b32.xlu1 %v2012_v59, %s4482_s7 }
0x17ba   :  { %v2015_v10 = vpop.permute.xlu1 %2014 }
0x17bb   :  { %v2017_v21 = vsel %vm139_vm1, %v2015_v10, %v5729_v13  ;;  %v6642_v13 = vld [vmem:[#allocation23_spill] sm:$0xff] }
0x17bc   :  { %v2018_v51 = vpack.c.bf16 %v2017_v21, %v2017_v21  ;;  %v1854_v21 = vpop.permute.xlu0 %1853 }
0x17be   :  { %2052 = vmatmul.mubr.bf16.vlgmr.msra.gmra.mrb[52].mxu0 %v2018_v51  ;;  %v1850_v51 = vmul.f32 %v4212_v50, %v5703_v33  ;;  %v2238_v33 = vpack.c.bf16 %v2012_v59, %v2012_v59 }
0x17bf   :  { %2168 = vmatpush1.bf16.msra.mxu0 %v5609_v35  ;;  %2199 = vmatprep.mubr.bf16.mxu0 %v6578_v22 }
0x17c0   :  { %2169 = vmatprep.subr.bf16.mxu0 %v5616_v6  ;;  %v1626_v50 = vpop.permute.xlu0 %1625 }
0x17c3   :  { %2170 = vmatpush1.bf16.msra.mxu0 %v6636_v53 }
0x17c4   :  { %2171 = vmatprep.subr.bf16.mxu0 %v6637_v62 }
0x17c7   :  { %2172 = vmatpush1.bf16.msra.mxu0 %v6638_v49 }
0x17c8   :  { %2173 = vmatprep.subr.bf16.mxu0 %v6639_v4 }
0x17cb   :  { %2174 = vmatpush1.bf16.msra.mxu0 %v6640_v20 }
0x17cc   :  { %2175 = vmatprep.subr.bf16.mxu0 %v6641_v54 }
0x17cf   :  { %2176 = vmatpush1.bf16.msra.mxu0 %v6642_v13 }
0x17d0   :  { %2177 = vmatprep.subr.bf16.mxu0 %v6643_v44 }
0x17d3   :  { %2178 = vmatpush1.bf16.msra.mxu0 %v6644_v46 }
0x17d4   :  { %2179 = vmatprep.subr.bf16.mxu0 %v6645_v9 }
0x17d7   :  { %2180 = vmatpush1.bf16.msra.mxu0 %v6646_v41 }
0x17d8   :  { %2181 = vmatprep.subr.bf16.mxu0 %v6647_v7 }
0x17db   :  { %2182 = vmatpush1.bf16.msra.mxu0 %v6648_v63 }
0x17dc   :  { %2395 = vmatprep.subr.bf16.mxu0 %v6649_v0 }
0x1891   :  { %v2053_v38 = vpop.f32.mrb[52].mxu0 }
0x1892   :  { %v2054_v39 = vadd.f32 %v2053_v38, %v4726_v11  ;;  %v2055_v30 = vpop.f32.mrb[53].mxu0  ;;  %v5833_v38 = vadd.f32 %v1854_v21, %v1850_v51 }
0x1893   :  { %v2056_v25 = vadd.f32 %v2055_v30, %v4729_v12  ;;  %v2057_v24 = vpop.f32.mrb[54].mxu0 }
0x1894   :  { %v3664_v37 = vmul.f32 -1.442695, %v2054_v39  ;;  %v2058_v40 = vpop.f32.mrb[55].mxu0 }
0x1895   :  { %v2061_v34 = vmul.f32 %v2056_v25, %v4597_v17 }
0x1896   :  { %4217 = vpow2.f32 %v3664_v37 }
0x1897   :  { %v3665_v36 = vmul.f32 -1.442695, %v2061_v34 }
0x1899   :  { %4219 = vpow2.f32 %v3665_v36  ;;  %v1622_v36 = vmul.f32 %v5800_v8, %v5716_v2  ;;  %v5952_v8 = vld [vmem:[%s6475_s2 + $0x24] ss:$8 sps:$4 sm:$0xff]  }
0x18a0   :  { %v4218_v19 = vpop.eup %4217 }
0x18a1   :  { %v2068_v0 = vadd.f32 1.0, %v4218_v19  ;;  %v5844_v19 = vadd.f32 %v1626_v50, %v1622_v36  ;;  %v6000_v50 = vld [vmem:[%s6475_s2 + $0x64] ss:$8 sps:$4 sm:$0xff]   ;;  %v6006_v36 = vld [vmem:[%s6475_s2 + $0x60] ss:$8 sps:$4 sm:$0xff]  }
0x18a2   :  { %6653 = vst [vmem:[#allocation8_spill] sm:$0xff] %v6000_v50  ;;  %6654 = vst [vmem:[#allocation12_spill] sm:$0xff] %v6006_v36 }
0x18a3   :  { %v4220_v47 = vpop.eup %4219 }
0x18a4   :  { %v2069_v10 = vadd.f32 1.0, %v4220_v47 }
0x18a6   :  { %4221 = vrcp.f32 %v2069_v10 }
0x18a7   :  { %4223 = vrcp.f32 %v2068_v0 }
0x18a8   :  { %4225 = vtanh.f32 %v5833_v38 }
0x18a9   :  { %4227 = vtanh.f32 %v5844_v19 }
0x18b0   :  { %v4222_v39 = vpop.eup %4221 }
0x18b1   :  { %v2075_v30 = vmul.f32 %v4222_v39, %v4597_v17  ;;  %v4224_v24 = vpop.eup %4223 }
0x18b2   :  { %v4226_v40 = vpop.eup %4225  ;;  %v2078_v47 = vmul.f32 %v4224_v24, %v5720_v52 }
0x18b3   :  { %v2077_v25 = vadd.f32 %v2075_v30, %v4602_v31  ;;  %v1858_v34 = vmul.f32 %v4226_v40, %v5791_v42  ;;  %v4228_v10 = vpop.eup %4227  ;;  %v5958_v30 = vld [vmem:[%s6475_s2 + $0x20] ss:$8 sps:$4 sm:$0xff]  }
0x18b4   :  { %v1630_v42 = vmul.f32 %v4228_v10, %v5797_v56  ;;  %v5946_v56 = vld [vmem:[%s6475_s2 + $0x10] ss:$8 sps:$4 sm:$0xff]   ;;  %v5982_v40 = vld [vmem:[%s6475_s2 + $0x40] ss:$8 sps:$4 sm:$0xff]  }
0x18b5   :  { %v2079_v37 = vmul.f32 %v4224_v24, %v2077_v25  ;;  %v5970_v24 = vld [vmem:[%s6475_s2 + $0x30] ss:$8 sps:$4 sm:$0xff]   ;;  %6650 = vst [vmem:[#allocation5_spill] sm:$0xff] %v5982_v40 }
0x18b6   :  { %v6018_v10 = vld [vmem:[%s6475_s2 + $0x70] ss:$8 sps:$4 sm:$0xff]  }
0x18b7   :  { %2081 = vrot.lane.b32.xlu1 %v2079_v37, %s4482_s7  ;;  %v5976_v37 = vld [vmem:[%s6475_s2 + $0x44] ss:$8 sps:$4 sm:$0xff]   ;;  %6656 = vst [vmem:[#allocation9_spill] sm:$0xff] %v6018_v10 }
0x18bb   :  { %1860 = vrot.lane.b32.xlu1 %v1858_v34, %s4482_s7 }
0x18bf   :  { %2240 = vrot.lane.b32.xlu1 %v2238_v33, %s4482_s7  ;;  %v5994_v33 = vld [vmem:[%s6475_s2 + $0x50] ss:$8 sps:$4 sm:$0xff]  }
0x18c0   :  { %6652 = vst [vmem:[#allocation7_spill] sm:$0xff] %v5994_v33 }
0x1929   :  { %v2082_v21 = vpop.permute.xlu1 %2081 }
0x192a   :  { %v5848_v51 = vadd.f32 %v2082_v21, %v2078_v47  ;;  %v6012_v47 = vld [vmem:[%s6475_s2 + $0x74] ss:$8 sps:$4 sm:$0xff]  }
0x192b   :  { %6655 = vst [vmem:[#allocation11_spill] sm:$0xff] %v6012_v47 }
0x192c   :  { %4229 = vtanh.f32 %v5848_v51 }
0x192d   :  { %v1861_v59 = vpop.permute.xlu1 %1860 }
0x192e   :  { %v1863_v0 = vsel %vm139_vm1, %v1861_v59, %v1630_v42 }
0x192f   :  { %v1864_v39 = vpack.c.bf16 %v1863_v0, %v1863_v0 }
0x1931   :  { %1898 = vmatmul.mubr.bf16.vlgmr.msra.gmra.mrb[28].mxu1 %v1864_v39 }
0x1932   :  { %2094 = vmatpush1.bf16.msra.mxu1 %v5436_v5  ;;  %2125 = vmatprep.mubr.bf16.mxu1 %v6578_v22  ;;  %v5876_v5 = vld [vmem:[%s6474_s1 + $0x4] ss:$8 sps:$4 sm:$0xff]  }
0x1933   :  { %2095 = vmatprep.subr.bf16.mxu1 %v5443_v55 }
0x1936   :  { %v4230_v2 = vpop.eup %4229  ;;  %2096 = vmatpush1.bf16.msra.mxu1 %v5449_v45 }
0x1937   :  { %v5857_v52 = vmul.f32 %v4230_v2, %v2077_v25  ;;  %2097 = vmatprep.subr.bf16.mxu1 %v5457_v27  ;;  %v5964_v25 = vld [vmem:[%s6475_s2 + $0x34] ss:$8 sps:$4 sm:$0xff]  }
0x1939   :  { %2088 = vrot.lane.b32.xlu0 %v5857_v52, %s4482_s7 }
0x193a   :  { %2098 = vmatpush1.bf16.msra.mxu1 %v5465_v26  ;;  %v5883_v26 = vld [vmem:[%s6474_s1] ss:$8 sps:$4 sm:$0xff]  }
0x193b   :  { %2099 = vmatprep.subr.bf16.mxu1 %v5471_v28  ;;  %v5890_v28 = vld [vmem:[%s6474_s1 + $0x14] ss:$8 sps:$4 sm:$0xff]  }
0x193e   :  { %2100 = vmatpush1.bf16.msra.mxu1 %v5477_v32  ;;  %v5896_v32 = vld [vmem:[%s6474_s1 + $0x10] ss:$8 sps:$4 sm:$0xff]  }
0x193f   :  { %2101 = vmatprep.subr.bf16.mxu1 %v5483_v16  ;;  %v5902_v16 = vld [vmem:[%s6474_s1 + $0x24] ss:$8 sps:$4 sm:$0xff]  }
0x1942   :  { %2102 = vmatpush1.bf16.msra.mxu1 %v5489_v3  ;;  %v5908_v3 = vld [vmem:[%s6474_s1 + $0x20] ss:$8 sps:$4 sm:$0xff]  }
0x1943   :  { %2103 = vmatprep.subr.bf16.mxu1 %v5495_v1  ;;  %v5914_v1 = vld [vmem:[%s6474_s1 + $0x34] ss:$8 sps:$4 sm:$0xff]  }
0x1946   :  { %2104 = vmatpush1.bf16.msra.mxu1 %v5501_v23  ;;  %v5920_v23 = vld [vmem:[%s6474_s1 + $0x30] ss:$8 sps:$4 sm:$0xff]  }
0x1947   :  { %2105 = vmatprep.subr.bf16.mxu1 %v5507_v57  ;;  %v5926_v57 = vld [vmem:[%s6475_s2 + $0x4] ss:$8 sps:$4 sm:$0xff]  }
0x194a   :  { %2106 = vmatpush1.bf16.msra.mxu1 %v5513_v58  ;;  %v2241_v58 = vpop.permute.xlu1 %2240 }
0x194b   :  { %2107 = vmatprep.subr.bf16.mxu1 %v5519_v60  ;;  %v5933_v60 = vld [vmem:[%s6475_s2] ss:$8 sps:$4 sm:$0xff]  }
0x194e   :  { %2108 = vmatpush1.bf16.msra.mxu1 %v5525_v61  ;;  %v5940_v61 = vld [vmem:[%s6475_s2 + $0x14] ss:$8 sps:$4 sm:$0xff]  }
0x194f   :  { %2245 = vmatprep.subr.bf16.mxu1 %v5876_v5 }
0x19ab   :  { %v2089_v55 = vpop.permute.xlu0 %2088 }
0x19ac   :  { %v2091_v45 = vsel %vm139_vm1, %v2089_v55, %v1858_v34  ;;  %v5988_v34 = vld [vmem:[%s6475_s2 + $0x54] ss:$8 sps:$4 sm:$0xff]  }
0x19ad   :  { %v2092_v27 = vpack.c.bf16 %v2091_v45, %v2091_v45  ;;  %6651 = vst [vmem:[#allocation6_spill] sm:$0xff] %v5988_v34 }
0x19af   :  { %2126 = vmatmul.mubr.bf16.vlgmr.msra.gmra.mrb[32].mxu1 %v2092_v27 }
0x19b0   :  { %2246 = vmatpush1.bf16.msra.mxu1 %v5883_v26  ;;  %2277 = vmatprep.mubr.bf16.mxu1 %v6578_v22 }
0x19b1   :  { %2247 = vmatprep.subr.bf16.mxu1 %v5890_v28 }
0x19b4   :  { %2248 = vmatpush1.bf16.msra.mxu1 %v5896_v32 }
0x19b5   :  { %2249 = vmatprep.subr.bf16.mxu1 %v5902_v16 }
0x19b8   :  { %2250 = vmatpush1.bf16.msra.mxu1 %v5908_v3 }
0x19b9   :  { %2251 = vmatprep.subr.bf16.mxu1 %v5914_v1 }
0x19bc   :  { %2252 = vmatpush1.bf16.msra.mxu1 %v5920_v23 }
0x19bd   :  { %2321 = vmatprep.subr.bf16.mxu1 %v5926_v57 }
0x19bf   :  { %3672 = vmatmul.mubr.msk.bf16.vlgmr.msra.gmra.mrb[36].mxu1 %vm139_vm1, %v2241_v58 }
0x19c0   :  { %2322 = vmatpush1.bf16.msra.mxu1 %v5933_v60  ;;  %2353 = vmatprep.mubr.bf16.mxu1 %v6578_v22 }
0x19c1   :  { %2323 = vmatprep.subr.bf16.mxu1 %v5940_v61 }
0x19c4   :  { %2324 = vmatpush1.bf16.msra.mxu1 %v5946_v56 }
0x19c5   :  { %2325 = vmatprep.subr.bf16.mxu1 %v5952_v8 }
0x19c8   :  { %2326 = vmatpush1.bf16.msra.mxu1 %v5958_v30 }
0x19c9   :  { %2327 = vmatprep.subr.bf16.mxu1 %v5964_v25 }
0x19cc   :  { %2328 = vmatpush1.bf16.msra.mxu1 %v5970_v24 }
0x19cd   :  { %2329 = vmatprep.subr.bf16.mxu1 %v5976_v37 }
0x19d0   :  { %2330 = vmatpush1.bf16.msra.mxu1 %v5982_v40 }
0x19d1   :  { %2331 = vmatprep.subr.bf16.mxu1 %v5988_v34 }
0x19d4   :  { %2332 = vmatpush1.bf16.msra.mxu1 %v5994_v33 }
0x19d5   :  { %2333 = vmatprep.subr.bf16.mxu1 %v6000_v50 }
0x19d8   :  { %2334 = vmatpush1.bf16.msra.mxu1 %v6006_v36 }
0x19d9   :  { %2335 = vmatprep.subr.bf16.mxu1 %v6012_v47 }
0x19dc   :  { %2336 = vmatpush1.bf16.msra.mxu1 %v6018_v10 }
0x19dd   :  { %2469 = vmatprep.subr.bf16.mxu1 %v6633_v15  ;;  %v3670_v15 = vld [vmem:[%s6473_s0 + $0x60] sm:$0xff] }
0x1a04   :  { %v1899_v21 = vpop.f32.mrb[28].mxu1 }
0x1a05   :  { %v1901_v42 = vpop.f32.mrb[29].mxu1  ;;  %v1900_v33 = vadd.f32 %v1899_v21, %v5060_v29 }
0x1a06   :  { %v1903_v59 = vpop.f32.mrb[30].mxu1  ;;  %v1902_v58 = vadd.f32 %v1901_v42, %v6635_v48 }
0x1a07   :  { %v1904_v0 = vpop.f32.mrb[31].mxu1  ;;  %v3671_v59 = vld [vmem:[%s6473_s0 + $0x68] sm:$0xff] }
0x1a08   :  { %v1907_v36 = vmul.f32 %v1902_v58, %v4597_v17 }
0x1a0a   :  { %v3658_v10 = vmul.f32 -1.442695, %v1907_v36 }
0x1a82   :  { %v2127_v39 = vpop.f32.mrb[32].mxu1 }
0x1a83   :  { %v2129_v2 = vpop.f32.mrb[33].mxu1  ;;  %v2128_v58 = vadd.f32 %v2127_v39, %v6585_v43 }
0x1a84   :  { %v2131_v55 = vpop.f32.mrb[34].mxu1  ;;  %v2130_v27 = vadd.f32 %v2129_v2, %v6634_v14 }
0x1a85   :  { %v2132_v45 = vpop.f32.mrb[35].mxu1  ;;  %v3666_v34 = vmul.f32 -1.442695, %v2128_v58 }
0x1a86   :  { %v2135_v47 = vmul.f32 %v2130_v27, %v4597_v17 }
0x1a88   :  { %v3667_v50 = vmul.f32 -1.442695, %v2135_v47 }
0x1a8a   :  { %4231 = vpow2.f32 %v3667_v50 }
0x1a8b   :  { %4233 = vpow2.f32 %v3658_v10 }
0x1a92   :  { %v2279_v0 = vpop.f32.mrb[36].mxu1 }
0x1a93   :  { %v2286_v55 = vadd.f32 %v3670_v15, %v2279_v0  ;;  %v2281_v45 = vpop.f32.mrb[37].mxu1  ;;  %v3657_v15 = vmul.f32 -1.442695, %v1900_v33 }
0x1a94   :  { %v2287_v2 = vadd.f32 %v3671_v59, %v2281_v45  ;;  %v2283_v42 = vpop.f32.mrb[38].mxu1  ;;  %v4232_v40 = vpop.eup %4231 }
0x1a95   :  { %v3673_v48 = vmul.f32 -1.442695, %v2286_v55  ;;  %v2284_v27 = vpop.f32.mrb[39].mxu1  ;;  %v2143_v36 = vadd.f32 1.0, %v4232_v40  ;;  %v4234_v50 = vpop.eup %4233 }
0x1a96   :  { %v2289_v47 = vmul.f32 %v2287_v2, %v4597_v17  ;;  %v1915_v55 = vadd.f32 1.0, %v4234_v50 }
0x1a97   :  { %4235 = vpow2.f32 %v3673_v48 }
0x1a98   :  { %v3674_v14 = vmul.f32 -1.442695, %v2289_v47 }
0x1a9a   :  { %4237 = vpow2.f32 %v3674_v14 }
0x1a9b   :  { %4239 = vpow2.f32 %v3666_v34 }
0x1a9c   :  { %4241 = vpow2.f32 %v3657_v15 }
0x1a9d   :  { %4243 = vrcp.f32 %v2143_v36 }
0x1aa1   :  { %v4236_v59 = vpop.eup %4235 }
0x1aa2   :  { %v2296_v45 = vadd.f32 1.0, %v4236_v59 }
0x1aa4   :  { %v4238_v0 = vpop.eup %4237 }
0x1aa5   :  { %v2297_v39 = vadd.f32 1.0, %v4238_v0  ;;  %v4240_v10 = vpop.eup %4239 }
0x1aa6   :  { %v2142_v48 = vadd.f32 1.0, %v4240_v10  ;;  %v4242_v21 = vpop.eup %4241 }
0x1aa7   :  { %4245 = vrcp.f32 %v2297_v39  ;;  %v4244_v2 = vpop.eup %4243  ;;  %v1914_v14 = vadd.f32 1.0, %v4242_v21 }
0x1aa8   :  { %4247 = vrcp.f32 %v1915_v55  ;;  %v2149_v34 = vmul.f32 %v4244_v2, %v4597_v17 }
0x1aa9   :  { %4249 = vrcp.f32 %v2296_v45 }
0x1aaa   :  { %4251 = vrcp.f32 %v2142_v48  ;;  %v6039_v15 = vadd.f32 %v2149_v34, %v4602_v31 }
0x1aab   :  { %4253 = vrcp.f32 %v1914_v14 }
0x1ab1   :  { %v4246_v33 = vpop.eup %4245 }
0x1ab2   :  { %v2303_v40 = vmul.f32 %v4246_v33, %v4597_v17  ;;  %v4248_v42 = vpop.eup %4247 }
0x1ab3   :  { %v4250_v58 = vpop.eup %4249  ;;  %v1921_v36 = vmul.f32 %v4248_v42, %v4597_v17 }
0x1ab4   :  { %v2305_v27 = vadd.f32 %v2303_v40, %v4602_v31  ;;  %v4252_v50 = vpop.eup %4251  ;;  %v2306_v45 = vmul.f32 %v4250_v58, %v5806_v18 }
0x1ab5   :  { %v2153_v59 = vmul.f32 %v4252_v50, %v6039_v15  ;;  %v6045_v0 = vadd.f32 %v1921_v36, %v4602_v31  ;;  %v6048_v55 = vpop.eup %4253 }
0x1ab6   :  { %v2307_v47 = vmul.f32 %v4250_v58, %v2305_v27 }
0x1ab7   :  { %v1925_v39 = vmul.f32 %v6048_v55, %v6045_v0 }
0x1ab8   :  { %2309 = vrot.lane.b32.xlu0 %v2307_v47, %s4482_s7 }
0x1abc   :  { %2155 = vrot.lane.b32.xlu0 %v2153_v59, %s4482_s7 }
0x1ac0   :  { %1927 = vrot.lane.b32.xlu0 %v1925_v39, %s4482_s7  ;;  %v1924_v39 = vmul.f32 %v6048_v55, %v5844_v19  ;;  %v6106_v19 = vld [vmem:[%s6475_s2 + $0x80] ss:$8 sps:$4 sm:$0xff]   ;;  %v6119_v55 = vld [vmem:[%s6475_s2 + $0x90] ss:$8 sps:$4 sm:$0xff]  }
0x1b2a   :  { %v2310_v10 = vpop.permute.xlu0 %2309 }
0x1b2b   :  { %v6054_v48 = vadd.f32 %v2310_v10, %v2306_v45 }
0x1b2d   :  { %4255 = vtanh.f32 %v6054_v48 }
0x1b37   :  { %v4256_v21 = vpop.eup %4255 }
0x1b38   :  { %v2314_v2 = vmul.f32 %v4256_v21, %v2305_v27 }
0x1b3a   :  { %2316 = vrot.lane.b32.xlu1 %v2314_v2, %s4482_s7 }
0x1bac   :  { %v2317_v14 = vpop.permute.xlu1 %2316 }
0x1bad   :  { %v2319_v33 = vsel %vm139_vm1, %v2317_v14, %v5857_v52 }
0x1bae   :  { %v2320_v40 = vpack.c.bf16 %v2319_v33, %v2319_v33 }
0x1bb0   :  { %2354 = vmatmul.mubr.bf16.vlgmr.msra.gmra.mrb[40].mxu1 %v2320_v40 }
0x1bb1   :  { %2470 = vmatpush1.bf16.msra.mxu1 %v5609_v35  ;;  %2501 = vmatprep.mubr.bf16.mxu1 %v6578_v22  ;;  %v4425_v35 = vld [vmem:[%s6475_s2 + $0x84] ss:$8 sps:$4 sm:$0xff]  }
0x1bb2   :  { %2471 = vmatprep.subr.bf16.mxu1 %v5616_v6 }
0x1bb5   :  { %2472 = vmatpush1.bf16.msra.mxu1 %v6636_v53 }
0x1bb6   :  { %2473 = vmatprep.subr.bf16.mxu1 %v6637_v62 }
0x1bb9   :  { %2474 = vmatpush1.bf16.msra.mxu1 %v6638_v49 }
0x1bba   :  { %2475 = vmatprep.subr.bf16.mxu1 %v6639_v4 }
0x1bbd   :  { %2476 = vmatpush1.bf16.msra.mxu1 %v6640_v20 }
0x1bbe   :  { %2477 = vmatprep.subr.bf16.mxu1 %v6641_v54 }
0x1bc1   :  { %2478 = vmatpush1.bf16.msra.mxu1 %v6642_v13 }
0x1bc2   :  { %2479 = vmatprep.subr.bf16.mxu1 %v6643_v44 }
0x1bc5   :  { %2480 = vmatpush1.bf16.msra.mxu1 %v6644_v46 }
0x1bc6   :  { %2481 = vmatprep.subr.bf16.mxu1 %v6645_v9 }
0x1bc9   :  { %2482 = vmatpush1.bf16.msra.mxu1 %v6646_v41  ;;  %v2156_v41 = vpop.permute.xlu0 %2155 }
0x1bca   :  { %2483 = vmatprep.subr.bf16.mxu1 %v6647_v7  ;;  %v2152_v7 = vmul.f32 %v4252_v50, %v5833_v38  ;;  %v2540_v38 = vpack.c.bf16 %v2314_v2, %v2314_v2 }
0x1bcc   :  { %v6083_v52 = vadd.f32 %v2156_v41, %v2152_v7  ;;  %v6195_v41 = vld [vmem:[%s6475_s2 + $0xf0] ss:$8 sps:$4 sm:$0xff]  }
0x1bcd   :  { %2484 = vmatpush1.bf16.msra.mxu1 %v6648_v63  ;;  %v1928_v50 = vpop.permute.xlu0 %1927 }
0x1bce   :  { %2697 = vmatprep.subr.bf16.mxu1 %v4425_v35  ;;  %v6094_v45 = vadd.f32 %v1928_v50, %v1924_v39  ;;  %v3681_v50 = vld [vmem:[%s6473_s0 + $0x70] sm:$0xff]  ;;  %v3682_v39 = vld [vmem:[%s6473_s0 + $0x78] sm:$0xff] }
0x1c83   :  { %v2355_v6 = vpop.f32.mrb[40].mxu1 }
0x1c84   :  { %v2356_v18 = vadd.f32 %v2355_v6, %v4726_v11  ;;  %v2357_v53 = vpop.f32.mrb[41].mxu1 }
0x1c85   :  { %v2358_v62 = vadd.f32 %v2357_v53, %v4729_v12  ;;  %v2359_v49 = vpop.f32.mrb[42].mxu1  ;;  %v6135_v53 = vld [vmem:[%s6475_s2 + $0xa0] ss:$8 sps:$4 sm:$0xff]  }
0x1c86   :  { %v3675_v4 = vmul.f32 -1.442695, %v2356_v18  ;;  %v2360_v20 = vpop.f32.mrb[43].mxu1  ;;  %v6127_v18 = vld [vmem:[%s6475_s2 + $0xa4] ss:$8 sps:$4 sm:$0xff]  }
0x1c87   :  { %v2363_v54 = vmul.f32 %v2358_v62, %v4597_v17  ;;  %v6141_v62 = vld [vmem:[%s6475_s2 + $0xb4] ss:$8 sps:$4 sm:$0xff]   ;;  %v6147_v49 = vld [vmem:[%s6475_s2 + $0xb0] ss:$8 sps:$4 sm:$0xff]   ;;  %v6159_v20 = vld [vmem:[%s6475_s2 + $0xc0] ss:$8 sps:$4 sm:$0xff]  }
0x1c88   :  { %4257 = vpow2.f32 %v3675_v4  ;;  %v6153_v4 = vld [vmem:[%s6475_s2 + $0xc4] ss:$8 sps:$4 sm:$0xff]  }
0x1c89   :  { %v3676_v13 = vmul.f32 -1.442695, %v2363_v54  ;;  %v6165_v54 = vld [vmem:[%s6475_s2 + $0xd4] ss:$8 sps:$4 sm:$0xff]  }
0x1c8b   :  { %4259 = vpow2.f32 %v3676_v13  ;;  %v6171_v13 = vld [vmem:[%s6475_s2 + $0xd0] ss:$8 sps:$4 sm:$0xff]  }
0x1c92   :  { %v4258_v44 = vpop.eup %4257 }
0x1c93   :  { %v2370_v63 = vadd.f32 1.0, %v4258_v44  ;;  %v6177_v44 = vld [vmem:[%s6475_s2 + $0xe4] ss:$8 sps:$4 sm:$0xff]  }
0x1c95   :  { %v4260_v46 = vpop.eup %4259 }
0x1c96   :  { %v2371_v9 = vadd.f32 1.0, %v4260_v46  ;;  %v6183_v46 = vld [vmem:[%s6475_s2 + $0xe0] ss:$8 sps:$4 sm:$0xff]  }
0x1c98   :  { %4261 = vrcp.f32 %v2371_v9  ;;  %v6189_v9 = vld [vmem:[%s6475_s2 + $0xf4] ss:$8 sps:$4 sm:$0xff]  }
0x1c99   :  { %4263 = vrcp.f32 %v2370_v63 }
0x1c9a   :  { %4265 = vtanh.f32 %v6083_v52 }
0x1c9b   :  { %4267 = vtanh.f32 %v6094_v45 }
0x1ca2   :  { %v4262_v34 = vpop.eup %4261 }
0x1ca3   :  { %v2377_v42 = vmul.f32 %v4262_v34, %v4597_v17  ;;  %v4264_v58 = vpop.eup %4263 }
0x1ca4   :  { %v4266_v36 = vpop.eup %4265  ;;  %v2380_v10 = vmul.f32 %v4264_v58, %v5848_v51  ;;  %v6113_v51 = vld [vmem:[%s6475_s2 + $0x94] ss:$8 sps:$4 sm:$0xff]  }
0x1ca5   :  { %v2379_v27 = vadd.f32 %v2377_v42, %v4602_v31  ;;  %v2160_v59 = vmul.f32 %v4266_v36, %v6039_v15  ;;  %v4268_v21 = vpop.eup %4267  ;;  %v6664_v42 = vld [vmem:[#allocation10_spill] sm:$0xff] }
0x1ca6   :  { %v1932_v15 = vmul.f32 %v4268_v21, %v6045_v0 }
0x1ca7   :  { %v2381_v47 = vmul.f32 %v4264_v58, %v2379_v27  ;;  %v6665_v58 = vld [vmem:[#allocation19_spill] sm:$0xff] }
0x1ca9   :  { %2383 = vrot.lane.b32.xlu1 %v2381_v47, %s4482_s7 }
0x1cad   :  { %2162 = vrot.lane.b32.xlu1 %v2160_v59, %s4482_s7 }
0x1cb1   :  { %2542 = vrot.lane.b32.xlu1 %v2540_v38, %s4482_s7 }
0x1d1b   :  { %v2384_v14 = vpop.permute.xlu1 %2383 }
0x1d1c   :  { %v6098_v33 = vadd.f32 %v2384_v14, %v2380_v10 }
0x1d1e   :  { %4269 = vtanh.f32 %v6098_v33 }
0x1d1f   :  { %v2163_v2 = vpop.permute.xlu1 %2162 }
0x1d20   :  { %v2165_v40 = vsel %vm139_vm1, %v2163_v2, %v1932_v15 }
0x1d21   :  { %v2166_v35 = vpack.c.bf16 %v2165_v40, %v2165_v40 }
0x1d23   :  { %2200 = vmatmul.mubr.bf16.vlgmr.msra.gmra.mrb[56].mxu0 %v2166_v35 }
0x1d24   :  { %2396 = vmatpush1.bf16.msra.mxu0 %v6106_v19  ;;  %2427 = vmatprep.mubr.bf16.mxu0 %v6578_v22 }
0x1d25   :  { %2397 = vmatprep.subr.bf16.mxu0 %v6113_v51 }
0x1d28   :  { %v4270_v0 = vpop.eup %4269  ;;  %2398 = vmatpush1.bf16.msra.mxu0 %v6119_v55 }
0x1d29   :  { %v6122_v6 = vmul.f32 %v4270_v0, %v2379_v27  ;;  %2399 = vmatprep.subr.bf16.mxu0 %v6127_v18 }
0x1d2b   :  { %2390 = vrot.lane.b32.xlu0 %v6122_v6, %s4482_s7 }
0x1d2c   :  { %2400 = vmatpush1.bf16.msra.mxu0 %v6135_v53 }
0x1d2d   :  { %2401 = vmatprep.subr.bf16.mxu0 %v6141_v62 }
0x1d30   :  { %2402 = vmatpush1.bf16.msra.mxu0 %v6147_v49 }
0x1d31   :  { %2403 = vmatprep.subr.bf16.mxu0 %v6153_v4 }
0x1d34   :  { %2404 = vmatpush1.bf16.msra.mxu0 %v6159_v20 }
0x1d35   :  { %2405 = vmatprep.subr.bf16.mxu0 %v6165_v54 }
0x1d38   :  { %2406 = vmatpush1.bf16.msra.mxu0 %v6171_v13 }
0x1d39   :  { %2407 = vmatprep.subr.bf16.mxu0 %v6177_v44 }
0x1d3c   :  { %2408 = vmatpush1.bf16.msra.mxu0 %v6183_v46 }
0x1d3d   :  { %2409 = vmatprep.subr.bf16.mxu0 %v6189_v9 }
0x1d40   :  { %2410 = vmatpush1.bf16.msra.mxu0 %v6195_v41 }
0x1d41   :  { %2547 = vmatprep.subr.bf16.mxu0 %v5876_v5  ;;  %v2543_v5 = vpop.permute.xlu1 %2542 }
0x1d9d   :  { %v2391_v7 = vpop.permute.xlu0 %2390 }
0x1d9e   :  { %v2393_v63 = vsel %vm139_vm1, %v2391_v7, %v2160_v59 }
0x1d9f   :  { %v2394_v34 = vpack.c.bf16 %v2393_v63, %v2393_v63 }
0x1da1   :  { %2428 = vmatmul.mubr.bf16.vlgmr.msra.gmra.mrb[60].mxu0 %v2394_v34 }
0x1da2   :  { %2548 = vmatpush1.bf16.msra.mxu0 %v5883_v26  ;;  %2579 = vmatprep.mubr.bf16.mxu0 %v6578_v22  ;;  %v6657_v26 = vld [vmem:[#allocation5_spill] sm:$0xff] }
0x1da3   :  { %2549 = vmatprep.subr.bf16.mxu0 %v5890_v28  ;;  %v6658_v28 = vld [vmem:[#allocation6_spill] sm:$0xff] }
0x1da6   :  { %2550 = vmatpush1.bf16.msra.mxu0 %v5896_v32  ;;  %v6659_v32 = vld [vmem:[#allocation7_spill] sm:$0xff] }
0x1da7   :  { %2551 = vmatprep.subr.bf16.mxu0 %v5902_v16  ;;  %v6660_v16 = vld [vmem:[#allocation8_spill] sm:$0xff] }
0x1daa   :  { %2552 = vmatpush1.bf16.msra.mxu0 %v5908_v3  ;;  %v6661_v3 = vld [vmem:[#allocation12_spill] sm:$0xff] }
0x1dab   :  { %2553 = vmatprep.subr.bf16.mxu0 %v5914_v1  ;;  %v6662_v1 = vld [vmem:[#allocation11_spill] sm:$0xff] }
0x1dae   :  { %2554 = vmatpush1.bf16.msra.mxu0 %v5920_v23  ;;  %v6663_v23 = vld [vmem:[#allocation9_spill] sm:$0xff] }
0x1daf   :  { %2623 = vmatprep.subr.bf16.mxu0 %v5926_v57  ;;  %v4441_v57 = vld [vmem:[%s6475_s2 + $0x104] ss:$8 sps:$4 sm:$0xff]  }
0x1db1   :  { %3683 = vmatmul.mubr.msk.bf16.vlgmr.msra.gmra.mrb[64].mxu0 %vm139_vm1, %v2543_v5 }
0x1db2   :  { %2624 = vmatpush1.bf16.msra.mxu0 %v5933_v60  ;;  %2655 = vmatprep.mubr.bf16.mxu0 %v6578_v22 }
0x1db3   :  { %2625 = vmatprep.subr.bf16.mxu0 %v5940_v61 }
0x1db6   :  { %2626 = vmatpush1.bf16.msra.mxu0 %v5946_v56 }
0x1db7   :  { %2627 = vmatprep.subr.bf16.mxu0 %v5952_v8 }
0x1dba   :  { %2628 = vmatpush1.bf16.msra.mxu0 %v5958_v30 }
0x1dbb   :  { %2629 = vmatprep.subr.bf16.mxu0 %v5964_v25 }
0x1dbe   :  { %2630 = vmatpush1.bf16.msra.mxu0 %v5970_v24 }
0x1dbf   :  { %2631 = vmatprep.subr.bf16.mxu0 %v5976_v37 }
0x1dc2   :  { %2632 = vmatpush1.bf16.msra.mxu0 %v6657_v26 }
0x1dc3   :  { %2633 = vmatprep.subr.bf16.mxu0 %v6658_v28 }
0x1dc6   :  { %2634 = vmatpush1.bf16.msra.mxu0 %v6659_v32 }
0x1dc7   :  { %2635 = vmatprep.subr.bf16.mxu0 %v6660_v16 }
0x1dca   :  { %2636 = vmatpush1.bf16.msra.mxu0 %v6661_v3 }
0x1dcb   :  { %2637 = vmatprep.subr.bf16.mxu0 %v6662_v1 }
0x1dce   :  { %2638 = vmatpush1.bf16.msra.mxu0 %v6663_v23 }
0x1dcf   :  { %2771 = vmatprep.subr.bf16.mxu0 %v4441_v57 }
0x1df6   :  { %v2201_v60 = vpop.f32.mrb[56].mxu0 }
0x1df7   :  { %v2203_v61 = vpop.f32.mrb[57].mxu0  ;;  %v2202_v5 = vadd.f32 %v2201_v60, %v5060_v29 }
0x1df8   :  { %v2205_v56 = vpop.f32.mrb[58].mxu0  ;;  %v2204_v47 = vadd.f32 %v2203_v61, %v6665_v58 }
0x1df9   :  { %v2206_v8 = vpop.f32.mrb[59].mxu0  ;;  %v3668_v32 = vmul.f32 -1.442695, %v2202_v5 }
0x1dfa   :  { %v2209_v59 = vmul.f32 %v2204_v47, %v4597_v17 }
0x1dfc   :  { %v3669_v15 = vmul.f32 -1.442695, %v2209_v59 }
0x1e74   :  { %v2429_v30 = vpop.f32.mrb[60].mxu0 }
0x1e75   :  { %v2431_v25 = vpop.f32.mrb[61].mxu0  ;;  %v2430_v7 = vadd.f32 %v2429_v30, %v6585_v43 }
0x1e76   :  { %v2433_v24 = vpop.f32.mrb[62].mxu0  ;;  %v2432_v27 = vadd.f32 %v2431_v25, %v6664_v42 }
0x1e77   :  { %v2434_v37 = vpop.f32.mrb[63].mxu0  ;;  %v3677_v26 = vmul.f32 -1.442695, %v2430_v7 }
0x1e78   :  { %v2437_v36 = vmul.f32 %v2432_v27, %v4597_v17 }
0x1e7a   :  { %v3678_v38 = vmul.f32 -1.442695, %v2437_v36 }
0x1e7c   :  { %4271 = vpow2.f32 %v3678_v38 }
0x1e7d   :  { %4273 = vpow2.f32 %v3669_v15 }
0x1e84   :  { %v2581_v10 = vpop.f32.mrb[64].mxu0 }
0x1e85   :  { %v2588_v21 = vadd.f32 %v3681_v50, %v2581_v10  ;;  %v2583_v14 = vpop.f32.mrb[65].mxu0 }
0x1e86   :  { %v2589_v2 = vadd.f32 %v3682_v39, %v2583_v14  ;;  %v2585_v40 = vpop.f32.mrb[66].mxu0  ;;  %v4272_v28 = vpop.eup %4271 }
0x1e87   :  { %v3684_v35 = vmul.f32 -1.442695, %v2588_v21  ;;  %v2586_v0 = vpop.f32.mrb[67].mxu0  ;;  %v2445_v16 = vadd.f32 1.0, %v4272_v28  ;;  %v4274_v3 = vpop.eup %4273 }
0x1e88   :  { %v2591_v63 = vmul.f32 %v2589_v2, %v4597_v17  ;;  %v2217_v57 = vadd.f32 1.0, %v4274_v3  ;;  %v4446_v3 = vld [vmem:[%s6475_s2 + $0x120] ss:$8 sps:$4 sm:$0xff]  }
0x1e89   :  { %4275 = vpow2.f32 %v3684_v35 }
0x1e8a   :  { %v3685_v34 = vmul.f32 -1.442695, %v2591_v63 }
0x1e8c   :  { %4277 = vpow2.f32 %v3685_v34 }
0x1e8d   :  { %4279 = vpow2.f32 %v3677_v26 }
0x1e8e   :  { %4281 = vpow2.f32 %v3668_v32  ;;  %v4443_v32 = vld [vmem:[%s6475_s2 + $0x114] ss:$8 sps:$4 sm:$0xff]  }
0x1e8f   :  { %4283 = vrcp.f32 %v2445_v16  ;;  %v4444_v16 = vld [vmem:[%s6475_s2 + $0x110] ss:$8 sps:$4 sm:$0xff]  }
0x1e93   :  { %v4276_v1 = vpop.eup %4275 }
0x1e94   :  { %v2598_v56 = vadd.f32 1.0, %v4276_v1  ;;  %v4447_v1 = vld [vmem:[%s6475_s2 + $0x134] ss:$8 sps:$4 sm:$0xff]  }
0x1e96   :  { %v4278_v23 = vpop.eup %4277 }
0x1e97   :  { %v2599_v61 = vadd.f32 1.0, %v4278_v23  ;;  %v4280_v8 = vpop.eup %4279  ;;  %v4448_v23 = vld [vmem:[%s6475_s2 + $0x130] ss:$8 sps:$4 sm:$0xff]  }
0x1e98   :  { %v2444_v30 = vadd.f32 1.0, %v4280_v8  ;;  %v4282_v60 = vpop.eup %4281  ;;  %v4452_v8 = vld [vmem:[%s6475_s2 + $0x150] ss:$8 sps:$4 sm:$0xff]  }
0x1e99   :  { %4285 = vrcp.f32 %v2599_v61  ;;  %v4284_v25 = vpop.eup %4283  ;;  %v2216_v24 = vadd.f32 1.0, %v4282_v60  ;;  %v4450_v61 = vld [vmem:[%s6475_s2 + $0x140] ss:$8 sps:$4 sm:$0xff]  }
0x1e9a   :  { %4287 = vrcp.f32 %v2217_v57  ;;  %v2451_v47 = vmul.f32 %v4284_v25, %v4597_v17  ;;  %v4449_v57 = vld [vmem:[%s6475_s2 + $0x144] ss:$8 sps:$4 sm:$0xff]   ;;  %v4454_v60 = vld [vmem:[%s6475_s2 + $0x160] ss:$8 sps:$4 sm:$0xff]   ;;  %v4455_v25 = vld [vmem:[%s6475_s2 + $0x174] ss:$8 sps:$4 sm:$0xff]  }
0x1e9b   :  { %4289 = vrcp.f32 %v2598_v56  ;;  %v4451_v56 = vld [vmem:[%s6475_s2 + $0x154] ss:$8 sps:$4 sm:$0xff]  }
0x1e9c   :  { %4291 = vrcp.f32 %v2444_v30  ;;  %v6246_v39 = vadd.f32 %v2451_v47, %v4602_v31  ;;  %v4453_v30 = vld [vmem:[%s6475_s2 + $0x164] ss:$8 sps:$4 sm:$0xff]  }
0x1e9d   :  { %4293 = vrcp.f32 %v2216_v24  ;;  %v4456_v24 = vld [vmem:[%s6475_s2 + $0x170] ss:$8 sps:$4 sm:$0xff]  }
0x1ea3   :  { %v4286_v37 = vpop.eup %4285 }
0x1ea4   :  { %v2605_v27 = vmul.f32 %v4286_v37, %v4597_v17  ;;  %v4288_v36 = vpop.eup %4287 }
0x1ea5   :  { %v4290_v38 = vpop.eup %4289  ;;  %v2223_v10 = vmul.f32 %v4288_v36, %v4597_v17 }
0x1ea6   :  { %v2607_v59 = vadd.f32 %v2605_v27, %v4602_v31  ;;  %v6250_v21 = vpop.eup %4291  ;;  %v2608_v35 = vmul.f32 %v4290_v38, %v6054_v48  ;;  %v4442_v48 = vld [vmem:[%s6475_s2 + $0x100] ss:$8 sps:$4 sm:$0xff]  }
0x1ea7   :  { %v2455_v14 = vmul.f32 %v6250_v21, %v6246_v39  ;;  %v6255_v15 = vadd.f32 %v2223_v10, %v4602_v31  ;;  %v6258_v2 = vpop.eup %4293 }
0x1ea8   :  { %v2609_v50 = vmul.f32 %v4290_v38, %v2607_v59 }
0x1ea9   :  { %v2227_v40 = vmul.f32 %v6258_v2, %v6255_v15 }
0x1eaa   :  { %2611 = vrot.lane.b32.xlu0 %v2609_v50, %s4482_s7 }
0x1eae   :  { %2457 = vrot.lane.b32.xlu0 %v2455_v14, %s4482_s7 }
0x1eb2   :  { %2229 = vrot.lane.b32.xlu0 %v2227_v40, %s4482_s7 }
0x1f1c   :  { %v2612_v0 = vpop.permute.xlu0 %2611 }
0x1f1d   :  { %v6264_v7 = vadd.f32 %v2612_v0, %v2608_v35 }
0x1f1f   :  { %4295 = vtanh.f32 %v6264_v7 }
0x1f29   :  { %v4296_v63 = vpop.eup %4295 }
0x1f2a   :  { %v6267_v34 = vmul.f32 %v4296_v63, %v2607_v59  ;;  %v2458_v63 = vpop.permute.xlu0 %2457 }
0x1f2c   :  { %2618 = vrot.lane.b32.xlu1 %v6267_v34, %s4482_s7 }
0x1f9e   :  { %v2619_v5 = vpop.permute.xlu1 %2618 }
0x1f9f   :  { %v2621_v26 = vsel %vm139_vm1, %v2619_v5, %v6122_v6  ;;  %v4445_v6 = vld [vmem:[%s6475_s2 + $0x124] ss:$8 sps:$4 sm:$0xff]   ;;  %v2454_v5 = vmul.f32 %v6250_v21, %v6083_v52  ;;  %v2230_v52 = vpop.permute.xlu0 %2229  ;;  %v2226_v21 = vmul.f32 %v6258_v2, %v6094_v45 }
0x1fa0   :  { %v2622_v28 = vpack.c.bf16 %v2621_v26, %v2621_v26 }
0x1fa2   :  { %2656 = vmatmul.mubr.bf16.vlgmr.msra.gmra.mrb[68].mxu0 %v2622_v28 }
0x1fa3   :  { %2772 = vmatpush1.bf16.msra.mxu0 %v4442_v48  ;;  %2803 = vmatprep.mubr.bf16.mxu0 %v6578_v22 }
0x1fa4   :  { %2773 = vmatprep.subr.bf16.mxu0 %v4443_v32 }
0x1fa7   :  { %2774 = vmatpush1.bf16.msra.mxu0 %v4444_v16 }
0x1fa8   :  { %2775 = vmatprep.subr.bf16.mxu0 %v4445_v6 }
0x1fab   :  { %2776 = vmatpush1.bf16.msra.mxu0 %v4446_v3 }
0x1fac   :  { %2777 = vmatprep.subr.bf16.mxu0 %v4447_v1  ;;  %v6334_v1 = vadd.f32 %v2230_v52, %v2226_v21 }
0x1faf   :  { %2778 = vmatpush1.bf16.msra.mxu0 %v4448_v23 }
0x1fb0   :  { %2779 = vmatprep.subr.bf16.mxu0 %v4449_v57 }
0x1fb3   :  { %2780 = vmatpush1.bf16.msra.mxu0 %v4450_v61 }
0x1fb4   :  { %2781 = vmatprep.subr.bf16.mxu0 %v4451_v56 }
0x1fb7   :  { %2782 = vmatpush1.bf16.msra.mxu0 %v4452_v8 }
0x1fb8   :  { %2783 = vmatprep.subr.bf16.mxu0 %v4453_v30 }
0x1fbb   :  { %2784 = vmatpush1.bf16.msra.mxu0 %v4454_v60 }
0x1fbc   :  { %2785 = vmatprep.subr.bf16.mxu0 %v4455_v25  ;;  %v3991_v25 = vld [vmem:[#allocation2 + $0x10] sm:$0xff]  }
0x1fbf   :  { %2786 = vmatpush1.bf16.msra.mxu0 %v4456_v24 }
0x2075   :  { %v2657_v37 = vpop.f32.mrb[68].mxu0 }
0x2076   :  { %v2658_v27 = vadd.f32 %v2657_v37, %v4726_v11  ;;  %v2659_v47 = vpop.f32.mrb[69].mxu0  ;;  %v6324_v11 = vadd.f32 %v2458_v63, %v2454_v5  ;;  %v3992_v37 = vld [vmem:[#allocation2 + $0x18] sm:$0xff]  }
0x2077   :  { %v2660_v36 = vadd.f32 %v2659_v47, %v4729_v12  ;;  %v2661_v59 = vpop.f32.mrb[70].mxu0 }
0x2078   :  { %v3686_v38 = vmul.f32 -1.442695, %v2658_v27  ;;  %v2662_v50 = vpop.f32.mrb[71].mxu0 }
0x2079   :  { %v2665_v10 = vmul.f32 %v2660_v36, %v4597_v17  ;;  %v2846_v50 = vpack.c.bf16 %v6267_v34, %v6267_v34 }
0x207a   :  { %4297 = vpow2.f32 %v3686_v38 }
0x207b   :  { %v3687_v14 = vmul.f32 -1.442695, %v2665_v10 }
0x207d   :  { %4299 = vpow2.f32 %v3687_v14 }
0x2084   :  { %v4298_v40 = vpop.eup %4297 }
0x2085   :  { %v2672_v26 = vadd.f32 1.0, %v4298_v40 }
0x2087   :  { %v4300_v35 = vpop.eup %4299 }
0x2088   :  { %v2673_v0 = vadd.f32 1.0, %v4300_v35 }
0x208a   :  { %4301 = vrcp.f32 %v2673_v0 }
0x208b   :  { %4303 = vrcp.f32 %v2672_v26 }
0x208c   :  { %4305 = vtanh.f32 %v6324_v11 }
0x208d   :  { %4307 = vtanh.f32 %v6334_v1 }
0x2094   :  { %v4302_v12 = vpop.eup %4301 }
0x2095   :  { %v2679_v28 = vmul.f32 %v4302_v12, %v4597_v17  ;;  %v4304_v32 = vpop.eup %4303 }
0x2096   :  { %v4306_v6 = vpop.eup %4305  ;;  %v2682_v23 = vmul.f32 %v4304_v32, %v6098_v33 }
0x2097   :  { %v2681_v48 = vadd.f32 %v2679_v28, %v4602_v31  ;;  %v2462_v3 = vmul.f32 %v4306_v6, %v6246_v39  ;;  %v4308_v57 = vpop.eup %4307 }
0x2098   :  { %v2234_v39 = vmul.f32 %v4308_v57, %v6255_v15 }
0x2099   :  { %v2683_v16 = vmul.f32 %v4304_v32, %v2681_v48 }
0x209b   :  { %2685 = vrot.lane.b32.xlu1 %v2683_v16, %s4482_s7 }
0x209f   :  { %2464 = vrot.lane.b32.xlu1 %v2462_v3, %s4482_s7 }
0x210d   :  { %v2686_v61 = vpop.permute.xlu1 %2685 }
0x210e   :  { %v6338_v56 = vadd.f32 %v2686_v61, %v2682_v23  ;;  %v3993_v61 = vld [vmem:[#allocation2 + $0x20] sm:$0xff]  }
0x2110   :  { %4309 = vtanh.f32 %v6338_v56 }
0x2111   :  { %v2465_v8 = vpop.permute.xlu1 %2464 }
0x2112   :  { %v2467_v30 = vsel %vm139_vm1, %v2465_v8, %v2234_v39  ;;  %v3995_v39 = vld [vmem:[#allocation2 + $0x30] sm:$0xff]  }
0x2113   :  { %v2468_v60 = vpack.c.bf16 %v2467_v30, %v2467_v30 }
0x2115   :  { %2502 = vmatmul.mubr.bf16.vlgmr.msra.gmra.mrb[44].mxu1 %v2468_v60 }
0x2116   :  { %2698 = vmatpush1.bf16.msra.mxu1 %v6106_v19  ;;  %2729 = vmatprep.mubr.bf16.mxu1 %v6578_v22  ;;  %v6666_v22 = vmov 0.0  }
0x2117   :  { %2699 = vmatprep.subr.bf16.mxu1 %v6113_v51 }
0x211a   :  { %v4310_v45 = vpop.eup %4309  ;;  %2700 = vmatpush1.bf16.msra.mxu1 %v6119_v55 }
0x211b   :  { %v6347_v33 = vmul.f32 %v4310_v45, %v2681_v48  ;;  %2701 = vmatprep.subr.bf16.mxu1 %v6127_v18  ;;  %v3996_v45 = vld [vmem:[#allocation2 + $0x38] sm:$0xff]  }
0x211d   :  { %2692 = vrot.lane.b32.xlu0 %v6347_v33, %s4482_s7 }
0x211e   :  { %2702 = vmatpush1.bf16.msra.mxu1 %v6135_v53 }
0x211f   :  { %2703 = vmatprep.subr.bf16.mxu1 %v6141_v62 }
0x2122   :  { %2704 = vmatpush1.bf16.msra.mxu1 %v6147_v49 }
0x2123   :  { %2705 = vmatprep.subr.bf16.mxu1 %v6153_v4 }
0x2126   :  { %2706 = vmatpush1.bf16.msra.mxu1 %v6159_v20 }
0x2127   :  { %2707 = vmatprep.subr.bf16.mxu1 %v6165_v54 }
0x212a   :  { %2708 = vmatpush1.bf16.msra.mxu1 %v6171_v13 }
0x212b   :  { %2709 = vmatprep.subr.bf16.mxu1 %v6177_v44 }
0x212e   :  { %2710 = vmatpush1.bf16.msra.mxu1 %v6183_v46  ;;  %v3989_v46 = vld [vmem:[#allocation2] sm:$0xff]  }
0x212f   :  { %2711 = vmatprep.subr.bf16.mxu1 %v6189_v9 }
0x2132   :  { %2712 = vmatpush1.bf16.msra.mxu1 %v6195_v41  ;;  %v3990_v41 = vld [vmem:[#allocation2 + $0x8] sm:$0xff]  }
0x2133   :  { %3773 = vmatprep.subr.bf16.mxu1 %v6666_v22 }
0x218f   :  { %v2693_v19 = vpop.permute.xlu0 %2692 }
0x2190   :  { %v2695_v51 = vsel %vm139_vm1, %v2693_v19, %v2462_v3 }
0x2191   :  { %v2696_v55 = vpack.c.bf16 %v2695_v51, %v2695_v51 }
0x2193   :  { %2730 = vmatmul.mubr.bf16.vlgmr.msra.gmra.mrb[48].mxu1 %v2696_v55  ;;  %v2926_v55 = vpack.c.bf16 %v6264_v7, %v6264_v7 }
0x2194   :  { %3774 = vmatpush3.bf16.msra.mxu1 %v3989_v46  ;;  %3781 = vmatprep.mubr.msk.bf16.mxu1 %vm4487_vm3, %v6666_v22 }
0x2195   :  { %3775 = vmatprep.subr.bf16.mxu1 %v6666_v22 }
0x2198   :  { %3776 = vmatpush3.bf16.msra.mxu1 %v3990_v41  ;;  %v4002_v41 = vld [vmem:[#allocation2 + $0x68] sm:$0xff]  }
0x2199   :  { %3777 = vmatprep.subr.bf16.mxu1 %v6666_v22 }
0x219c   :  { %3778 = vmatpush3.bf16.msra.mxu1 %v3991_v25 }
0x219d   :  { %3779 = vmatprep.subr.bf16.mxu1 %v6666_v22 }
0x21a0   :  { %3780 = vmatpush3.bf16.msra.mxu1 %v3992_v37 }
0x21a1   :  { %3785 = vmatprep.subr.bf16.mxu1 %v6666_v22 }
0x21e8   :  { %v2503_v18 = vpop.f32.mrb[44].mxu1 }
0x21e9   :  { %v2504_v53 = vadd.f32 %v2503_v18, %v5060_v29  ;;  %v2505_v62 = vpop.f32.mrb[45].mxu1 }
0x21ea   :  { %v2506_v49 = vadd.f32 %v2505_v62, %v6665_v58  ;;  %v2507_v4 = vpop.f32.mrb[46].mxu1 }
0x21eb   :  { %v3679_v20 = vmul.f32 -1.442695, %v2504_v53  ;;  %v2508_v54 = vpop.f32.mrb[47].mxu1 }
0x21ec   :  { %v2511_v13 = vmul.f32 %v2506_v49, %v4597_v17  ;;  %v3997_v54 = vld [vmem:[#allocation2 + $0x40] sm:$0xff]  }
0x21ed   :  { %4311 = vpow2.f32 %v3679_v20 }
0x21ee   :  { %v3680_v44 = vmul.f32 -1.442695, %v2511_v13  ;;  %v3999_v13 = vld [vmem:[#allocation2 + $0x50] sm:$0xff]  }
0x21f0   :  { %4313 = vpow2.f32 %v3680_v44  ;;  %v4000_v44 = vld [vmem:[#allocation2 + $0x58] sm:$0xff]  }
0x21f7   :  { %v4312_v9 = vpop.eup %4311 }
0x21f8   :  { %v2518_v24 = vadd.f32 1.0, %v4312_v9  ;;  %v4001_v9 = vld [vmem:[#allocation2 + $0x60] sm:$0xff]  }
0x21fa   :  { %v4314_v15 = vpop.eup %4313 }
0x21fb   :  { %v2519_v2 = vadd.f32 1.0, %v4314_v15  ;;  %v4003_v15 = vld [vmem:[#allocation2 + $0x70] sm:$0xff]  }
0x21fd   :  { %4315 = vrcp.f32 %v2519_v2 }
0x21fe   :  { %4317 = vrcp.f32 %v2518_v24 }
0x2207   :  { %v4316_v27 = vpop.eup %4315 }
0x2208   :  { %v2525_v47 = vmul.f32 %v4316_v27, %v4597_v17  ;;  %v4318_v59 = vpop.eup %4317 }
0x2209   :  { %v2528_v16 = vmul.f32 %v4318_v59, %v6334_v1  ;;  %v3994_v1 = vld [vmem:[#allocation2 + $0x28] sm:$0xff]  }
0x220a   :  { %v2527_v36 = vadd.f32 %v2525_v47, %v4602_v31 }
0x220c   :  { %v2529_v38 = vmul.f32 %v4318_v59, %v2527_v36 }
0x220e   :  { %2531 = vrot.lane.b32.xlu0 %v2529_v38, %s4482_s7 }
0x2212   :  { %2856 = vrot.lane.b32.xlu0 %v2846_v50, %s4482_s7 }
0x2266   :  { %v2731_v10 = vpop.f32.mrb[48].mxu1 }
0x2267   :  { %v2732_v14 = vadd.f32 %v2731_v10, %v6585_v43  ;;  %v2733_v40 = vpop.f32.mrb[49].mxu1 }
0x2268   :  { %v2734_v35 = vadd.f32 %v2733_v40, %v6664_v42  ;;  %v2735_v0 = vpop.f32.mrb[50].mxu1 }
0x2269   :  { %v3688_v63 = vmul.f32 -1.442695, %v2732_v14  ;;  %v2736_v5 = vpop.f32.mrb[51].mxu1 }
0x226a   :  { %v2739_v26 = vmul.f32 %v2734_v35, %v4597_v17  ;;  %v4004_v35 = vld [vmem:[#allocation2 + $0x78] sm:$0xff]  }
0x226b   :  { %4319 = vpow2.f32 %v3688_v63 }
0x226c   :  { %v3689_v12 = vmul.f32 -1.442695, %v2739_v26  ;;  %v3088_v26 = vpack.c.bf16 %v6338_v56, %v6338_v56  ;;  %v4006_v56 = vld [vmem:[#allocation2 + $0x88] sm:$0xff]  }
0x226e   :  { %4321 = vpow2.f32 %v3689_v12 }
0x2275   :  { %v4320_v28 = vpop.eup %4319 }
0x2276   :  { %v2746_v34 = vadd.f32 1.0, %v4320_v28 }
0x2278   :  { %v4322_v48 = vpop.eup %4321 }
0x2279   :  { %v2747_v32 = vadd.f32 1.0, %v4322_v48 }
0x227b   :  { %4323 = vrcp.f32 %v2747_v32  ;;  %v4005_v32 = vld [vmem:[#allocation2 + $0x80] sm:$0xff]  }
0x227c   :  { %4325 = vrcp.f32 %v2746_v34 }
0x2280   :  { %v2532_v43 = vpop.permute.xlu0 %2531 }
0x2281   :  { %v6384_v6 = vadd.f32 %v2532_v43, %v2528_v16  ;;  %v4007_v16 = vld [vmem:[#allocation2 + $0x90] sm:$0xff]  }
0x2284   :  { %v2857_v42 = vpop.permute.xlu0 %2856 }
0x2285   :  { %v4324_v3 = vpop.eup %4323  ;;  %3782 = vmatmul.mubr.msk.bf16.vlgmr.msra.gmra.mrb[52].mxu1 %vm139_vm1, %v2857_v42 }
0x2286   :  { %v2753_v52 = vmul.f32 %v4324_v3, %v4597_v17  ;;  %3793 = vmatprep.mubr.msk.bf16.mxu1 %vm4487_vm3, %v6666_v22  ;;  %v4326_v23 = vpop.eup %4325  ;;  %3786 = vmatpush3.bf16.msra.mxu1 %v3993_v61  ;;  %v4012_v61 = vld [vmem:[#allocation2 + $0xb8] sm:$0xff]  }
0x2287   :  { %3787 = vmatprep.subr.bf16.mxu1 %v6666_v22  ;;  %v2756_v8 = vmul.f32 %v4326_v23, %v6324_v11  ;;  %v3007_v11 = vpack.c.bf16 %v6347_v33, %v6347_v33  ;;  %v3998_v33 = vld [vmem:[#allocation2 + $0x48] sm:$0xff]  }
0x2288   :  { %v2755_v21 = vadd.f32 %v2753_v52, %v4602_v31  ;;  %v4009_v52 = vld [vmem:[#allocation2 + $0xa0] sm:$0xff]  }
0x228a   :  { %v2757_v57 = vmul.f32 %v4326_v23, %v2755_v21  ;;  %3788 = vmatpush3.bf16.msra.mxu1 %v3994_v1  ;;  %v4010_v23 = vld [vmem:[#allocation2 + $0xa8] sm:$0xff]   ;;  %v4013_v1 = vld [vmem:[#allocation2 + $0xc0] sm:$0xff]  }
0x228b   :  { %3789 = vmatprep.subr.bf16.mxu1 %v6666_v22 }
0x228c   :  { %2759 = vrot.lane.b32.xlu1 %v2757_v57, %s4482_s7  ;;  %v4011_v57 = vld [vmem:[#allocation2 + $0xb0] sm:$0xff]  }
0x228e   :  { %3790 = vmatpush3.bf16.msra.mxu1 %v3995_v39 }
0x228f   :  { %3791 = vmatprep.subr.bf16.mxu1 %v6666_v22 }
0x2292   :  { %3792 = vmatpush3.bf16.msra.mxu1 %v3996_v45  ;;  %v4017_v45 = vld [vmem:[#allocation2 + $0xe0] sm:$0xff]  }
0x2293   :  { %3797 = vmatprep.subr.bf16.mxu1 %v6666_v22 }
0x22fe   :  { %v2760_v30 = vpop.permute.xlu1 %2759 }
0x22ff   :  { %v6396_v60 = vadd.f32 %v2760_v30, %v2756_v8  ;;  %v4014_v8 = vld [vmem:[#allocation2 + $0xc8] sm:$0xff]   ;;  %v4015_v30 = vld [vmem:[#allocation2 + $0xd0] sm:$0xff]  }
0x2301   :  { %4327 = vtanh.f32 %v6396_v60  ;;  %v3250_v12 = vpack.c.bf16 %v6396_v60, %v6396_v60  ;;  %v4016_v60 = vld [vmem:[#allocation2 + $0xd8] sm:$0xff]  }
0x2302   :  { %4329 = vtanh.f32 %v6384_v6 }
0x230b   :  { %v4328_v19 = vpop.eup %4327 }
0x230c   :  { %v2764_v51 = vmul.f32 %v4328_v19, %v2755_v21  ;;  %v4330_v53 = vpop.eup %4329 }
0x230d   :  { %v2536_v62 = vmul.f32 %v4330_v53, %v2527_v36  ;;  %v3692_v53 = vld [vmem:[%s6478_s5] ss:$0 sm:$0xff] }
0x230e   :  { %2766 = vrot.lane.b32.xlu1 %v2764_v51, %s4482_s7  ;;  %v3169_v18 = vpack.c.bf16 %v2764_v51, %v2764_v51  ;;  %v4018_v51 = vld [vmem:[#allocation2 + $0xe8] sm:$0xff]  }
0x2312   :  { %2937 = vrot.lane.b32.xlu1 %v2926_v55, %s4482_s7  ;;  %v4019_v55 = vld [vmem:[#allocation2 + $0xf0] sm:$0xff]  }
0x2316   :  { %3018 = vrot.lane.b32.xlu1 %v3007_v11, %s4482_s7  ;;  %v4020_v11 = vld [vmem:[#allocation2 + $0xf8] sm:$0xff]  }
0x231a   :  { %3180 = vrot.lane.b32.xlu1 %v3169_v18, %s4482_s7 }
0x2380   :  { %v2767_v49 = vpop.permute.xlu1 %2766 }
0x2381   :  { %v2769_v4 = vsel %vm139_vm1, %v2767_v49, %v2536_v62 }
0x2382   :  { %v2770_v20 = vpack.c.bf16 %v2769_v4, %v2769_v4 }
0x2384   :  { %v2938_v7 = vpop.permute.xlu1 %2937  ;;  %2804 = vmatmul.mubr.bf16.vlgmr.msra.gmra.mrb[72].mxu0 %v2770_v20 }
0x2385   :  { %3794 = vmatmul.mubr.msk.bf16.vlgmr.msra.gmra.mrb[52].mxu1 %vm139_vm1, %v2938_v7 }
0x2386   :  { %3798 = vmatpush3.bf16.msra.mxu1 %v3997_v54  ;;  %3805 = vmatprep.mubr.msk.bf16.mxu1 %vm4487_vm3, %v6666_v22 }
0x2387   :  { %3799 = vmatprep.subr.bf16.mxu1 %v6666_v22 }
0x2388   :  { %v3019_v46 = vpop.permute.xlu1 %3018 }
0x238a   :  { %3800 = vmatpush3.bf16.msra.mxu1 %v3998_v33 }
0x238b   :  { %3801 = vmatprep.subr.bf16.mxu1 %v6666_v22 }
0x238c   :  { %v3181_v21 = vpop.permute.xlu1 %3180 }
0x238e   :  { %3802 = vmatpush3.bf16.msra.mxu1 %v3999_v13 }
0x238f   :  { %3803 = vmatprep.subr.bf16.mxu1 %v6666_v22 }
0x2392   :  { %3804 = vmatpush3.bf16.msra.mxu1 %v4000_v44 }
0x2393   :  { %3809 = vmatprep.subr.bf16.mxu1 %v6666_v22 }
0x2395   :  { %3806 = vmatmul.mubr.msk.bf16.vlgmr.msra.gmra.mrb[52].mxu1 %vm139_vm1, %v3019_v46 }
0x2396   :  { %3817 = vmatprep.mubr.msk.bf16.mxu1 %vm4487_vm3, %v6666_v22  ;;  %3810 = vmatpush3.bf16.msra.mxu1 %v4001_v9 }
0x2397   :  { %3811 = vmatprep.subr.bf16.mxu1 %v6666_v22 }
0x239a   :  { %3812 = vmatpush3.bf16.msra.mxu1 %v4002_v41 }
0x239b   :  { %3813 = vmatprep.subr.bf16.mxu1 %v6666_v22 }
0x239e   :  { %3814 = vmatpush3.bf16.msra.mxu1 %v4003_v15 }
0x239f   :  { %3815 = vmatprep.subr.bf16.mxu1 %v6666_v22 }
0x23a2   :  { %3816 = vmatpush3.bf16.msra.mxu1 %v4004_v35 }
0x23a3   :  { %3821 = vmatprep.subr.bf16.mxu1 %v6666_v22 }
0x2457   :  { %v2805_v2 = vpop.f32.mrb[72].mxu0 }
0x2458   :  { %v2806_v25 = vadd.f32 %v2805_v2, %v5060_v29  ;;  %v2807_v24 = vpop.f32.mrb[73].mxu0 }
0x2459   :  { %v2808_v37 = vadd.f32 %v2807_v24, %v6665_v58  ;;  %v2809_v27 = vpop.f32.mrb[74].mxu0 }
0x245a   :  { %v3690_v47 = vmul.f32 -1.442695, %v2806_v25  ;;  %v2810_v36 = vpop.f32.mrb[75].mxu0 }
0x245b   :  { %v2813_v59 = vmul.f32 %v2808_v37, %v4597_v17 }
0x245c   :  { %4331 = vpow2.f32 %v3690_v47 }
0x245d   :  { %v3691_v38 = vmul.f32 -1.442695, %v2813_v59 }
0x245f   :  { %4333 = vpow2.f32 %v3691_v38 }
0x2466   :  { %v4332_v50 = vpop.eup %4331 }
0x2467   :  { %v2820_v40 = vadd.f32 1.0, %v4332_v50 }
0x2469   :  { %v4334_v10 = vpop.eup %4333 }
0x246a   :  { %v2821_v14 = vadd.f32 1.0, %v4334_v10 }
0x246c   :  { %4335 = vrcp.f32 %v2821_v14 }
0x246d   :  { %4337 = vrcp.f32 %v2820_v40 }
0x2476   :  { %v4336_v29 = vpop.eup %4335 }
0x2477   :  { %v2827_v58 = vmul.f32 %v4336_v29, %v4597_v17  ;;  %v4338_v63 = vpop.eup %4337 }
0x2478   :  { %v2830_v28 = vmul.f32 %v4338_v63, %v6384_v6  ;;  %v4008_v6 = vld [vmem:[#allocation2 + $0x98] sm:$0xff]  }
0x2479   :  { %v2829_v0 = vadd.f32 %v2827_v58, %v4602_v31 }
0x247b   :  { %v2831_v5 = vmul.f32 %v4338_v63, %v2829_v0 }
0x247d   :  { %2833 = vrot.lane.b32.xlu0 %v2831_v5, %s4482_s7 }
0x2481   :  { %3099 = vrot.lane.b32.xlu0 %v3088_v26, %s4482_s7 }
0x2485   :  { %3261 = vrot.lane.b32.xlu0 %v3250_v12, %s4482_s7 }
0x24ef   :  { %v2834_v48 = vpop.permute.xlu0 %2833 }
0x24f0   :  { %v2836_v17 = vadd.f32 %v2834_v48, %v2830_v28 }
0x24f2   :  { %4339 = vtanh.f32 %v2836_v17  ;;  %v3412_v31 = vpack.c.bf16 %v2836_v17, %v2836_v17 }
0x24f3   :  { %v3100_v34 = vpop.permute.xlu0 %3099 }
0x24f4   :  { %3818 = vmatmul.mubr.msk.bf16.vlgmr.msra.gmra.mrb[52].mxu1 %vm139_vm1, %v3100_v34  ;;  %3423 = vrot.lane.b32.xlu0 %v3412_v31, %s4482_s7 }
0x24f5   :  { %3822 = vmatpush3.bf16.msra.mxu1 %v4005_v32  ;;  %3829 = vmatprep.mubr.msk.bf16.mxu1 %vm4487_vm3, %v6666_v22 }
0x24f6   :  { %3823 = vmatprep.subr.bf16.mxu1 %v6666_v22 }
0x24f7   :  { %v3262_v39 = vpop.permute.xlu0 %3261 }
0x24f9   :  { %3824 = vmatpush3.bf16.msra.mxu1 %v4006_v56 }
0x24fa   :  { %3825 = vmatprep.subr.bf16.mxu1 %v6666_v22 }
0x24fc   :  { %v4340_v43 = vpop.eup %4339 }
0x24fd   :  { %3826 = vmatpush3.bf16.msra.mxu1 %v4007_v16  ;;  %v2838_v42 = vmul.f32 %v4340_v43, %v2829_v0 }
0x24fe   :  { %3827 = vmatprep.subr.bf16.mxu1 %v6666_v22 }
0x24ff   :  { %v3331_v3 = vpack.c.bf16 %v2838_v42, %v2838_v42 }
0x2501   :  { %3828 = vmatpush3.bf16.msra.mxu1 %v4008_v6  ;;  %3342 = vrot.lane.b32.xlu1 %v3331_v3, %s4482_s7 }
0x2502   :  { %3833 = vmatprep.subr.bf16.mxu1 %v6666_v22 }
0x2504   :  { %3830 = vmatmul.mubr.msk.bf16.vlgmr.msra.gmra.mrb[52].mxu1 %vm139_vm1, %v3181_v21 }
0x2505   :  { %3834 = vmatpush3.bf16.msra.mxu1 %v4009_v52  ;;  %3841 = vmatprep.mubr.msk.bf16.mxu1 %vm4487_vm3, %v6666_v22 }
0x2506   :  { %3835 = vmatprep.subr.bf16.mxu1 %v6666_v22 }
0x2509   :  { %3836 = vmatpush3.bf16.msra.mxu1 %v4010_v23 }
0x250a   :  { %3837 = vmatprep.subr.bf16.mxu1 %v6666_v22 }
0x250d   :  { %3838 = vmatpush3.bf16.msra.mxu1 %v4011_v57 }
0x250e   :  { %3839 = vmatprep.subr.bf16.mxu1 %v6666_v22 }
0x2511   :  { %3840 = vmatpush3.bf16.msra.mxu1 %v4012_v61 }
0x2512   :  { %3845 = vmatprep.subr.bf16.mxu1 %v6666_v22 }
0x2514   :  { %3842 = vmatmul.mubr.msk.bf16.vlgmr.msra.gmra.mrb[52].mxu1 %vm139_vm1, %v3262_v39 }
0x2515   :  { %3846 = vmatpush3.bf16.msra.mxu1 %v4013_v1  ;;  %3853 = vmatprep.mubr.msk.bf16.mxu1 %vm4487_vm3, %v6666_v22 }
0x2516   :  { %3847 = vmatprep.subr.bf16.mxu1 %v6666_v22 }
0x2519   :  { %3848 = vmatpush3.bf16.msra.mxu1 %v4014_v8 }
0x251a   :  { %3849 = vmatprep.subr.bf16.mxu1 %v6666_v22 }
0x251d   :  { %3850 = vmatpush3.bf16.msra.mxu1 %v4015_v30 }
0x251e   :  { %3851 = vmatprep.subr.bf16.mxu1 %v6666_v22 }
0x2521   :  { %3852 = vmatpush3.bf16.msra.mxu1 %v4016_v60 }
0x2522   :  { %3857 = vmatprep.subr.bf16.mxu1 %v6666_v22 }
0x2566   :  { %v3424_v18 = vpop.permute.xlu0 %3423 }
0x2573   :  { %v3343_v19 = vpop.permute.xlu1 %3342 }
0x2574   :  { %3854 = vmatmul.mubr.msk.bf16.vlgmr.msra.gmra.mrb[52].mxu1 %vm139_vm1, %v3343_v19 }
0x2575   :  { %3858 = vmatpush3.bf16.msra.mxu1 %v4017_v45  ;;  %3865 = vmatprep.mubr.msk.bf16.mxu1 %vm4487_vm3, %v6666_v22 }
0x2576   :  { %3859 = vmatprep.subr.bf16.mxu1 %v6666_v22 }
0x2579   :  { %3860 = vmatpush3.bf16.msra.mxu1 %v4018_v51 }
0x257a   :  { %3861 = vmatprep.subr.bf16.mxu1 %v6666_v22 }
0x257d   :  { %3862 = vmatpush3.bf16.msra.mxu1 %v4019_v55 }
0x257e   :  { %3863 = vmatprep.subr.bf16.mxu1 %v6666_v22 }
0x2581   :  { %3864 = vmatpush3.bf16.msra.mxu1 %v4020_v11 }
0x2584   :  { %3866 = vmatmul.mubr.msk.bf16.vlgmr.msra.gmra.mrb[52].mxu1 %vm139_vm1, %v3424_v18 }
0x2657   :  { %v3486_v62 = vpop.f32.mrb[52].mxu1 }
0x2658   :  { %v3869_v49 = vadd.f32 %v3692_v53, %v3486_v62  ;;  %v3867_v4 = vpop.f32.mrb[53].mxu1 }
0x2659   :  { %v3489_v20 = vpop.f32.mrb[54].mxu1 }
0x265a   :  { %3493 = vmax.xlane.f32.xlu1 %v3869_v49  ;;  %v3868_v54 = vpop.f32.mrb[55].mxu1 }
0x26e7   :  { %v3494_v7 = vpop.xlane.xlu1 %3493 }
0x26e8   :  { %v3495_v33 = vsub.f32 %v3869_v49, %v3494_v7 }
0x26ea   :  { %v3496_v13 = vmul.f32 1.442695, %v3495_v33 }
0x26ec   :  { %4341 = vpow2.f32 %v3496_v13 }
0x26f6   :  { %v4342_v44 = vpop.eup %4341 }
0x26f7   :  { %3498 = vadd.xlane.f32.xlu0 %v4342_v44 }
0x2784   :  { %v3499_v22 = vpop.xlane.xlu0 %3498 }
0x2785   :  { %4343 = vrcp.f32 %v3499_v22 }
0x278f   :  { %v4344_v46 = vpop.eup %4343 }
0x2790   :  { %v3501_v9 = vmul.f32 %v4344_v46, %v4342_v44 }
0x2792   :  { %3502 = vst [vmem:[%s6479_s6] sm:$0xff] %v3501_v9 }
0x2793   :  { %3507 = vsyncpa [#allocation3], 1 }

</bundles_post_ra>
